<compile_context>
chip_gen: v7x
topology: tpu7x:2x2x1
jax: 0.10.0
libtpu: 0.0.40
codegen_flags: <defaults>
</compile_context>

<pallas_src>
import functools
import math

import jax
import jax.numpy as jnp
from jax.experimental import pallas as pl
from jax.experimental.pallas import tpu as pltpu


# ----------------------------------------------------------------------------
# Fused kernel: nearest-upsample + pad + Conv2d(k, pad=k//2) + BN(train) + ReLU
# ----------------------------------------------------------------------------
def _dec_block_kernel(x_ref, uw_ref, cmask_ref, w_ref, gamma_ref, beta_ref,
                      o_ref, flat_ref, *, N, Cin, Cout, KH, KW, OH, OW,
                      idx_h, lpad, eps):
    NC = N * Cin                       # rows of the flat activation: (n, cin)
    M = OH * OW
    ph, pw = KH // 2, KW // 2
    rpad = ph * OW + pw                # flat halo needed on each side of data

    # ---- (1) nearest W-upsample: one tiny MXU matmul ------------------------
    # x_ref : (H*N*Cin, W) bf16, rows ordered (h, n, cin)
    # uw_ref: (W, OW)      bf16 0/1 column selector (general nearest indices)
    # Exact: each output element selects exactly one input value.
    xw = jnp.dot(x_ref[...], uw_ref[...],
                 preferred_element_type=jnp.float32)          # (H*NC, OW) f32

    # ---- (2) H-upsample + row-flatten + zero halo into VMEM scratch ---------
    # flat_ref: (NC, lpad + M + rpad) bf16, lane p = lpad + oh*OW + ow.
    # Left halo is rounded up to a 128-lane multiple so the OH block stores
    # land at 32-aligned in-tile offsets (OW multiple of 32) without straddling.
    if lpad > 0:
        flat_ref[:, 0:lpad] = jnp.zeros((NC, lpad), jnp.bfloat16)
    if rpad > 0:
        flat_ref[:, lpad + M:lpad + M + rpad] = jnp.zeros((NC, rpad),
                                                          jnp.bfloat16)
    for oh in range(OH):               # static unroll; idx_h is a Python tuple
        src = idx_h[oh] * NC
        flat_ref[:, lpad + oh * OW:lpad + (oh + 1) * OW] = (
            xw[src:src + NC, :].astype(jnp.bfloat16))

    # ---- (3) conv: per-tap accumulation, N fused via block-diagonal LHS -----
    # Tap (kh, kw) for output lane m is flat lane (base + kh*OW + kw) + m; the
    # vertical padding is handled by the zero halo, the horizontal wrap by the
    # per-kw 0/1 column mask.  w_ref columns are ordered (kh, kw, n, cin) and
    # each (N*Cout, N*Cin) tap block is block-diagonal over n, so one dot per
    # tap covers the whole batch.  No im2col buffer is ever materialised.
    base = lpad - rpad
    acc = jnp.zeros((N * Cout, M), jnp.float32)
    for kh in range(KH):
        for kw in range(KW):
            t = kh * KW + kw
            start = base + kh * OW + kw
            tap = flat_ref[:, start:start + M] * cmask_ref[kw:kw + 1, :]
            acc = acc + jnp.dot(w_ref[:, t * NC:(t + 1) * NC], tap,
                                preferred_element_type=jnp.float32)

    # ---- (4) BatchNorm2d (training mode, biased batch stats) + ReLU ---------
    # Conv bias omitted: it cancels exactly in the mean subtraction.
    # One-pass sum / sum-of-squares (f32 over N*M elements; clamped var).
    cnt = float(N * M)
    rs = jnp.sum(acc, axis=1, keepdims=True)                  # (N*Cout, 1)
    rss = jnp.sum(acc * acc, axis=1, keepdims=True)           # (N*Cout, 1)
    s = rs[0:Cout, :]
    ss = rss[0:Cout, :]
    for n in range(1, N):
        s = s + rs[n * Cout:(n + 1) * Cout, :]
        ss = ss + rss[n * Cout:(n + 1) * Cout, :]
    mean = s / cnt
    var = jnp.maximum(ss / cnt - mean * mean, 0.0)
    scale = gamma_ref[...] * jax.lax.rsqrt(var + eps)         # (Cout, 1)
    shift = beta_ref[...] - mean * scale

    # ---- (5) affine + ReLU, lane-dense (1024-lane) unmasked stores ----------
    for n in range(N):
        yn = acc[n * Cout:(n + 1) * Cout, :] * scale + shift
        o_ref[n] = jnp.maximum(yn, 0.0)


# ----------------------------------------------------------------------------
# Wrapper: layout plumbing + constants, then one fused pallas_call.
# ----------------------------------------------------------------------------
def convnet_dec_block(x, weight, bias, gamma, beta, *, out_shape, kernel_size=5,
                      eps=1e-5):
    """ConvNetDecBlock forward.

    x      : (N, Cin, H, W) float32, NCHW (PyTorch layout)
    weight : (Cout, Cin, KH, KW) float32 (PyTorch Conv2d layout)
    bias   : (Cout,)  -- accepted for fidelity; a mathematical no-op under
             train-mode BatchNorm (cancels in the mean subtraction).
    gamma, beta : (Cout,) BatchNorm2d affine parameters.
    out_shape   : (OH, OW) spatial target of the nearest Upsample.
    Returns (N, Cout, OH, OW) float32.
    """
    # TODO(synk): BatchNorm running_mean/running_var buffer updates (a
    # training-time side effect) are not modeled; only the activation is computed.
    del bias
    N, Cin, H, W = x.shape
    Cout = weight.shape[0]
    KH = KW = kernel_size
    ph, pw = KH // 2, KW // 2
    OH, OW = out_shape
    M = OH * OW
    rpad = ph * OW + pw                       # flat halo actually required
    lpad = ((rpad + 127) // 128) * 128        # round left halo up to a lane tile

    # Nearest-neighbour source indices (matches torch.nn.Upsample(mode='nearest')
    # for exact integer ratios; formula is floor(dst * in/out)).
    idx_h = tuple((oh * H) // OH for oh in range(OH))         # static Python ints
    idx_w = jnp.arange(OW) * W // OW
    uw = jax.nn.one_hot(idx_w, W, dtype=jnp.float32).T        # (W, OW) 0/1
    uw = uw.astype(jnp.bfloat16)

    # Per-kw column-validity masks: zero taps whose horizontal read wraps into
    # the neighbouring row of the flat layout. (Vertical pad = zero halo.)
    ox = jnp.tile(jnp.arange(OW), OH)                          # ox[m] = m % OW
    col = ox[None, :] + jnp.arange(KW)[:, None] - pw           # (KW, M)
    cmask = ((col >= 0) & (col < OW)).astype(jnp.bfloat16)

    # Conv weight as (N*Cout, KH*KW*N*Cin): per tap a block-diagonal
    # (N*Cout, N*Cin) block so ONE dot per tap covers the whole batch.
    # (N is tiny here; for large N loop over samples instead.)
    wt = jnp.transpose(weight, (2, 3, 0, 1))                   # (KH, KW, Cout, Cin)
    eye_n = jnp.eye(N, dtype=weight.dtype)
    w_bd = wt[:, :, None, :, None, :] * eye_n[None, None, :, None, :, None]
    #      -> (KH, KW, N, Cout, N2, Cin); rows (n, cout), cols (kh, kw, n2, cin)
    w_bd = jnp.transpose(w_bd, (2, 3, 0, 1, 4, 5)).reshape(
        N * Cout, KH * KW * N * Cin).astype(jnp.bfloat16)

    # Input rows ordered (h, n, cin) so each oh-block of the flat layout is a
    # contiguous row slice of the W-upsampled activation.
    x2 = jnp.transpose(x, (2, 0, 1, 3)).reshape(H * N * Cin, W)
    x2 = x2.astype(jnp.bfloat16)

    gamma2 = gamma.reshape(Cout, 1).astype(jnp.float32)
    beta2 = beta.reshape(Cout, 1).astype(jnp.float32)

    kernel = functools.partial(_dec_block_kernel, N=N, Cin=Cin, Cout=Cout,
                               KH=KH, KW=KW, OH=OH, OW=OW, idx_h=idx_h,
                               lpad=lpad, eps=eps)

    out = pl.pallas_call(
        kernel,
        out_shape=jax.ShapeDtypeStruct((N, Cout, M), jnp.float32),
        grid=(1,),
        in_specs=[
            pl.BlockSpec((H * N * Cin, W), lambda i: (0, 0)),
            pl.BlockSpec((W, OW), lambda i: (0, 0)),
            pl.BlockSpec((KW, M), lambda i: (0, 0)),
            pl.BlockSpec((N * Cout, KH * KW * N * Cin), lambda i: (0, 0)),
            pl.BlockSpec((Cout, 1), lambda i: (0, 0)),
            pl.BlockSpec((Cout, 1), lambda i: (0, 0)),
        ],
        out_specs=pl.BlockSpec((N, Cout, M), lambda i: (0, 0, 0)),
        scratch_shapes=[pltpu.VMEM((N * Cin, lpad + M + rpad), jnp.bfloat16)],
        compiler_params=pltpu.CompilerParams(
            dimension_semantics=("arbitrary",)),
    )(x2, uw, cmask, w_bd, gamma2, beta2)

    # (N, Cout, OH*OW) -> (N, Cout, OH, OW): layout-preserving reshape.
    return out.reshape(N, Cout, OH, OW)


# ----------------------------------------------------------------------------
# Pure-JAX f32 reference (loose-tolerance sanity check).
# ----------------------------------------------------------------------------
def _reference_forward(x, weight, bias, gamma, beta, out_shape, eps=1e-5):
    N, Cin, H, W = x.shape
    OH, OW = out_shape
    KH = weight.shape[2]
    ph = KH // 2
    idx_h = (jnp.arange(OH) * H) // OH
    idx_w = (jnp.arange(OW) * W) // OW
    xu = x[:, :, idx_h, :][:, :, :, idx_w]
    y = jax.lax.conv_general_dilated(
        xu, weight, window_strides=(1, 1), padding=[(ph, ph), (ph, ph)],
        dimension_numbers=("NCHW", "OIHW", "NCHW"))
    y = y + bias.reshape(1, -1, 1, 1)
    mean = jnp.mean(y, axis=(0, 2, 3), keepdims=True)
    var = jnp.mean((y - mean) ** 2, axis=(0, 2, 3), keepdims=True)
    y = (y - mean) * jax.lax.rsqrt(var + eps)
    y = y * gamma.reshape(1, -1, 1, 1) + beta.reshape(1, -1, 1, 1)
    return jnp.maximum(y, 0.0)


if __name__ == "__main__":
    key = jax.random.PRNGKey(0)
    k_x, k_w, k_b = jax.random.split(key, 3)

    # Small shapes consistent with the module: upsample a (2, 4, 16, 16)
    # feature map to 32x32 and convolve 4 -> 12 channels with a 5x5 kernel.
    N, Cin, H, W = 2, 4, 16, 16
    Cout, ksize = 12, 5
    out_hw = (32, 32)

    x = jax.random.normal(k_x, (N, Cin, H, W), jnp.float32)

    # PyTorch-style Conv2d parameter init bounds; fresh BatchNorm2d affine.
    fan_in = Cin * ksize * ksize
    bound = 1.0 / math.sqrt(fan_in)
    weight = jax.random.uniform(k_w, (Cout, Cin, ksize, ksize), jnp.float32,
                                -bound, bound)
    bias = jax.random.uniform(k_b, (Cout,), jnp.float32, -bound, bound)
    gamma = jnp.ones((Cout,), jnp.float32)
    beta = jnp.zeros((Cout,), jnp.float32)

    fwd = jax.jit(functools.partial(convnet_dec_block, out_shape=out_hw,
                                    kernel_size=ksize))
    out = jax.block_until_ready(fwd(x, weight, bias, gamma, beta))

    assert out.shape == (N, Cout, out_hw[0], out_hw[1]), out.shape
    assert bool(jnp.all(jnp.isfinite(out)))

    # Loose tolerance: kernel matmuls run in bf16 with f32 accumulation.
    ref = _reference_forward(x, weight, bias, gamma, beta, out_hw)
    max_err = float(jnp.max(jnp.abs(out - ref)))
    assert max_err < 1e-1, f"max abs err vs f32 reference: {max_err}"

    print("KERNEL_OK")
</pallas_src>

<mosaic_0001>
module attributes {stable_mosaic.version = 11 : i64} {
  func.func @_dec_block_kernel(%arg0: i32, %arg1: memref<128x16xbf16, #tpu.memory_space<vmem>>, %arg2: memref<16x32xbf16, #tpu.memory_space<vmem>>, %arg3: memref<5x1024xbf16, #tpu.memory_space<vmem>>, %arg4: memref<24x200xbf16, #tpu.memory_space<vmem>>, %arg5: memref<12x1xf32, #tpu.memory_space<vmem>>, %arg6: memref<12x1xf32, #tpu.memory_space<vmem>>, %arg7: memref<2x12x1024xf32, #tpu.memory_space<vmem>>, %arg8: memref<8x1218xbf16, #tpu.memory_space<vmem>>) attributes {dimension_semantics = [#tpu.dimension_semantics<arbitrary>], iteration_bounds = array<i64: 1>, scalar_prefetch = 0 : i64, scratch_operands = 1 : i64, tpu.core_type = #tpu.core_type<tc>, window_params = [{pipeline_mode = #tpu.pipeline_mode<synchronous>, transform_indices = @transform_0, window_bounds = array<i64: 128, 16>}, {pipeline_mode = #tpu.pipeline_mode<synchronous>, transform_indices = @transform_1, window_bounds = array<i64: 16, 32>}, {pipeline_mode = #tpu.pipeline_mode<synchronous>, transform_indices = @transform_2, window_bounds = array<i64: 5, 1024>}, {pipeline_mode = #tpu.pipeline_mode<synchronous>, transform_indices = @transform_3, window_bounds = array<i64: 24, 200>}, {pipeline_mode = #tpu.pipeline_mode<synchronous>, transform_indices = @transform_4, window_bounds = array<i64: 12, 1>}, {pipeline_mode = #tpu.pipeline_mode<synchronous>, transform_indices = @transform_5, window_bounds = array<i64: 12, 1>}, {pipeline_mode = #tpu.pipeline_mode<synchronous>, transform_indices = @transform_6, window_bounds = array<i64: 2, 12, 1024>}]} {
    %c0 = arith.constant 0 : index
    %c0_0 = arith.constant 0 : index
    %0 = vector.load %arg1[%c0, %c0_0] : memref<128x16xbf16, #tpu.memory_space<vmem>>, vector<128x16xbf16>
    %c0_1 = arith.constant 0 : index
    %c0_2 = arith.constant 0 : index
    %1 = vector.load %arg2[%c0_1, %c0_2] : memref<16x32xbf16, #tpu.memory_space<vmem>>, vector<16x32xbf16>
    %cst = arith.constant dense<0.000000e+00> : vector<128x32xf32>
    %2 = tpu.matmul %0, %1, %cst {dimension_numbers = #tpu.dot_dimension_numbers<[1], [0], [0], [1], [0, 0, 1, 1], [], []>} : vector<128x16xbf16>, vector<16x32xbf16>, vector<128x32xf32> -> vector<128x32xf32>
    %cst_3 = arith.constant 0.000000e+00 : bf16
    %3 = vector.broadcast %cst_3 : bf16 to vector<8x128xbf16>
    %c0_4 = arith.constant 0 : index
    %c0_5 = arith.constant 0 : index
    %4 = vector.load %arg8[%c0_4, %c0_5] : memref<8x1218xbf16, #tpu.memory_space<vmem>>, vector<8x128xbf16>
    tpu.vector_store %arg8[%c0_4, %c0_5], %3 {strides = array<i32>} : memref<8x1218xbf16, #tpu.memory_space<vmem>>, vector<8x128xbf16>,
    %cst_6 = arith.constant 0.000000e+00 : bf16
    %5 = vector.broadcast %cst_6 : bf16 to vector<8x66xbf16>
    %c0_7 = arith.constant 0 : index
    %c1152 = arith.constant 1152 : index
    %6 = vector.load %arg8[%c0_7, %c1152] : memref<8x1218xbf16, #tpu.memory_space<vmem>>, vector<8x66xbf16>
    tpu.vector_store %arg8[%c0_7, %c1152], %5 {strides = array<i32>} : memref<8x1218xbf16, #tpu.memory_space<vmem>>, vector<8x66xbf16>,
    %7 = vector.extract_strided_slice %2 {offsets = [0, 0], sizes = [8, 32], strides = [1, 1]} : vector<128x32xf32> to vector<8x32xf32>
    %8 = arith.truncf %7 : vector<8x32xf32> to vector<8x32xbf16>
    %c0_8 = arith.constant 0 : index
    %c128 = arith.constant 128 : index
    %9 = vector.load %arg8[%c0_8, %c128] : memref<8x1218xbf16, #tpu.memory_space<vmem>>, vector<8x32xbf16>
    tpu.vector_store %arg8[%c0_8, %c128], %8 {strides = array<i32>} : memref<8x1218xbf16, #tpu.memory_space<vmem>>, vector<8x32xbf16>,
    %10 = vector.extract_strided_slice %2 {offsets = [0, 0], sizes = [8, 32], strides = [1, 1]} : vector<128x32xf32> to vector<8x32xf32>
    %11 = arith.truncf %10 : vector<8x32xf32> to vector<8x32xbf16>
    %c0_9 = arith.constant 0 : index
    %c160 = arith.constant 160 : index
    %12 = vector.load %arg8[%c0_9, %c160] : memref<8x1218xbf16, #tpu.memory_space<vmem>>, vector<8x32xbf16>
    tpu.vector_store %arg8[%c0_9, %c160], %11 {strides = array<i32>} : memref<8x1218xbf16, #tpu.memory_space<vmem>>, vector<8x32xbf16>,
    %13 = vector.extract_strided_slice %2 {offsets = [8, 0], sizes = [8, 32], strides = [1, 1]} : vector<128x32xf32> to vector<8x32xf32>
    %14 = arith.truncf %13 : vector<8x32xf32> to vector<8x32xbf16>
    %c0_10 = arith.constant 0 : index
    %c192 = arith.constant 192 : index
    %15 = vector.load %arg8[%c0_10, %c192] : memref<8x1218xbf16, #tpu.memory_space<vmem>>, vector<8x32xbf16>
    tpu.vector_store %arg8[%c0_10, %c192], %14 {strides = array<i32>} : memref<8x1218xbf16, #tpu.memory_space<vmem>>, vector<8x32xbf16>,
    %16 = vector.extract_strided_slice %2 {offsets = [8, 0], sizes = [8, 32], strides = [1, 1]} : vector<128x32xf32> to vector<8x32xf32>
    %17 = arith.truncf %16 : vector<8x32xf32> to vector<8x32xbf16>
    %c0_11 = arith.constant 0 : index
    %c224 = arith.constant 224 : index
    %18 = vector.load %arg8[%c0_11, %c224] : memref<8x1218xbf16, #tpu.memory_space<vmem>>, vector<8x32xbf16>
    tpu.vector_store %arg8[%c0_11, %c224], %17 {strides = array<i32>} : memref<8x1218xbf16, #tpu.memory_space<vmem>>, vector<8x32xbf16>,
    %19 = vector.extract_strided_slice %2 {offsets = [16, 0], sizes = [8, 32], strides = [1, 1]} : vector<128x32xf32> to vector<8x32xf32>
    %20 = arith.truncf %19 : vector<8x32xf32> to vector<8x32xbf16>
    %c0_12 = arith.constant 0 : index
    %c256 = arith.constant 256 : index
    %21 = vector.load %arg8[%c0_12, %c256] : memref<8x1218xbf16, #tpu.memory_space<vmem>>, vector<8x32xbf16>
    tpu.vector_store %arg8[%c0_12, %c256], %20 {strides = array<i32>} : memref<8x1218xbf16, #tpu.memory_space<vmem>>, vector<8x32xbf16>,
    %22 = vector.extract_strided_slice %2 {offsets = [16, 0], sizes = [8, 32], strides = [1, 1]} : vector<128x32xf32> to vector<8x32xf32>
    %23 = arith.truncf %22 : vector<8x32xf32> to vector<8x32xbf16>
    %c0_13 = arith.constant 0 : index
    %c288 = arith.constant 288 : index
    %24 = vector.load %arg8[%c0_13, %c288] : memref<8x1218xbf16, #tpu.memory_space<vmem>>, vector<8x32xbf16>
    tpu.vector_store %arg8[%c0_13, %c288], %23 {strides = array<i32>} : memref<8x1218xbf16, #tpu.memory_space<vmem>>, vector<8x32xbf16>,
    %25 = vector.extract_strided_slice %2 {offsets = [24, 0], sizes = [8, 32], strides = [1, 1]} : vector<128x32xf32> to vector<8x32xf32>
    %26 = arith.truncf %25 : vector<8x32xf32> to vector<8x32xbf16>
    %c0_14 = arith.constant 0 : index
    %c320 = arith.constant 320 : index
    %27 = vector.load %arg8[%c0_14, %c320] : memref<8x1218xbf16, #tpu.memory_space<vmem>>, vector<8x32xbf16>
    tpu.vector_store %arg8[%c0_14, %c320], %26 {strides = array<i32>} : memref<8x1218xbf16, #tpu.memory_space<vmem>>, vector<8x32xbf16>,
    %28 = vector.extract_strided_slice %2 {offsets = [24, 0], sizes = [8, 32], strides = [1, 1]} : vector<128x32xf32> to vector<8x32xf32>
    %29 = arith.truncf %28 : vector<8x32xf32> to vector<8x32xbf16>
    %c0_15 = arith.constant 0 : index
    %c352 = arith.constant 352 : index
    %30 = vector.load %arg8[%c0_15, %c352] : memref<8x1218xbf16, #tpu.memory_space<vmem>>, vector<8x32xbf16>
    tpu.vector_store %arg8[%c0_15, %c352], %29 {strides = array<i32>} : memref<8x1218xbf16, #tpu.memory_space<vmem>>, vector<8x32xbf16>,
    %31 = vector.extract_strided_slice %2 {offsets = [32, 0], sizes = [8, 32], strides = [1, 1]} : vector<128x32xf32> to vector<8x32xf32>
    %32 = arith.truncf %31 : vector<8x32xf32> to vector<8x32xbf16>
    %c0_16 = arith.constant 0 : index
    %c384 = arith.constant 384 : index
    %33 = vector.load %arg8[%c0_16, %c384] : memref<8x1218xbf16, #tpu.memory_space<vmem>>, vector<8x32xbf16>
    tpu.vector_store %arg8[%c0_16, %c384], %32 {strides = array<i32>} : memref<8x1218xbf16, #tpu.memory_space<vmem>>, vector<8x32xbf16>,
    %34 = vector.extract_strided_slice %2 {offsets = [32, 0], sizes = [8, 32], strides = [1, 1]} : vector<128x32xf32> to vector<8x32xf32>
    %35 = arith.truncf %34 : vector<8x32xf32> to vector<8x32xbf16>
    %c0_17 = arith.constant 0 : index
    %c416 = arith.constant 416 : index
    %36 = vector.load %arg8[%c0_17, %c416] : memref<8x1218xbf16, #tpu.memory_space<vmem>>, vector<8x32xbf16>
    tpu.vector_store %arg8[%c0_17, %c416], %35 {strides = array<i32>} : memref<8x1218xbf16, #tpu.memory_space<vmem>>, vector<8x32xbf16>,
    %37 = vector.extract_strided_slice %2 {offsets = [40, 0], sizes = [8, 32], strides = [1, 1]} : vector<128x32xf32> to vector<8x32xf32>
    %38 = arith.truncf %37 : vector<8x32xf32> to vector<8x32xbf16>
    %c0_18 = arith.constant 0 : index
    %c448 = arith.constant 448 : index
    %39 = vector.load %arg8[%c0_18, %c448] : memref<8x1218xbf16, #tpu.memory_space<vmem>>, vector<8x32xbf16>
    tpu.vector_store %arg8[%c0_18, %c448], %38 {strides = array<i32>} : memref<8x1218xbf16, #tpu.memory_space<vmem>>, vector<8x32xbf16>,
    %40 = vector.extract_strided_slice %2 {offsets = [40, 0], sizes = [8, 32], strides = [1, 1]} : vector<128x32xf32> to vector<8x32xf32>
    %41 = arith.truncf %40 : vector<8x32xf32> to vector<8x32xbf16>
    %c0_19 = arith.constant 0 : index
    %c480 = arith.constant 480 : index
    %42 = vector.load %arg8[%c0_19, %c480] : memref<8x1218xbf16, #tpu.memory_space<vmem>>, vector<8x32xbf16>
    tpu.vector_store %arg8[%c0_19, %c480], %41 {strides = array<i32>} : memref<8x1218xbf16, #tpu.memory_space<vmem>>, vector<8x32xbf16>,
    %43 = vector.extract_strided_slice %2 {offsets = [48, 0], sizes = [8, 32], strides = [1, 1]} : vector<128x32xf32> to vector<8x32xf32>
    %44 = arith.truncf %43 : vector<8x32xf32> to vector<8x32xbf16>
    %c0_20 = arith.constant 0 : index
    %c512 = arith.constant 512 : index
    %45 = vector.load %arg8[%c0_20, %c512] : memref<8x1218xbf16, #tpu.memory_space<vmem>>, vector<8x32xbf16>
    tpu.vector_store %arg8[%c0_20, %c512], %44 {strides = array<i32>} : memref<8x1218xbf16, #tpu.memory_space<vmem>>, vector<8x32xbf16>,
    %46 = vector.extract_strided_slice %2 {offsets = [48, 0], sizes = [8, 32], strides = [1, 1]} : vector<128x32xf32> to vector<8x32xf32>
    %47 = arith.truncf %46 : vector<8x32xf32> to vector<8x32xbf16>
    %c0_21 = arith.constant 0 : index
    %c544 = arith.constant 544 : index
    %48 = vector.load %arg8[%c0_21, %c544] : memref<8x1218xbf16, #tpu.memory_space<vmem>>, vector<8x32xbf16>
    tpu.vector_store %arg8[%c0_21, %c544], %47 {strides = array<i32>} : memref<8x1218xbf16, #tpu.memory_space<vmem>>, vector<8x32xbf16>,
    %49 = vector.extract_strided_slice %2 {offsets = [56, 0], sizes = [8, 32], strides = [1, 1]} : vector<128x32xf32> to vector<8x32xf32>
    %50 = arith.truncf %49 : vector<8x32xf32> to vector<8x32xbf16>
    %c0_22 = arith.constant 0 : index
    %c576 = arith.constant 576 : index
    %51 = vector.load %arg8[%c0_22, %c576] : memref<8x1218xbf16, #tpu.memory_space<vmem>>, vector<8x32xbf16>
    tpu.vector_store %arg8[%c0_22, %c576], %50 {strides = array<i32>} : memref<8x1218xbf16, #tpu.memory_space<vmem>>, vector<8x32xbf16>,
    %52 = vector.extract_strided_slice %2 {offsets = [56, 0], sizes = [8, 32], strides = [1, 1]} : vector<128x32xf32> to vector<8x32xf32>
    %53 = arith.truncf %52 : vector<8x32xf32> to vector<8x32xbf16>
    %c0_23 = arith.constant 0 : index
    %c608 = arith.constant 608 : index
    %54 = vector.load %arg8[%c0_23, %c608] : memref<8x1218xbf16, #tpu.memory_space<vmem>>, vector<8x32xbf16>
    tpu.vector_store %arg8[%c0_23, %c608], %53 {strides = array<i32>} : memref<8x1218xbf16, #tpu.memory_space<vmem>>, vector<8x32xbf16>,
    %55 = vector.extract_strided_slice %2 {offsets = [64, 0], sizes = [8, 32], strides = [1, 1]} : vector<128x32xf32> to vector<8x32xf32>
    %56 = arith.truncf %55 : vector<8x32xf32> to vector<8x32xbf16>
    %c0_24 = arith.constant 0 : index
    %c640 = arith.constant 640 : index
    %57 = vector.load %arg8[%c0_24, %c640] : memref<8x1218xbf16, #tpu.memory_space<vmem>>, vector<8x32xbf16>
    tpu.vector_store %arg8[%c0_24, %c640], %56 {strides = array<i32>} : memref<8x1218xbf16, #tpu.memory_space<vmem>>, vector<8x32xbf16>,
    %58 = vector.extract_strided_slice %2 {offsets = [64, 0], sizes = [8, 32], strides = [1, 1]} : vector<128x32xf32> to vector<8x32xf32>
    %59 = arith.truncf %58 : vector<8x32xf32> to vector<8x32xbf16>
    %c0_25 = arith.constant 0 : index
    %c672 = arith.constant 672 : index
    %60 = vector.load %arg8[%c0_25, %c672] : memref<8x1218xbf16, #tpu.memory_space<vmem>>, vector<8x32xbf16>
    tpu.vector_store %arg8[%c0_25, %c672], %59 {strides = array<i32>} : memref<8x1218xbf16, #tpu.memory_space<vmem>>, vector<8x32xbf16>,
    %61 = vector.extract_strided_slice %2 {offsets = [72, 0], sizes = [8, 32], strides = [1, 1]} : vector<128x32xf32> to vector<8x32xf32>
    %62 = arith.truncf %61 : vector<8x32xf32> to vector<8x32xbf16>
    %c0_26 = arith.constant 0 : index
    %c704 = arith.constant 704 : index
    %63 = vector.load %arg8[%c0_26, %c704] : memref<8x1218xbf16, #tpu.memory_space<vmem>>, vector<8x32xbf16>
    tpu.vector_store %arg8[%c0_26, %c704], %62 {strides = array<i32>} : memref<8x1218xbf16, #tpu.memory_space<vmem>>, vector<8x32xbf16>,
    %64 = vector.extract_strided_slice %2 {offsets = [72, 0], sizes = [8, 32], strides = [1, 1]} : vector<128x32xf32> to vector<8x32xf32>
    %65 = arith.truncf %64 : vector<8x32xf32> to vector<8x32xbf16>
    %c0_27 = arith.constant 0 : index
    %c736 = arith.constant 736 : index
    %66 = vector.load %arg8[%c0_27, %c736] : memref<8x1218xbf16, #tpu.memory_space<vmem>>, vector<8x32xbf16>
    tpu.vector_store %arg8[%c0_27, %c736], %65 {strides = array<i32>} : memref<8x1218xbf16, #tpu.memory_space<vmem>>, vector<8x32xbf16>,
    %67 = vector.extract_strided_slice %2 {offsets = [80, 0], sizes = [8, 32], strides = [1, 1]} : vector<128x32xf32> to vector<8x32xf32>
    %68 = arith.truncf %67 : vector<8x32xf32> to vector<8x32xbf16>
    %c0_28 = arith.constant 0 : index
    %c768 = arith.constant 768 : index
    %69 = vector.load %arg8[%c0_28, %c768] : memref<8x1218xbf16, #tpu.memory_space<vmem>>, vector<8x32xbf16>
    tpu.vector_store %arg8[%c0_28, %c768], %68 {strides = array<i32>} : memref<8x1218xbf16, #tpu.memory_space<vmem>>, vector<8x32xbf16>,
    %70 = vector.extract_strided_slice %2 {offsets = [80, 0], sizes = [8, 32], strides = [1, 1]} : vector<128x32xf32> to vector<8x32xf32>
    %71 = arith.truncf %70 : vector<8x32xf32> to vector<8x32xbf16>
    %c0_29 = arith.constant 0 : index
    %c800 = arith.constant 800 : index
    %72 = vector.load %arg8[%c0_29, %c800] : memref<8x1218xbf16, #tpu.memory_space<vmem>>, vector<8x32xbf16>
    tpu.vector_store %arg8[%c0_29, %c800], %71 {strides = array<i32>} : memref<8x1218xbf16, #tpu.memory_space<vmem>>, vector<8x32xbf16>,
    %73 = vector.extract_strided_slice %2 {offsets = [88, 0], sizes = [8, 32], strides = [1, 1]} : vector<128x32xf32> to vector<8x32xf32>
    %74 = arith.truncf %73 : vector<8x32xf32> to vector<8x32xbf16>
    %c0_30 = arith.constant 0 : index
    %c832 = arith.constant 832 : index
    %75 = vector.load %arg8[%c0_30, %c832] : memref<8x1218xbf16, #tpu.memory_space<vmem>>, vector<8x32xbf16>
    tpu.vector_store %arg8[%c0_30, %c832], %74 {strides = array<i32>} : memref<8x1218xbf16, #tpu.memory_space<vmem>>, vector<8x32xbf16>,
    %76 = vector.extract_strided_slice %2 {offsets = [88, 0], sizes = [8, 32], strides = [1, 1]} : vector<128x32xf32> to vector<8x32xf32>
    %77 = arith.truncf %76 : vector<8x32xf32> to vector<8x32xbf16>
    %c0_31 = arith.constant 0 : index
    %c864 = arith.constant 864 : index
    %78 = vector.load %arg8[%c0_31, %c864] : memref<8x1218xbf16, #tpu.memory_space<vmem>>, vector<8x32xbf16>
    tpu.vector_store %arg8[%c0_31, %c864], %77 {strides = array<i32>} : memref<8x1218xbf16, #tpu.memory_space<vmem>>, vector<8x32xbf16>,
    %79 = vector.extract_strided_slice %2 {offsets = [96, 0], sizes = [8, 32], strides = [1, 1]} : vector<128x32xf32> to vector<8x32xf32>
    %80 = arith.truncf %79 : vector<8x32xf32> to vector<8x32xbf16>
    %c0_32 = arith.constant 0 : index
    %c896 = arith.constant 896 : index
    %81 = vector.load %arg8[%c0_32, %c896] : memref<8x1218xbf16, #tpu.memory_space<vmem>>, vector<8x32xbf16>
    tpu.vector_store %arg8[%c0_32, %c896], %80 {strides = array<i32>} : memref<8x1218xbf16, #tpu.memory_space<vmem>>, vector<8x32xbf16>,
    %82 = vector.extract_strided_slice %2 {offsets = [96, 0], sizes = [8, 32], strides = [1, 1]} : vector<128x32xf32> to vector<8x32xf32>
    %83 = arith.truncf %82 : vector<8x32xf32> to vector<8x32xbf16>
    %c0_33 = arith.constant 0 : index
    %c928 = arith.constant 928 : index
    %84 = vector.load %arg8[%c0_33, %c928] : memref<8x1218xbf16, #tpu.memory_space<vmem>>, vector<8x32xbf16>
    tpu.vector_store %arg8[%c0_33, %c928], %83 {strides = array<i32>} : memref<8x1218xbf16, #tpu.memory_space<vmem>>, vector<8x32xbf16>,
    %85 = vector.extract_strided_slice %2 {offsets = [104, 0], sizes = [8, 32], strides = [1, 1]} : vector<128x32xf32> to vector<8x32xf32>
    %86 = arith.truncf %85 : vector<8x32xf32> to vector<8x32xbf16>
    %c0_34 = arith.constant 0 : index
    %c960 = arith.constant 960 : index
    %87 = vector.load %arg8[%c0_34, %c960] : memref<8x1218xbf16, #tpu.memory_space<vmem>>, vector<8x32xbf16>
    tpu.vector_store %arg8[%c0_34, %c960], %86 {strides = array<i32>} : memref<8x1218xbf16, #tpu.memory_space<vmem>>, vector<8x32xbf16>,
    %88 = vector.extract_strided_slice %2 {offsets = [104, 0], sizes = [8, 32], strides = [1, 1]} : vector<128x32xf32> to vector<8x32xf32>
    %89 = arith.truncf %88 : vector<8x32xf32> to vector<8x32xbf16>
    %c0_35 = arith.constant 0 : index
    %c992 = arith.constant 992 : index
    %90 = vector.load %arg8[%c0_35, %c992] : memref<8x1218xbf16, #tpu.memory_space<vmem>>, vector<8x32xbf16>
    tpu.vector_store %arg8[%c0_35, %c992], %89 {strides = array<i32>} : memref<8x1218xbf16, #tpu.memory_space<vmem>>, vector<8x32xbf16>,
    %91 = vector.extract_strided_slice %2 {offsets = [112, 0], sizes = [8, 32], strides = [1, 1]} : vector<128x32xf32> to vector<8x32xf32>
    %92 = arith.truncf %91 : vector<8x32xf32> to vector<8x32xbf16>
    %c0_36 = arith.constant 0 : index
    %c1024 = arith.constant 1024 : index
    %93 = vector.load %arg8[%c0_36, %c1024] : memref<8x1218xbf16, #tpu.memory_space<vmem>>, vector<8x32xbf16>
    tpu.vector_store %arg8[%c0_36, %c1024], %92 {strides = array<i32>} : memref<8x1218xbf16, #tpu.memory_space<vmem>>, vector<8x32xbf16>,
    %94 = vector.extract_strided_slice %2 {offsets = [112, 0], sizes = [8, 32], strides = [1, 1]} : vector<128x32xf32> to vector<8x32xf32>
    %95 = arith.truncf %94 : vector<8x32xf32> to vector<8x32xbf16>
    %c0_37 = arith.constant 0 : index
    %c1056 = arith.constant 1056 : index
    %96 = vector.load %arg8[%c0_37, %c1056] : memref<8x1218xbf16, #tpu.memory_space<vmem>>, vector<8x32xbf16>
    tpu.vector_store %arg8[%c0_37, %c1056], %95 {strides = array<i32>} : memref<8x1218xbf16, #tpu.memory_space<vmem>>, vector<8x32xbf16>,
    %97 = vector.extract_strided_slice %2 {offsets = [120, 0], sizes = [8, 32], strides = [1, 1]} : vector<128x32xf32> to vector<8x32xf32>
    %98 = arith.truncf %97 : vector<8x32xf32> to vector<8x32xbf16>
    %c0_38 = arith.constant 0 : index
    %c1088 = arith.constant 1088 : index
    %99 = vector.load %arg8[%c0_38, %c1088] : memref<8x1218xbf16, #tpu.memory_space<vmem>>, vector<8x32xbf16>
    tpu.vector_store %arg8[%c0_38, %c1088], %98 {strides = array<i32>} : memref<8x1218xbf16, #tpu.memory_space<vmem>>, vector<8x32xbf16>,
    %100 = vector.extract_strided_slice %2 {offsets = [120, 0], sizes = [8, 32], strides = [1, 1]} : vector<128x32xf32> to vector<8x32xf32>
    %101 = arith.truncf %100 : vector<8x32xf32> to vector<8x32xbf16>
    %c0_39 = arith.constant 0 : index
    %c1120 = arith.constant 1120 : index
    %102 = vector.load %arg8[%c0_39, %c1120] : memref<8x1218xbf16, #tpu.memory_space<vmem>>, vector<8x32xbf16>
    tpu.vector_store %arg8[%c0_39, %c1120], %101 {strides = array<i32>} : memref<8x1218xbf16, #tpu.memory_space<vmem>>, vector<8x32xbf16>,
    %cst_40 = arith.constant 0.000000e+00 : f32
    %103 = vector.broadcast %cst_40 : f32 to vector<24x1024xf32>
    %c0_41 = arith.constant 0 : index
    %c62 = arith.constant 62 : index
    %104 = vector.load %arg8[%c0_41, %c62] : memref<8x1218xbf16, #tpu.memory_space<vmem>>, vector<8x1024xbf16>
    %c0_42 = arith.constant 0 : index
    %c0_43 = arith.constant 0 : index
    %105 = vector.load %arg3[%c0_42, %c0_43] : memref<5x1024xbf16, #tpu.memory_space<vmem>>, vector<1x1024xbf16>
    %106 = vector.broadcast %105 : vector<1x1024xbf16> to vector<8x1024xbf16>
    %107 = arith.mulf %104, %106 : vector<8x1024xbf16>
    %c0_44 = arith.constant 0 : index
    %c0_45 = arith.constant 0 : index
    %108 = vector.load %arg4[%c0_44, %c0_45] : memref<24x200xbf16, #tpu.memory_space<vmem>>, vector<24x8xbf16>
    %cst_46 = arith.constant dense<0.000000e+00> : vector<24x1024xf32>
    %109 = tpu.matmul %108, %107, %cst_46 {dimension_numbers = #tpu.dot_dimension_numbers<[1], [0], [0], [1], [0, 0, 1, 1], [], []>} : vector<24x8xbf16>, vector<8x1024xbf16>, vector<24x1024xf32> -> vector<24x1024xf32>
    %110 = arith.addf %103, %109 : vector<24x1024xf32>
    %c0_47 = arith.constant 0 : index
    %c63 = arith.constant 63 : index
    %111 = vector.load %arg8[%c0_47, %c63] : memref<8x1218xbf16, #tpu.memory_space<vmem>>, vector<8x1024xbf16>
    %c1 = arith.constant 1 : index
    %c0_48 = arith.constant 0 : index
    %112 = vector.load %arg3[%c1, %c0_48] : memref<5x1024xbf16, #tpu.memory_space<vmem>>, vector<1x1024xbf16>
    %113 = vector.broadcast %112 : vector<1x1024xbf16> to vector<8x1024xbf16>
    %114 = arith.mulf %111, %113 : vector<8x1024xbf16>
    %c0_49 = arith.constant 0 : index
    %c8 = arith.constant 8 : index
    %115 = vector.load %arg4[%c0_49, %c8] : memref<24x200xbf16, #tpu.memory_space<vmem>>, vector<24x8xbf16>
    %cst_50 = arith.constant dense<0.000000e+00> : vector<24x1024xf32>
    %116 = tpu.matmul %115, %114, %cst_50 {dimension_numbers = #tpu.dot_dimension_numbers<[1], [0], [0], [1], [0, 0, 1, 1], [], []>} : vector<24x8xbf16>, vector<8x1024xbf16>, vector<24x1024xf32> -> vector<24x1024xf32>
    %117 = arith.addf %110, %116 : vector<24x1024xf32>
    %c0_51 = arith.constant 0 : index
    %c64 = arith.constant 64 : index
    %118 = vector.load %arg8[%c0_51, %c64] : memref<8x1218xbf16, #tpu.memory_space<vmem>>, vector<8x1024xbf16>
    %c2 = arith.constant 2 : index
    %c0_52 = arith.constant 0 : index
    %119 = vector.load %arg3[%c2, %c0_52] : memref<5x1024xbf16, #tpu.memory_space<vmem>>, vector<1x1024xbf16>
    %120 = vector.broadcast %119 : vector<1x1024xbf16> to vector<8x1024xbf16>
    %121 = arith.mulf %118, %120 : vector<8x1024xbf16>
    %c0_53 = arith.constant 0 : index
    %c16 = arith.constant 16 : index
    %122 = vector.load %arg4[%c0_53, %c16] : memref<24x200xbf16, #tpu.memory_space<vmem>>, vector<24x8xbf16>
    %cst_54 = arith.constant dense<0.000000e+00> : vector<24x1024xf32>
    %123 = tpu.matmul %122, %121, %cst_54 {dimension_numbers = #tpu.dot_dimension_numbers<[1], [0], [0], [1], [0, 0, 1, 1], [], []>} : vector<24x8xbf16>, vector<8x1024xbf16>, vector<24x1024xf32> -> vector<24x1024xf32>
    %124 = arith.addf %117, %123 : vector<24x1024xf32>
    %c0_55 = arith.constant 0 : index
    %c65 = arith.constant 65 : index
    %125 = vector.load %arg8[%c0_55, %c65] : memref<8x1218xbf16, #tpu.memory_space<vmem>>, vector<8x1024xbf16>
    %c3 = arith.constant 3 : index
    %c0_56 = arith.constant 0 : index
    %126 = vector.load %arg3[%c3, %c0_56] : memref<5x1024xbf16, #tpu.memory_space<vmem>>, vector<1x1024xbf16>
    %127 = vector.broadcast %126 : vector<1x1024xbf16> to vector<8x1024xbf16>
    %128 = arith.mulf %125, %127 : vector<8x1024xbf16>
    %c0_57 = arith.constant 0 : index
    %c24 = arith.constant 24 : index
    %129 = vector.load %arg4[%c0_57, %c24] : memref<24x200xbf16, #tpu.memory_space<vmem>>, vector<24x8xbf16>
    %cst_58 = arith.constant dense<0.000000e+00> : vector<24x1024xf32>
    %130 = tpu.matmul %129, %128, %cst_58 {dimension_numbers = #tpu.dot_dimension_numbers<[1], [0], [0], [1], [0, 0, 1, 1], [], []>} : vector<24x8xbf16>, vector<8x1024xbf16>, vector<24x1024xf32> -> vector<24x1024xf32>
    %131 = arith.addf %124, %130 : vector<24x1024xf32>
    %c0_59 = arith.constant 0 : index
    %c66 = arith.constant 66 : index
    %132 = vector.load %arg8[%c0_59, %c66] : memref<8x1218xbf16, #tpu.memory_space<vmem>>, vector<8x1024xbf16>
    %c4 = arith.constant 4 : index
    %c0_60 = arith.constant 0 : index
    %133 = vector.load %arg3[%c4, %c0_60] : memref<5x1024xbf16, #tpu.memory_space<vmem>>, vector<1x1024xbf16>
    %134 = vector.broadcast %133 : vector<1x1024xbf16> to vector<8x1024xbf16>
    %135 = arith.mulf %132, %134 : vector<8x1024xbf16>
    %c0_61 = arith.constant 0 : index
    %c32 = arith.constant 32 : index
    %136 = vector.load %arg4[%c0_61, %c32] : memref<24x200xbf16, #tpu.memory_space<vmem>>, vector<24x8xbf16>
    %cst_62 = arith.constant dense<0.000000e+00> : vector<24x1024xf32>
    %137 = tpu.matmul %136, %135, %cst_62 {dimension_numbers = #tpu.dot_dimension_numbers<[1], [0], [0], [1], [0, 0, 1, 1], [], []>} : vector<24x8xbf16>, vector<8x1024xbf16>, vector<24x1024xf32> -> vector<24x1024xf32>
    %138 = arith.addf %131, %137 : vector<24x1024xf32>
    %c0_63 = arith.constant 0 : index
    %c94 = arith.constant 94 : index
    %139 = vector.load %arg8[%c0_63, %c94] : memref<8x1218xbf16, #tpu.memory_space<vmem>>, vector<8x1024xbf16>
    %c0_64 = arith.constant 0 : index
    %c0_65 = arith.constant 0 : index
    %140 = vector.load %arg3[%c0_64, %c0_65] : memref<5x1024xbf16, #tpu.memory_space<vmem>>, vector<1x1024xbf16>
    %141 = vector.broadcast %140 : vector<1x1024xbf16> to vector<8x1024xbf16>
    %142 = arith.mulf %139, %141 : vector<8x1024xbf16>
    %c0_66 = arith.constant 0 : index
    %c40 = arith.constant 40 : index
    %143 = vector.load %arg4[%c0_66, %c40] : memref<24x200xbf16, #tpu.memory_space<vmem>>, vector<24x8xbf16>
    %cst_67 = arith.constant dense<0.000000e+00> : vector<24x1024xf32>
    %144 = tpu.matmul %143, %142, %cst_67 {dimension_numbers = #tpu.dot_dimension_numbers<[1], [0], [0], [1], [0, 0, 1, 1], [], []>} : vector<24x8xbf16>, vector<8x1024xbf16>, vector<24x1024xf32> -> vector<24x1024xf32>
    %145 = arith.addf %138, %144 : vector<24x1024xf32>
    %c0_68 = arith.constant 0 : index
    %c95 = arith.constant 95 : index
    %146 = vector.load %arg8[%c0_68, %c95] : memref<8x1218xbf16, #tpu.memory_space<vmem>>, vector<8x1024xbf16>
    %c1_69 = arith.constant 1 : index
    %c0_70 = arith.constant 0 : index
    %147 = vector.load %arg3[%c1_69, %c0_70] : memref<5x1024xbf16, #tpu.memory_space<vmem>>, vector<1x1024xbf16>
    %148 = vector.broadcast %147 : vector<1x1024xbf16> to vector<8x1024xbf16>
    %149 = arith.mulf %146, %148 : vector<8x1024xbf16>
    %c0_71 = arith.constant 0 : index
    %c48 = arith.constant 48 : index
    %150 = vector.load %arg4[%c0_71, %c48] : memref<24x200xbf16, #tpu.memory_space<vmem>>, vector<24x8xbf16>
    %cst_72 = arith.constant dense<0.000000e+00> : vector<24x1024xf32>
    %151 = tpu.matmul %150, %149, %cst_72 {dimension_numbers = #tpu.dot_dimension_numbers<[1], [0], [0], [1], [0, 0, 1, 1], [], []>} : vector<24x8xbf16>, vector<8x1024xbf16>, vector<24x1024xf32> -> vector<24x1024xf32>
    %152 = arith.addf %145, %151 : vector<24x1024xf32>
    %c0_73 = arith.constant 0 : index
    %c96 = arith.constant 96 : index
    %153 = vector.load %arg8[%c0_73, %c96] : memref<8x1218xbf16, #tpu.memory_space<vmem>>, vector<8x1024xbf16>
    %c2_74 = arith.constant 2 : index
    %c0_75 = arith.constant 0 : index
    %154 = vector.load %arg3[%c2_74, %c0_75] : memref<5x1024xbf16, #tpu.memory_space<vmem>>, vector<1x1024xbf16>
    %155 = vector.broadcast %154 : vector<1x1024xbf16> to vector<8x1024xbf16>
    %156 = arith.mulf %153, %155 : vector<8x1024xbf16>
    %c0_76 = arith.constant 0 : index
    %c56 = arith.constant 56 : index
    %157 = vector.load %arg4[%c0_76, %c56] : memref<24x200xbf16, #tpu.memory_space<vmem>>, vector<24x8xbf16>
    %cst_77 = arith.constant dense<0.000000e+00> : vector<24x1024xf32>
    %158 = tpu.matmul %157, %156, %cst_77 {dimension_numbers = #tpu.dot_dimension_numbers<[1], [0], [0], [1], [0, 0, 1, 1], [], []>} : vector<24x8xbf16>, vector<8x1024xbf16>, vector<24x1024xf32> -> vector<24x1024xf32>
    %159 = arith.addf %152, %158 : vector<24x1024xf32>
    %c0_78 = arith.constant 0 : index
    %c97 = arith.constant 97 : index
    %160 = vector.load %arg8[%c0_78, %c97] : memref<8x1218xbf16, #tpu.memory_space<vmem>>, vector<8x1024xbf16>
    %c3_79 = arith.constant 3 : index
    %c0_80 = arith.constant 0 : index
    %161 = vector.load %arg3[%c3_79, %c0_80] : memref<5x1024xbf16, #tpu.memory_space<vmem>>, vector<1x1024xbf16>
    %162 = vector.broadcast %161 : vector<1x1024xbf16> to vector<8x1024xbf16>
    %163 = arith.mulf %160, %162 : vector<8x1024xbf16>
    %c0_81 = arith.constant 0 : index
    %c64_82 = arith.constant 64 : index
    %164 = vector.load %arg4[%c0_81, %c64_82] : memref<24x200xbf16, #tpu.memory_space<vmem>>, vector<24x8xbf16>
    %cst_83 = arith.constant dense<0.000000e+00> : vector<24x1024xf32>
    %165 = tpu.matmul %164, %163, %cst_83 {dimension_numbers = #tpu.dot_dimension_numbers<[1], [0], [0], [1], [0, 0, 1, 1], [], []>} : vector<24x8xbf16>, vector<8x1024xbf16>, vector<24x1024xf32> -> vector<24x1024xf32>
    %166 = arith.addf %159, %165 : vector<24x1024xf32>
    %c0_84 = arith.constant 0 : index
    %c98 = arith.constant 98 : index
    %167 = vector.load %arg8[%c0_84, %c98] : memref<8x1218xbf16, #tpu.memory_space<vmem>>, vector<8x1024xbf16>
    %c4_85 = arith.constant 4 : index
    %c0_86 = arith.constant 0 : index
    %168 = vector.load %arg3[%c4_85, %c0_86] : memref<5x1024xbf16, #tpu.memory_space<vmem>>, vector<1x1024xbf16>
    %169 = vector.broadcast %168 : vector<1x1024xbf16> to vector<8x1024xbf16>
    %170 = arith.mulf %167, %169 : vector<8x1024xbf16>
    %c0_87 = arith.constant 0 : index
    %c72 = arith.constant 72 : index
    %171 = vector.load %arg4[%c0_87, %c72] : memref<24x200xbf16, #tpu.memory_space<vmem>>, vector<24x8xbf16>
    %cst_88 = arith.constant dense<0.000000e+00> : vector<24x1024xf32>
    %172 = tpu.matmul %171, %170, %cst_88 {dimension_numbers = #tpu.dot_dimension_numbers<[1], [0], [0], [1], [0, 0, 1, 1], [], []>} : vector<24x8xbf16>, vector<8x1024xbf16>, vector<24x1024xf32> -> vector<24x1024xf32>
    %173 = arith.addf %166, %172 : vector<24x1024xf32>
    %c0_89 = arith.constant 0 : index
    %c126 = arith.constant 126 : index
    %174 = vector.load %arg8[%c0_89, %c126] : memref<8x1218xbf16, #tpu.memory_space<vmem>>, vector<8x1024xbf16>
    %c0_90 = arith.constant 0 : index
    %c0_91 = arith.constant 0 : index
    %175 = vector.load %arg3[%c0_90, %c0_91] : memref<5x1024xbf16, #tpu.memory_space<vmem>>, vector<1x1024xbf16>
    %176 = vector.broadcast %175 : vector<1x1024xbf16> to vector<8x1024xbf16>
    %177 = arith.mulf %174, %176 : vector<8x1024xbf16>
    %c0_92 = arith.constant 0 : index
    %c80 = arith.constant 80 : index
    %178 = vector.load %arg4[%c0_92, %c80] : memref<24x200xbf16, #tpu.memory_space<vmem>>, vector<24x8xbf16>
    %cst_93 = arith.constant dense<0.000000e+00> : vector<24x1024xf32>
    %179 = tpu.matmul %178, %177, %cst_93 {dimension_numbers = #tpu.dot_dimension_numbers<[1], [0], [0], [1], [0, 0, 1, 1], [], []>} : vector<24x8xbf16>, vector<8x1024xbf16>, vector<24x1024xf32> -> vector<24x1024xf32>
    %180 = arith.addf %173, %179 : vector<24x1024xf32>
    %c0_94 = arith.constant 0 : index
    %c127 = arith.constant 127 : index
    %181 = vector.load %arg8[%c0_94, %c127] : memref<8x1218xbf16, #tpu.memory_space<vmem>>, vector<8x1024xbf16>
    %c1_95 = arith.constant 1 : index
    %c0_96 = arith.constant 0 : index
    %182 = vector.load %arg3[%c1_95, %c0_96] : memref<5x1024xbf16, #tpu.memory_space<vmem>>, vector<1x1024xbf16>
    %183 = vector.broadcast %182 : vector<1x1024xbf16> to vector<8x1024xbf16>
    %184 = arith.mulf %181, %183 : vector<8x1024xbf16>
    %c0_97 = arith.constant 0 : index
    %c88 = arith.constant 88 : index
    %185 = vector.load %arg4[%c0_97, %c88] : memref<24x200xbf16, #tpu.memory_space<vmem>>, vector<24x8xbf16>
    %cst_98 = arith.constant dense<0.000000e+00> : vector<24x1024xf32>
    %186 = tpu.matmul %185, %184, %cst_98 {dimension_numbers = #tpu.dot_dimension_numbers<[1], [0], [0], [1], [0, 0, 1, 1], [], []>} : vector<24x8xbf16>, vector<8x1024xbf16>, vector<24x1024xf32> -> vector<24x1024xf32>
    %187 = arith.addf %180, %186 : vector<24x1024xf32>
    %c0_99 = arith.constant 0 : index
    %c128_100 = arith.constant 128 : index
    %188 = vector.load %arg8[%c0_99, %c128_100] : memref<8x1218xbf16, #tpu.memory_space<vmem>>, vector<8x1024xbf16>
    %c2_101 = arith.constant 2 : index
    %c0_102 = arith.constant 0 : index
    %189 = vector.load %arg3[%c2_101, %c0_102] : memref<5x1024xbf16, #tpu.memory_space<vmem>>, vector<1x1024xbf16>
    %190 = vector.broadcast %189 : vector<1x1024xbf16> to vector<8x1024xbf16>
    %191 = arith.mulf %188, %190 : vector<8x1024xbf16>
    %c0_103 = arith.constant 0 : index
    %c96_104 = arith.constant 96 : index
    %192 = vector.load %arg4[%c0_103, %c96_104] : memref<24x200xbf16, #tpu.memory_space<vmem>>, vector<24x8xbf16>
    %cst_105 = arith.constant dense<0.000000e+00> : vector<24x1024xf32>
    %193 = tpu.matmul %192, %191, %cst_105 {dimension_numbers = #tpu.dot_dimension_numbers<[1], [0], [0], [1], [0, 0, 1, 1], [], []>} : vector<24x8xbf16>, vector<8x1024xbf16>, vector<24x1024xf32> -> vector<24x1024xf32>
    %194 = arith.addf %187, %193 : vector<24x1024xf32>
    %c0_106 = arith.constant 0 : index
    %c129 = arith.constant 129 : index
    %195 = vector.load %arg8[%c0_106, %c129] : memref<8x1218xbf16, #tpu.memory_space<vmem>>, vector<8x1024xbf16>
    %c3_107 = arith.constant 3 : index
    %c0_108 = arith.constant 0 : index
    %196 = vector.load %arg3[%c3_107, %c0_108] : memref<5x1024xbf16, #tpu.memory_space<vmem>>, vector<1x1024xbf16>
    %197 = vector.broadcast %196 : vector<1x1024xbf16> to vector<8x1024xbf16>
    %198 = arith.mulf %195, %197 : vector<8x1024xbf16>
    %c0_109 = arith.constant 0 : index
    %c104 = arith.constant 104 : index
    %199 = vector.load %arg4[%c0_109, %c104] : memref<24x200xbf16, #tpu.memory_space<vmem>>, vector<24x8xbf16>
    %cst_110 = arith.constant dense<0.000000e+00> : vector<24x1024xf32>
    %200 = tpu.matmul %199, %198, %cst_110 {dimension_numbers = #tpu.dot_dimension_numbers<[1], [0], [0], [1], [0, 0, 1, 1], [], []>} : vector<24x8xbf16>, vector<8x1024xbf16>, vector<24x1024xf32> -> vector<24x1024xf32>
    %201 = arith.addf %194, %200 : vector<24x1024xf32>
    %c0_111 = arith.constant 0 : index
    %c130 = arith.constant 130 : index
    %202 = vector.load %arg8[%c0_111, %c130] : memref<8x1218xbf16, #tpu.memory_space<vmem>>, vector<8x1024xbf16>
    %c4_112 = arith.constant 4 : index
    %c0_113 = arith.constant 0 : index
    %203 = vector.load %arg3[%c4_112, %c0_113] : memref<5x1024xbf16, #tpu.memory_space<vmem>>, vector<1x1024xbf16>
    %204 = vector.broadcast %203 : vector<1x1024xbf16> to vector<8x1024xbf16>
    %205 = arith.mulf %202, %204 : vector<8x1024xbf16>
    %c0_114 = arith.constant 0 : index
    %c112 = arith.constant 112 : index
    %206 = vector.load %arg4[%c0_114, %c112] : memref<24x200xbf16, #tpu.memory_space<vmem>>, vector<24x8xbf16>
    %cst_115 = arith.constant dense<0.000000e+00> : vector<24x1024xf32>
    %207 = tpu.matmul %206, %205, %cst_115 {dimension_numbers = #tpu.dot_dimension_numbers<[1], [0], [0], [1], [0, 0, 1, 1], [], []>} : vector<24x8xbf16>, vector<8x1024xbf16>, vector<24x1024xf32> -> vector<24x1024xf32>
    %208 = arith.addf %201, %207 : vector<24x1024xf32>
    %c0_116 = arith.constant 0 : index
    %c158 = arith.constant 158 : index
    %209 = vector.load %arg8[%c0_116, %c158] : memref<8x1218xbf16, #tpu.memory_space<vmem>>, vector<8x1024xbf16>
    %c0_117 = arith.constant 0 : index
    %c0_118 = arith.constant 0 : index
    %210 = vector.load %arg3[%c0_117, %c0_118] : memref<5x1024xbf16, #tpu.memory_space<vmem>>, vector<1x1024xbf16>
    %211 = vector.broadcast %210 : vector<1x1024xbf16> to vector<8x1024xbf16>
    %212 = arith.mulf %209, %211 : vector<8x1024xbf16>
    %c0_119 = arith.constant 0 : index
    %c120 = arith.constant 120 : index
    %213 = vector.load %arg4[%c0_119, %c120] : memref<24x200xbf16, #tpu.memory_space<vmem>>, vector<24x8xbf16>
    %cst_120 = arith.constant dense<0.000000e+00> : vector<24x1024xf32>
    %214 = tpu.matmul %213, %212, %cst_120 {dimension_numbers = #tpu.dot_dimension_numbers<[1], [0], [0], [1], [0, 0, 1, 1], [], []>} : vector<24x8xbf16>, vector<8x1024xbf16>, vector<24x1024xf32> -> vector<24x1024xf32>
    %215 = arith.addf %208, %214 : vector<24x1024xf32>
    %c0_121 = arith.constant 0 : index
    %c159 = arith.constant 159 : index
    %216 = vector.load %arg8[%c0_121, %c159] : memref<8x1218xbf16, #tpu.memory_space<vmem>>, vector<8x1024xbf16>
    %c1_122 = arith.constant 1 : index
    %c0_123 = arith.constant 0 : index
    %217 = vector.load %arg3[%c1_122, %c0_123] : memref<5x1024xbf16, #tpu.memory_space<vmem>>, vector<1x1024xbf16>
    %218 = vector.broadcast %217 : vector<1x1024xbf16> to vector<8x1024xbf16>
    %219 = arith.mulf %216, %218 : vector<8x1024xbf16>
    %c0_124 = arith.constant 0 : index
    %c128_125 = arith.constant 128 : index
    %220 = vector.load %arg4[%c0_124, %c128_125] : memref<24x200xbf16, #tpu.memory_space<vmem>>, vector<24x8xbf16>
    %cst_126 = arith.constant dense<0.000000e+00> : vector<24x1024xf32>
    %221 = tpu.matmul %220, %219, %cst_126 {dimension_numbers = #tpu.dot_dimension_numbers<[1], [0], [0], [1], [0, 0, 1, 1], [], []>} : vector<24x8xbf16>, vector<8x1024xbf16>, vector<24x1024xf32> -> vector<24x1024xf32>
    %222 = arith.addf %215, %221 : vector<24x1024xf32>
    %c0_127 = arith.constant 0 : index
    %c160_128 = arith.constant 160 : index
    %223 = vector.load %arg8[%c0_127, %c160_128] : memref<8x1218xbf16, #tpu.memory_space<vmem>>, vector<8x1024xbf16>
    %c2_129 = arith.constant 2 : index
    %c0_130 = arith.constant 0 : index
    %224 = vector.load %arg3[%c2_129, %c0_130] : memref<5x1024xbf16, #tpu.memory_space<vmem>>, vector<1x1024xbf16>
    %225 = vector.broadcast %224 : vector<1x1024xbf16> to vector<8x1024xbf16>
    %226 = arith.mulf %223, %225 : vector<8x1024xbf16>
    %c0_131 = arith.constant 0 : index
    %c136 = arith.constant 136 : index
    %227 = vector.load %arg4[%c0_131, %c136] : memref<24x200xbf16, #tpu.memory_space<vmem>>, vector<24x8xbf16>
    %cst_132 = arith.constant dense<0.000000e+00> : vector<24x1024xf32>
    %228 = tpu.matmul %227, %226, %cst_132 {dimension_numbers = #tpu.dot_dimension_numbers<[1], [0], [0], [1], [0, 0, 1, 1], [], []>} : vector<24x8xbf16>, vector<8x1024xbf16>, vector<24x1024xf32> -> vector<24x1024xf32>
    %229 = arith.addf %222, %228 : vector<24x1024xf32>
    %c0_133 = arith.constant 0 : index
    %c161 = arith.constant 161 : index
    %230 = vector.load %arg8[%c0_133, %c161] : memref<8x1218xbf16, #tpu.memory_space<vmem>>, vector<8x1024xbf16>
    %c3_134 = arith.constant 3 : index
    %c0_135 = arith.constant 0 : index
    %231 = vector.load %arg3[%c3_134, %c0_135] : memref<5x1024xbf16, #tpu.memory_space<vmem>>, vector<1x1024xbf16>
    %232 = vector.broadcast %231 : vector<1x1024xbf16> to vector<8x1024xbf16>
    %233 = arith.mulf %230, %232 : vector<8x1024xbf16>
    %c0_136 = arith.constant 0 : index
    %c144 = arith.constant 144 : index
    %234 = vector.load %arg4[%c0_136, %c144] : memref<24x200xbf16, #tpu.memory_space<vmem>>, vector<24x8xbf16>
    %cst_137 = arith.constant dense<0.000000e+00> : vector<24x1024xf32>
    %235 = tpu.matmul %234, %233, %cst_137 {dimension_numbers = #tpu.dot_dimension_numbers<[1], [0], [0], [1], [0, 0, 1, 1], [], []>} : vector<24x8xbf16>, vector<8x1024xbf16>, vector<24x1024xf32> -> vector<24x1024xf32>
    %236 = arith.addf %229, %235 : vector<24x1024xf32>
    %c0_138 = arith.constant 0 : index
    %c162 = arith.constant 162 : index
    %237 = vector.load %arg8[%c0_138, %c162] : memref<8x1218xbf16, #tpu.memory_space<vmem>>, vector<8x1024xbf16>
    %c4_139 = arith.constant 4 : index
    %c0_140 = arith.constant 0 : index
    %238 = vector.load %arg3[%c4_139, %c0_140] : memref<5x1024xbf16, #tpu.memory_space<vmem>>, vector<1x1024xbf16>
    %239 = vector.broadcast %238 : vector<1x1024xbf16> to vector<8x1024xbf16>
    %240 = arith.mulf %237, %239 : vector<8x1024xbf16>
    %c0_141 = arith.constant 0 : index
    %c152 = arith.constant 152 : index
    %241 = vector.load %arg4[%c0_141, %c152] : memref<24x200xbf16, #tpu.memory_space<vmem>>, vector<24x8xbf16>
    %cst_142 = arith.constant dense<0.000000e+00> : vector<24x1024xf32>
    %242 = tpu.matmul %241, %240, %cst_142 {dimension_numbers = #tpu.dot_dimension_numbers<[1], [0], [0], [1], [0, 0, 1, 1], [], []>} : vector<24x8xbf16>, vector<8x1024xbf16>, vector<24x1024xf32> -> vector<24x1024xf32>
    %243 = arith.addf %236, %242 : vector<24x1024xf32>
    %c0_143 = arith.constant 0 : index
    %c190 = arith.constant 190 : index
    %244 = vector.load %arg8[%c0_143, %c190] : memref<8x1218xbf16, #tpu.memory_space<vmem>>, vector<8x1024xbf16>
    %c0_144 = arith.constant 0 : index
    %c0_145 = arith.constant 0 : index
    %245 = vector.load %arg3[%c0_144, %c0_145] : memref<5x1024xbf16, #tpu.memory_space<vmem>>, vector<1x1024xbf16>
    %246 = vector.broadcast %245 : vector<1x1024xbf16> to vector<8x1024xbf16>
    %247 = arith.mulf %244, %246 : vector<8x1024xbf16>
    %c0_146 = arith.constant 0 : index
    %c160_147 = arith.constant 160 : index
    %248 = vector.load %arg4[%c0_146, %c160_147] : memref<24x200xbf16, #tpu.memory_space<vmem>>, vector<24x8xbf16>
    %cst_148 = arith.constant dense<0.000000e+00> : vector<24x1024xf32>
    %249 = tpu.matmul %248, %247, %cst_148 {dimension_numbers = #tpu.dot_dimension_numbers<[1], [0], [0], [1], [0, 0, 1, 1], [], []>} : vector<24x8xbf16>, vector<8x1024xbf16>, vector<24x1024xf32> -> vector<24x1024xf32>
    %250 = arith.addf %243, %249 : vector<24x1024xf32>
    %c0_149 = arith.constant 0 : index
    %c191 = arith.constant 191 : index
    %251 = vector.load %arg8[%c0_149, %c191] : memref<8x1218xbf16, #tpu.memory_space<vmem>>, vector<8x1024xbf16>
    %c1_150 = arith.constant 1 : index
    %c0_151 = arith.constant 0 : index
    %252 = vector.load %arg3[%c1_150, %c0_151] : memref<5x1024xbf16, #tpu.memory_space<vmem>>, vector<1x1024xbf16>
    %253 = vector.broadcast %252 : vector<1x1024xbf16> to vector<8x1024xbf16>
    %254 = arith.mulf %251, %253 : vector<8x1024xbf16>
    %c0_152 = arith.constant 0 : index
    %c168 = arith.constant 168 : index
    %255 = vector.load %arg4[%c0_152, %c168] : memref<24x200xbf16, #tpu.memory_space<vmem>>, vector<24x8xbf16>
    %cst_153 = arith.constant dense<0.000000e+00> : vector<24x1024xf32>
    %256 = tpu.matmul %255, %254, %cst_153 {dimension_numbers = #tpu.dot_dimension_numbers<[1], [0], [0], [1], [0, 0, 1, 1], [], []>} : vector<24x8xbf16>, vector<8x1024xbf16>, vector<24x1024xf32> -> vector<24x1024xf32>
    %257 = arith.addf %250, %256 : vector<24x1024xf32>
    %c0_154 = arith.constant 0 : index
    %c192_155 = arith.constant 192 : index
    %258 = vector.load %arg8[%c0_154, %c192_155] : memref<8x1218xbf16, #tpu.memory_space<vmem>>, vector<8x1024xbf16>
    %c2_156 = arith.constant 2 : index
    %c0_157 = arith.constant 0 : index
    %259 = vector.load %arg3[%c2_156, %c0_157] : memref<5x1024xbf16, #tpu.memory_space<vmem>>, vector<1x1024xbf16>
    %260 = vector.broadcast %259 : vector<1x1024xbf16> to vector<8x1024xbf16>
    %261 = arith.mulf %258, %260 : vector<8x1024xbf16>
    %c0_158 = arith.constant 0 : index
    %c176 = arith.constant 176 : index
    %262 = vector.load %arg4[%c0_158, %c176] : memref<24x200xbf16, #tpu.memory_space<vmem>>, vector<24x8xbf16>
    %cst_159 = arith.constant dense<0.000000e+00> : vector<24x1024xf32>
    %263 = tpu.matmul %262, %261, %cst_159 {dimension_numbers = #tpu.dot_dimension_numbers<[1], [0], [0], [1], [0, 0, 1, 1], [], []>} : vector<24x8xbf16>, vector<8x1024xbf16>, vector<24x1024xf32> -> vector<24x1024xf32>
    %264 = arith.addf %257, %263 : vector<24x1024xf32>
    %c0_160 = arith.constant 0 : index
    %c193 = arith.constant 193 : index
    %265 = vector.load %arg8[%c0_160, %c193] : memref<8x1218xbf16, #tpu.memory_space<vmem>>, vector<8x1024xbf16>
    %c3_161 = arith.constant 3 : index
    %c0_162 = arith.constant 0 : index
    %266 = vector.load %arg3[%c3_161, %c0_162] : memref<5x1024xbf16, #tpu.memory_space<vmem>>, vector<1x1024xbf16>
    %267 = vector.broadcast %266 : vector<1x1024xbf16> to vector<8x1024xbf16>
    %268 = arith.mulf %265, %267 : vector<8x1024xbf16>
    %c0_163 = arith.constant 0 : index
    %c184 = arith.constant 184 : index
    %269 = vector.load %arg4[%c0_163, %c184] : memref<24x200xbf16, #tpu.memory_space<vmem>>, vector<24x8xbf16>
    %cst_164 = arith.constant dense<0.000000e+00> : vector<24x1024xf32>
    %270 = tpu.matmul %269, %268, %cst_164 {dimension_numbers = #tpu.dot_dimension_numbers<[1], [0], [0], [1], [0, 0, 1, 1], [], []>} : vector<24x8xbf16>, vector<8x1024xbf16>, vector<24x1024xf32> -> vector<24x1024xf32>
    %271 = arith.addf %264, %270 : vector<24x1024xf32>
    %c0_165 = arith.constant 0 : index
    %c194 = arith.constant 194 : index
    %272 = vector.load %arg8[%c0_165, %c194] : memref<8x1218xbf16, #tpu.memory_space<vmem>>, vector<8x1024xbf16>
    %c4_166 = arith.constant 4 : index
    %c0_167 = arith.constant 0 : index
    %273 = vector.load %arg3[%c4_166, %c0_167] : memref<5x1024xbf16, #tpu.memory_space<vmem>>, vector<1x1024xbf16>
    %274 = vector.broadcast %273 : vector<1x1024xbf16> to vector<8x1024xbf16>
    %275 = arith.mulf %272, %274 : vector<8x1024xbf16>
    %c0_168 = arith.constant 0 : index
    %c192_169 = arith.constant 192 : index
    %276 = vector.load %arg4[%c0_168, %c192_169] : memref<24x200xbf16, #tpu.memory_space<vmem>>, vector<24x8xbf16>
    %cst_170 = arith.constant dense<0.000000e+00> : vector<24x1024xf32>
    %277 = tpu.matmul %276, %275, %cst_170 {dimension_numbers = #tpu.dot_dimension_numbers<[1], [0], [0], [1], [0, 0, 1, 1], [], []>} : vector<24x8xbf16>, vector<8x1024xbf16>, vector<24x1024xf32> -> vector<24x1024xf32>
    %278 = arith.addf %271, %277 : vector<24x1024xf32>
    %cst_171 = arith.constant dense<0.000000e+00> : vector<24xf32>
    %279 = vector.multi_reduction <add>, %278, %cst_171 [1] : vector<24x1024xf32> to vector<24xf32>
    %280 = vector.shape_cast %279 : vector<24xf32> to vector<24x1xf32>
    %281 = arith.mulf %278, %278 : vector<24x1024xf32>
    %cst_172 = arith.constant dense<0.000000e+00> : vector<24xf32>
    %282 = vector.multi_reduction <add>, %281, %cst_172 [1] : vector<24x1024xf32> to vector<24xf32>
    %283 = vector.shape_cast %282 : vector<24xf32> to vector<24x1xf32>
    %284 = vector.extract_strided_slice %280 {offsets = [0, 0], sizes = [12, 1], strides = [1, 1]} : vector<24x1xf32> to vector<12x1xf32>
    %285 = vector.extract_strided_slice %283 {offsets = [0, 0], sizes = [12, 1], strides = [1, 1]} : vector<24x1xf32> to vector<12x1xf32>
    %286 = vector.extract_strided_slice %280 {offsets = [12, 0], sizes = [12, 1], strides = [1, 1]} : vector<24x1xf32> to vector<12x1xf32>
    %287 = arith.addf %284, %286 : vector<12x1xf32>
    %288 = vector.extract_strided_slice %283 {offsets = [12, 0], sizes = [12, 1], strides = [1, 1]} : vector<24x1xf32> to vector<12x1xf32>
    %289 = arith.addf %285, %288 : vector<12x1xf32>
    %cst_173 = arith.constant 2.048000e+03 : f32
    %290 = vector.broadcast %cst_173 : f32 to vector<12x1xf32>
    %291 = arith.divf %287, %290 : vector<12x1xf32>
    %cst_174 = arith.constant 2.048000e+03 : f32
    %292 = vector.broadcast %cst_174 : f32 to vector<12x1xf32>
    %293 = arith.divf %289, %292 : vector<12x1xf32>
    %294 = arith.mulf %291, %291 : vector<12x1xf32>
    %295 = arith.subf %293, %294 : vector<12x1xf32>
    %cst_175 = arith.constant 0.000000e+00 : f32
    %296 = vector.broadcast %cst_175 : f32 to vector<12x1xf32>
    %297 = arith.maximumf %295, %296 : vector<12x1xf32>
    %c0_176 = arith.constant 0 : index
    %c0_177 = arith.constant 0 : index
    %298 = vector.load %arg5[%c0_176, %c0_177] : memref<12x1xf32, #tpu.memory_space<vmem>>, vector<12x1xf32>
    %cst_178 = arith.constant 9.99999974E-6 : f32
    %299 = vector.broadcast %cst_178 : f32 to vector<12x1xf32>
    %300 = arith.addf %297, %299 : vector<12x1xf32>
    %301 = math.rsqrt %300 : vector<12x1xf32>
    %302 = arith.mulf %298, %301 : vector<12x1xf32>
    %c0_179 = arith.constant 0 : index
    %c0_180 = arith.constant 0 : index
    %303 = vector.load %arg6[%c0_179, %c0_180] : memref<12x1xf32, #tpu.memory_space<vmem>>, vector<12x1xf32>
    %304 = arith.mulf %291, %302 : vector<12x1xf32>
    %305 = arith.subf %303, %304 : vector<12x1xf32>
    %306 = vector.extract_strided_slice %278 {offsets = [0, 0], sizes = [12, 1024], strides = [1, 1]} : vector<24x1024xf32> to vector<12x1024xf32>
    %307 = vector.broadcast %302 : vector<12x1xf32> to vector<12x1024xf32>
    %308 = arith.mulf %306, %307 : vector<12x1024xf32>
    %309 = vector.broadcast %305 : vector<12x1xf32> to vector<12x1024xf32>
    %310 = arith.addf %308, %309 : vector<12x1024xf32>
    %cst_181 = arith.constant 0.000000e+00 : f32
    %311 = vector.broadcast %cst_181 : f32 to vector<12x1024xf32>
    %312 = arith.maximumf %310, %311 : vector<12x1024xf32>
    %c0_182 = arith.constant 0 : index
    %c0_183 = arith.constant 0 : index
    %c0_184 = arith.constant 0 : index
    %313 = vector.load %arg7[%c0_182, %c0_183, %c0_184] : memref<2x12x1024xf32, #tpu.memory_space<vmem>>, vector<1x12x1024xf32>
    %314 = vector.shape_cast %313 : vector<1x12x1024xf32> to vector<12x1024xf32>
    %315 = vector.shape_cast %312 : vector<12x1024xf32> to vector<1x12x1024xf32>
    tpu.vector_store %arg7[%c0_182, %c0_183, %c0_184], %315 {strides = array<i32>} : memref<2x12x1024xf32, #tpu.memory_space<vmem>>, vector<1x12x1024xf32>,
    %316 = vector.extract_strided_slice %278 {offsets = [12, 0], sizes = [12, 1024], strides = [1, 1]} : vector<24x1024xf32> to vector<12x1024xf32>
    %317 = vector.broadcast %302 : vector<12x1xf32> to vector<12x1024xf32>
    %318 = arith.mulf %316, %317 : vector<12x1024xf32>
    %319 = vector.broadcast %305 : vector<12x1xf32> to vector<12x1024xf32>
    %320 = arith.addf %318, %319 : vector<12x1024xf32>
    %cst_185 = arith.constant 0.000000e+00 : f32
    %321 = vector.broadcast %cst_185 : f32 to vector<12x1024xf32>
    %322 = arith.maximumf %320, %321 : vector<12x1024xf32>
    %c1_186 = arith.constant 1 : index
    %c0_187 = arith.constant 0 : index
    %c0_188 = arith.constant 0 : index
    %323 = vector.load %arg7[%c1_186, %c0_187, %c0_188] : memref<2x12x1024xf32, #tpu.memory_space<vmem>>, vector<1x12x1024xf32>
    %324 = vector.shape_cast %323 : vector<1x12x1024xf32> to vector<12x1024xf32>
    %325 = vector.shape_cast %322 : vector<12x1024xf32> to vector<1x12x1024xf32>
    tpu.vector_store %arg7[%c1_186, %c0_187, %c0_188], %325 {strides = array<i32>} : memref<2x12x1024xf32, #tpu.memory_space<vmem>>, vector<1x12x1024xf32>,
    return
  }
  func.func @transform_0(%arg0: i32) -> (i32, i32) {
    %c0_i32 = arith.constant 0 : i32
    %c0_i32_0 = arith.constant 0 : i32
    %c0_i32_1 = arith.constant 0 : i32
    return %c0_i32, %c0_i32_0 : i32, i32
  }
  func.func @transform_1(%arg0: i32) -> (i32, i32) {
    %c0_i32 = arith.constant 0 : i32
    %c0_i32_0 = arith.constant 0 : i32
    %c0_i32_1 = arith.constant 0 : i32
    return %c0_i32, %c0_i32_0 : i32, i32
  }
  func.func @transform_2(%arg0: i32) -> (i32, i32) {
    %c0_i32 = arith.constant 0 : i32
    %c0_i32_0 = arith.constant 0 : i32
    %c0_i32_1 = arith.constant 0 : i32
    return %c0_i32, %c0_i32_0 : i32, i32
  }
  func.func @transform_3(%arg0: i32) -> (i32, i32) {
    %c0_i32 = arith.constant 0 : i32
    %c0_i32_0 = arith.constant 0 : i32
    %c0_i32_1 = arith.constant 0 : i32
    return %c0_i32, %c0_i32_0 : i32, i32
  }
  func.func @transform_4(%arg0: i32) -> (i32, i32) {
    %c0_i32 = arith.constant 0 : i32
    %c0_i32_0 = arith.constant 0 : i32
    %c0_i32_1 = arith.constant 0 : i32
    return %c0_i32, %c0_i32_0 : i32, i32
  }
  func.func @transform_5(%arg0: i32) -> (i32, i32) {
    %c0_i32 = arith.constant 0 : i32
    %c0_i32_0 = arith.constant 0 : i32
    %c0_i32_1 = arith.constant 0 : i32
    return %c0_i32, %c0_i32_0 : i32, i32
  }
  func.func @transform_6(%arg0: i32) -> (i32, i32, i32) {
    %c0_i32 = arith.constant 0 : i32
    %c0_i32_0 = arith.constant 0 : i32
    %c0_i32_1 = arith.constant 0 : i32
    %c0_i32_2 = arith.constant 0 : i32
    return %c0_i32, %c0_i32_0, %c0_i32_1 : i32, i32, i32
  }
}

</mosaic_0001>

<bundles_post_ra>
// kernel: convnet_dec_block.1
= control target key start
LH: loop header
LB: loop body
LE: loop exit
PB: predicated region body
PF: predicated region fallthrough
CT: control target
= control target key end

     0   :  { %vm88_vm0 = vcmask 130048   ;;  %v417_v4 = vlaneseq  ;;  %s11036_s16 = smov 97   ;;  %vm214_vm1 = vcmask 257024   ;;  %v14110_v35 = vmov 0   ;;  %s11039_s19 = smov 96   ;;  %s14097_s1 = inlined_call_operand.vmem [shape: bf16[16,32], index: 1, kind: input, shape index: {}]   ;;  %s14098_s0 = inlined_call_operand.vmem [shape: bf16[128,16], index: 0, kind: input, shape index: {}]   ;;  %s14099_s2 = inlined_call_operand.vmem [shape: bf16[5,1024], index: 2, kind: input, shape index: {}]   ;;  %s14100_s3 = inlined_call_operand.vmem [shape: bf16[24,200], index: 3, kind: input, shape index: {}]   ;;  %s14101_s4 = inlined_call_operand.vmem [shape: f32[12,1], index: 4, kind: input, shape index: {}]   ;;  %s14102_s5 = inlined_call_operand.vmem [shape: f32[12,1], index: 5, kind: input, shape index: {}]   ;;  %s14103_s6 = inlined_call_operand.vmem [shape: f32[2,12,1024], index: 6, kind: output, shape index: {}]  }
   0x1   :  { %v10969_v0 = vld [vmem:[%s14097_s1] sm:$0xff]   ;;  %v10971_v2 = vld [vmem:[%s14098_s0 + $0x8] sm:$0xff]   ;;  %v10972_v3 = vld [vmem:[%s14098_s0 + $0x10] sm:$0xff]   ;;  %210 = vst [vmem:[#allocation2] sm:$0xf] %v14110_v35  ;;  %3681 = vmatprep.mubr.bf16.mxu1 %v14110_v35  ;;  %10968 = vset.pattern.permute.xlu0 %v14110_v35  ;;  %s11040_s22 = smov 64  }
   0x2   :  { %v10970_v1 = vld [vmem:[%s14098_s0] sm:$0xff]   ;;  %10155 = vmatprep.subr.bf16.mxu0 %v10969_v0  ;;  %v11118_v5 = vshrl.u32 %v417_v4, 7  ;;  %v1213_v6 = vld [vmem:[%s14099_s2 + $0x8] sm:$0x22]  ;;  %v10973_v8 = vld [vmem:[%s14098_s0 + $0x18] sm:$0xff]   ;;  %10967 = vset.pattern.permute.xlu1 %v14110_v35  ;;  %s11041_s30 = smov 63  }
   0x3   :  { %10156 = vmatpush3.bf16.msra.mxu0 %v10969_v0  ;;  %10157 = vmatprep.mubr.msk.bf16.mxu0 %vm88_vm0, %v10970_v1  ;;  %v1212_v7 = vld [vmem:[%s14099_s2] sm:$0x22]  ;;  %v11129_v9 = vcombine.low %v1213_v6, %v1213_v6  ;;  %v11131_v10 = vcombine.high %v1213_v6, %v1213_v6  ;;  %v10975_v27 = vld [vmem:[%s14098_s0 + $0x28] sm:$0xff]   ;;  %v10976_v30 = vld [vmem:[%s14098_s0 + $0x30] sm:$0xff]   ;;  %s11042_s15 = smov 98   ;;  %vm222_vm2 = vcmask 519424  }
   0x4   :  { %v11133_v11 = vcombine.low %v1212_v7, %v1212_v7  ;;  %v11135_v12 = vcombine.high %v1212_v7, %v1212_v7  ;;  %v10974_v13 = vld [vmem:[%s14098_s0 + $0x20] sm:$0xff]   ;;  %v11141_v14 = vsub.s32 1, %v11118_v5  ;;  %v10977_v31 = vld [vmem:[%s14098_s0 + $0x38] sm:$0xff]   ;;  %s11038_s0 = smov 32   ;;  %v1214_v42 = vld [vmem:[%s14099_s2 + $0x10] sm:$0x22] }
   0x5   :  { %v1667_v15 = vshrl.u32 %v11129_v9, 16  ;;  %v1674_v16 = vshrl.u32 %v11131_v10, 16  ;;  %v11189_v48 = vcombine.low %v1214_v42, %v1214_v42  ;;  %v11192_v49 = vcombine.high %v1214_v42, %v1214_v42  ;;  %v390_v56 = vld [vmem:[%s14099_s2] sm:$0x11]  ;;  %v2069_v42 = vld [vmem:[%s14099_s2] sm:$0x44] }
   0x6   :  { %10158 = vmatmul.mubr.msk.bf16.vlgmr.msra.gmra.mrb[0].mxu0 %vm88_vm0, %v10971_v2  ;;  %v1653_v17 = vshrl.u32 %v11133_v11, 16  ;;  %v1660_v18 = vshrl.u32 %v11135_v12, 16  ;;  %v11206_v62 = vcombine.low %v390_v56, %v390_v56  ;;  %v11208_v63 = vcombine.high %v390_v56, %v390_v56  ;;  %s11044_s25 = smov 62   ;;  %s11045_s26 = smov 65  }
   0x7   :  { %10161 = vmatprep.mubr.msk.bf16.mxu0 %vm88_vm0, %v10972_v3  ;;  %v1668_v19 = vpack.i.b16 %v1667_v15, %v1667_v15  ;;  %v1675_v20 = vpack.i.b16 %v1674_v16, %v1674_v16  ;;  %v1681_v51 = vshrl.u32 %v11189_v48, 16  ;;  %v1688_v53 = vshrl.u32 %v11192_v49, 16  ;;  %s11046_s27 = smov 126   ;;  %s11047_s28 = smov 120  }
   0x8   :  { %v1654_v21 = vpack.i.b16 %v1653_v17, %v1653_v17  ;;  %v1661_v22 = vpack.i.b16 %v1660_v18, %v1660_v18  ;;  %v524_v7 = vshrl.u32 %v11206_v62, 16  ;;  %vm231_vm3 = vcmask 781824   ;;  %s11048_s1 = smov 30   ;;  %s11049_s29 = smov 56  }
   0x9   :  { %v1673_v23 = vrot.slane %v1668_v19, %v11141_v14  ;;  %v1680_v24 = vrot.slane %v1675_v20, %v11141_v14  ;;  %v1682_v60 = vpack.i.b16 %v1681_v51, %v1681_v51  ;;  %v1689_v61 = vpack.i.b16 %v1688_v53, %v1688_v53  ;;  %v2070_v53 = vld [vmem:[%s14099_s2 + $0x8] sm:$0x44]  ;;  %s11050_s7 = smov 127   ;;  %s11051_s8 = smov 66  }
   0xa   :  { %v1659_v25 = vrot.slane %v1654_v21, %v11141_v14  ;;  %v1666_v26 = vrot.slane %v1661_v22, %v11141_v14  ;;  %v11223_v19 = vsub.s32 0, %v11118_v5  ;;  %v525_v20 = vpack.i.b16 %v524_v7, %v524_v7  ;;  %v391_v22 = vld [vmem:[%s14099_s2 + $0x8] sm:$0x11]  ;;  %v2071_v7 = vld [vmem:[%s14099_s2 + $0x10] sm:$0x44]  ;;  %s11052_s9 = smov 2  }
   0xb   :  { %v11156_v28 = vcombine.low %v1673_v23, %v1680_v24  ;;  %v1687_v1 = vrot.slane %v1682_v60, %v11141_v14  ;;  %v1694_v2 = vrot.slane %v1689_v61, %v11141_v14  ;;  %vm236_vm4 = vcmask 1044224   ;;  %s11053_s10 = smov 48   ;;  %s11054_s11 = smov 1  }
   0xc   :  { %v11158_v29 = vcombine.low %v1659_v25, %v1666_v26  ;;  %v530_v23 = vrot.slane %v525_v20, %v11223_v19  ;;  %v1215_v25 = vld [vmem:[%s14099_s2 + $0x18] sm:$0x22]  ;;  %v11236_v26 = vcombine.low %v391_v22, %v391_v22  ;;  %vm211_vm5 = vcmask 535552   ;;  %s11055_s12 = smov 40   ;;  %s11056_s13 = smov 112  }
   0xd   :  { %3537 = vrot.lane.b32.xlu0 %v11156_v28, %s11036_s16  ;;  %v11218_v17 = vcombine.low %v1687_v1, %v1694_v2  ;;  %v9663_v1 = vcombine.high %v2070_v53, %v2070_v53  ;;  %212 = vst.msk [vmem:[#allocation2 + $0x24] sm:$0xf] %vm211_vm5, %v14110_v35  ;;  %vm504_vm6 = vcmask 1043456   ;;  %vm3547_vm7 = vcmask 793600   ;;  %s11057_s21 = smov 104   ;;  %s11058_s23 = smov 24  }
   0xe   :  { %10162 = vmatmul.mubr.msk.bf16.gmra.mrb[4].mxu0 %vm88_vm0, %v10973_v8  ;;  %3535 = vrot.lane.b32.xlu1 %v11158_v29, %s11036_s16  ;;  %v531_v8 = vshrl.u32 %v11208_v63, 16  ;;  %vm14149_vm8 = vcmask 515072   ;;  %vm14151_vm9 = vcmask 801792   ;;  %vm3610_vm10 = vcmask 252928   ;;  %s11059_s24 = smov 94   ;;  %s11063_s14 = smov 34  }
   0xf   :  { %10165 = vmatprep.mubr.msk.bf16.mxu0 %vm88_vm0, %v10974_v13  ;;  %vm692_vm11 = vcmask 64512   ;;  %vm14148_vm12 = vcmask 506880   ;;  %vm4231_vm13 = vcmask 1031168   ;;  %vm14152_vm14 = vcmask 531456   ;;  %s11064_s17 = smov 88   ;;  %s11065_s18 = smov 33  }
  0x10   :  { %v532_v21 = vpack.i.b16 %v531_v8, %v531_v8  ;;  %vm3952_vm15 = vcmask 244736   ;;  %vm2521_vm5 = vcmask 769024  }
  0x12   :  { %v537_v24 = vrot.slane %v532_v21, %v11223_v19 }
  0x16   :  { %10166 = vmatmul.mubr.msk.bf16.gmra.mrb[8].mxu0 %vm88_vm0, %v10975_v27  ;;  %v11238_v27 = vcombine.high %v391_v22, %v391_v22 }
  0x17   :  { %10169 = vmatprep.mubr.msk.bf16.mxu0 %vm88_vm0, %v10976_v30 }
  0x1e   :  { %10170 = vmatmul.mubr.msk.bf16.gmra.mrb[12].mxu0 %vm88_vm0, %v10977_v31  ;;  %v392_v31 = vld [vmem:[%s14099_s2 + $0x10] sm:$0x11]  ;;  %vm4573_vm0 = vcmask 1039360  }
  0x1f   :  { %756 = vmatprep.mubr.bf16.mxu0 %v14110_v35 }
  0xd9   :  { %v10159_v32 = vpop.f32.mrb[0].mxu0 }
  0xda   :  { %v238_v33 = vpack.c.bf16 %v10159_v32, %v10159_v32  ;;  %v147_v34 = vpop.f32.mrb[1].mxu0  ;;  %v11244_v32 = vcombine.low %v1215_v25, %v1215_v25 }
  0xdb   :  { %v213_v36 = vpack.c.bf16 %v147_v34, %v147_v34  ;;  %v10160_v37 = vpop.f32.mrb[2].mxu0  ;;  %v11249_v34 = vcombine.low %v530_v23, %v537_v24  ;;  %v2115_v23 = vpack.i.b16 %v9663_v1, %v9663_v1  ;;  %v9664_v24 = vcombine.low %v2071_v7, %v2071_v7 }
  0xdc   :  { %239 = vst.msk [vmem:[#allocation2 + $0x8] sm:$0xf] %vm214_vm1, %v238_v33  ;;  %v10133_v38 = vpack.c.bf16 %v10160_v37, %v10160_v37  ;;  %243 = vrot.lane.b32.xlu0 %v238_v33, %s11038_s0  ;;  %v150_v39 = vpop.f32.mrb[3].mxu0  ;;  %v11246_v33 = vcombine.high %v1215_v25, %v1215_v25  ;;  %v545_v37 = vshrl.u32 %v11238_v27, 16  ;;  %v9665_v25 = vcombine.high %v2071_v7, %v2071_v7 }
  0xdd   :  { %215 = vst.msk [vmem:[#allocation2 + $0x4] sm:$0xf] %vm214_vm1, %v213_v36  ;;  %v10131_v40 = vpack.c.bf16 %v150_v39, %v150_v39  ;;  %v11255_v39 = vcombine.high %v392_v31, %v392_v31 }
  0xde   :  { %255 = vrot.lane.b32.xlu1 %v10133_v38, %s11039_s19 }
  0xe0   :  { %219 = vrot.lane.b32.xlu0 %v213_v36, %s11038_s0  ;;  %v538_v36 = vshrl.u32 %v11236_v26, 16 }
  0xe1   :  { %v10163_v41 = vpop.f32.mrb[4].mxu0 }
  0xe2   :  { %228 = vrot.lane.b32.xlu1 %v10131_v40, %s11040_s22  ;;  %v280_v43 = vpack.c.bf16 %v10163_v41, %v10163_v41  ;;  %v163_v44 = vpop.f32.mrb[5].mxu0  ;;  %v1702_v41 = vshrl.u32 %v11246_v33, 16 }
  0xe3   :  { %v259_v45 = vpack.c.bf16 %v163_v44, %v163_v44  ;;  %v10164_v46 = vpop.f32.mrb[6].mxu0  ;;  %v546_v44 = vpack.i.b16 %v545_v37, %v545_v37 }
  0xe4   :  { %281 = vst.msk [vmem:[#allocation2 + $0x10] sm:$0xf] %vm214_vm1, %v280_v43  ;;  %251 = vrot.lane.b32.xlu0 %v10133_v38, %s11040_s22  ;;  %v166_v47 = vpop.f32.mrb[7].mxu0  ;;  %v10137_v0 = vpack.c.bf16 %v10164_v46, %v10164_v46  ;;  %v11253_v38 = vcombine.low %v392_v31, %v392_v31  ;;  %v559_v46 = vshrl.u32 %v11255_v39, 16  ;;  %v1703_v51 = vpack.i.b16 %v1702_v41, %v1702_v41 }
  0xe5   :  { %260 = vst.msk [vmem:[#allocation2 + $0xc] sm:$0xf] %vm214_vm1, %v259_v45  ;;  %v10135_v50 = vpack.c.bf16 %v166_v47, %v166_v47  ;;  %v393_v47 = vld [vmem:[%s14099_s2 + $0x18] sm:$0x11] }
  0xe6   :  { %264 = vrot.lane.b32.xlu1 %v259_v45, %s11038_s0  ;;  %v552_v45 = vshrl.u32 %v11253_v38, 16  ;;  %v11275_v56 = vcombine.low %v393_v47, %v393_v47  ;;  %v560_v61 = vpack.i.b16 %v559_v46, %v559_v46 }
  0xe8   :  { %233 = vrot.lane.b32.xlu0 %v10131_v40, %s11039_s19  ;;  %v1695_v40 = vshrl.u32 %v11244_v32, 16  ;;  %v553_v60 = vpack.i.b16 %v552_v45, %v552_v45  ;;  %v565_v22 = vrot.slane %v560_v61, %v11223_v19 }
  0xe9   :  { %v10167_v52 = vpop.f32.mrb[8].mxu0 }
  0xea   :  { %272 = vrot.lane.b32.xlu1 %v10135_v50, %s11040_s22  ;;  %v322_v54 = vpack.c.bf16 %v10167_v52, %v10167_v52  ;;  %v179_v55 = vpop.f32.mrb[9].mxu0  ;;  %v9660_v52 = vcombine.low %v2069_v42, %v2069_v42  ;;  %v558_v21 = vrot.slane %v553_v60, %v11223_v19 }
  0xeb   :  { %v301_v57 = vpack.c.bf16 %v179_v55, %v179_v55  ;;  %v10168_v58 = vpop.f32.mrb[10].mxu0  ;;  %v9661_v55 = vcombine.high %v2069_v42, %v2069_v42 }
  0xec   :  { %323 = vst.msk [vmem:[#allocation2 + $0x18] sm:$0xf] %vm214_vm1, %v322_v54  ;;  %276 = vrot.lane.b32.xlu0 %v10135_v50, %s11039_s19  ;;  %v182_v59 = vpop.f32.mrb[11].mxu0  ;;  %v10141_v30 = vpack.c.bf16 %v10168_v58, %v10168_v58  ;;  %v1696_v50 = vpack.i.b16 %v1695_v40, %v1695_v40  ;;  %v11303_v40 = vcombine.low %v558_v21, %v565_v22 }
  0xed   :  { %302 = vst.msk [vmem:[#allocation2 + $0x14] sm:$0xf] %vm214_vm1, %v301_v57  ;;  %v10139_v18 = vpack.c.bf16 %v182_v59, %v182_v59  ;;  %v551_v59 = vrot.slane %v546_v44, %v11223_v19  ;;  %v2129_v44 = vpack.i.b16 %v9665_v25, %v9665_v25 }
  0xee   :  { %285 = vrot.lane.b32.xlu1 %v280_v43, %s11038_s0  ;;  %v539_v43 = vpack.i.b16 %v538_v36, %v538_v36  ;;  %v1701_v2 = vrot.slane %v1696_v50, %v11141_v14 }
  0xf0   :  { %327 = vrot.lane.b32.xlu0 %v322_v54, %s11038_s0  ;;  %v544_v58 = vrot.slane %v539_v43, %v11223_v19  ;;  %v2122_v43 = vpack.i.b16 %v9664_v24, %v9664_v24 }
  0xf1   :  { %v10171_v3 = vpop.f32.mrb[12].mxu0 }
  0xf2   :  { %293 = vrot.lane.b32.xlu1 %v10137_v0, %s11040_s22  ;;  %v364_v4 = vpack.c.bf16 %v10171_v3, %v10171_v3  ;;  %v195_v6 = vpop.f32.mrb[13].mxu0  ;;  %v1708_v3 = vrot.slane %v1703_v51, %v11141_v14  ;;  %v11293_v20 = vcombine.low %v544_v58, %v551_v59  ;;  %v3536_v58 = vpop.permute.xlu1 %3535 }
  0xf3   :  { %v343_v13 = vpack.c.bf16 %v195_v6, %v195_v6  ;;  %v10172_v15 = vpop.f32.mrb[14].mxu0  ;;  %v11285_v6 = vsub.s32 2, %v11118_v5 }
  0xf4   :  { %306 = vrot.lane.b32.xlu0 %v301_v57, %s11038_s0  ;;  %365 = vst.msk [vmem:[#allocation2 + $0x20] sm:$0xf] %vm214_vm1, %v364_v4  ;;  %v198_v16 = vpop.f32.mrb[15].mxu0  ;;  %v10145_v54 = vpack.c.bf16 %v10172_v15, %v10172_v15  ;;  %v11277_v57 = vcombine.high %v393_v47, %v393_v47  ;;  %v566_v15 = vshrl.u32 %v11275_v56, 16 }
  0xf5   :  { %344 = vst.msk [vmem:[#allocation2 + $0x1c] sm:$0xf] %vm214_vm1, %v343_v13  ;;  %v10143_v8 = vpack.c.bf16 %v198_v16, %v198_v16  ;;  %v11298_v16 = vcombine.low %v1701_v2, %v1708_v3  ;;  %v2120_v42 = vrot.slane %v2115_v23, %v11285_v6  ;;  %v2127_v51 = vrot.slane %v2122_v43, %v11285_v6 }
  0xf6   :  { %297 = vrot.lane.b32.xlu1 %v10137_v0, %s11039_s19  ;;  %v9662_v0 = vcombine.low %v2070_v53, %v2070_v53  ;;  %v567_v36 = vpack.i.b16 %v566_v15, %v566_v15  ;;  %vm14150_vm1 = vcmask 523264  }
  0xf8   :  { %314 = vrot.lane.b32.xlu0 %v10139_v18, %s11040_s22  ;;  %v2108_v5 = vpack.i.b16 %v9662_v0, %v9662_v0  ;;  %v572_v46 = vrot.slane %v567_v36, %v11223_v19 }
  0xfa   :  { %3539 = vrot.lane.b32.xlu1 %v11218_v17, %s11036_s16  ;;  %v2113_v41 = vrot.slane %v2108_v5, %v11285_v6 }
  0xfc   :  { %318 = vrot.lane.b32.xlu0 %v10139_v18, %s11039_s19  ;;  %v573_v18 = vshrl.u32 %v11277_v57, 16  ;;  %v11317_v50 = vcombine.low %v2113_v41, %v2120_v42 }
  0xfe   :  { %335 = vrot.lane.b32.xlu1 %v10141_v30, %s11040_s22  ;;  %v574_v37 = vpack.i.b16 %v573_v18, %v573_v18 }
 0x100   :  { %339 = vrot.lane.b32.xlu0 %v10141_v30, %s11039_s19  ;;  %v579_v47 = vrot.slane %v574_v37, %v11223_v19 }
 0x102   :  { %600 = vrot.lane.b32.xlu1 %v11249_v34, %s11041_s30  ;;  %v11323_v53 = vcombine.low %v572_v46, %v579_v47 }
 0x104   :  { %369 = vrot.lane.b32.xlu0 %v364_v4, %s11038_s0  ;;  %v2094_v4 = vpack.i.b16 %v9660_v52, %v9660_v52  ;;  %v2134_v52 = vrot.slane %v2129_v44, %v11285_v6 }
 0x106   :  { %348 = vrot.lane.b32.xlu1 %v343_v13, %s11038_s0  ;;  %v2101_v13 = vpack.i.b16 %v9661_v55, %v9661_v55  ;;  %v2099_v30 = vrot.slane %v2094_v4, %v11285_v6  ;;  %v11333_v55 = vpop.permute.xlu0 %3537  ;;  %v2072_v4 = vld [vmem:[%s14099_s2 + $0x18] sm:$0x44]  ;;  %s11043_s2 = smov 31  }
 0x107   :  { %v9666_v18 = vcombine.low %v2072_v4, %v2072_v4  ;;  %v9667_v21 = vcombine.high %v2072_v4, %v2072_v4 }
 0x108   :  { %381 = vrot.lane.b32.xlu0 %v10145_v54, %s11039_s19  ;;  %v2106_v31 = vrot.slane %v2101_v13, %v11285_v6  ;;  %v3543_v13 = vrot.slane %v3536_v58, 4 }
 0x10a   :  { %377 = vrot.lane.b32.xlu1 %v10145_v54, %s11040_s22  ;;  %v11311_v45 = vcombine.low %v2099_v30, %v2106_v31  ;;  %v11327_v54 = vcombine.low %v2127_v51, %v2134_v52  ;;  %v3548_v5 = vsel %vm3547_vm7, %v3543_v13, %v3536_v58  ;;  %v2136_v30 = vpack.i.b16 %v9666_v18, %v9666_v18 }
 0x10b   :  { %v2143_v31 = vpack.i.b16 %v9667_v21, %v9667_v21  ;;  %v415_v52 = vpack.i.b16 %v11206_v62, %v11206_v62  ;;  %v422_v58 = vpack.i.b16 %v11208_v63, %v11208_v63  ;;  %v429_v62 = vpack.i.b16 %v11236_v26, %v11236_v26  ;;  %v11391_v26 = vld [vmem:[%s14100_s3 + $0x10] ss:$0 sps:$4 sm:$0xff]  }
 0x10c   :  { %356 = vrot.lane.b32.xlu0 %v10143_v8, %s11040_s22  ;;  %v2141_v47 = vrot.slane %v2136_v30, %v11285_v6  ;;  %v436_v63 = vpack.i.b16 %v11238_v27, %v11238_v27 }
 0x10d   :  { %v2148_v51 = vrot.slane %v2143_v31, %v11285_v6  ;;  %v427_v27 = vrot.slane %v422_v58, %v11223_v19 }
 0x10e   :  { %360 = vrot.lane.b32.xlu1 %v10143_v8, %s11039_s19  ;;  %v3544_v8 = vrot.slane %v11333_v55, 4 }
 0x110   :  { %602 = vrot.lane.b32.xlu0 %v11293_v20, %s11041_s30  ;;  %v3549_v23 = vsel %vm504_vm6, %v3543_v13, %v3544_v8 }
 0x111   :  { %v3550_v43 = vsel %vm3547_vm7, %v3549_v23, %v11333_v55 }
 0x112   :  { %3541 = vrot.lane.b32.xlu1 %v11298_v16, %s11036_s16 }
 0x114   :  { %604 = vrot.lane.b32.xlu0 %v11303_v40, %s11041_s30 }
 0x116   :  { %3877 = vrot.lane.b32.xlu1 %v11311_v45, %s11042_s15 }
 0x118   :  { %3879 = vrot.lane.b32.xlu0 %v11317_v50, %s11042_s15 }
 0x11a   :  { %606 = vrot.lane.b32.xlu1 %v11323_v53, %s11041_s30 }
 0x11c   :  { %3881 = vrot.lane.b32.xlu0 %v11327_v54, %s11042_s15 }
 0x14e   :  { %v244_v59 = vpop.permute.xlu0 %243 }
 0x14f   :  { %246 = vst.msk [vmem:[#allocation2 + $0x8] sm:$0xf] %vm222_vm2, %v244_v59  ;;  %v11374_v59 = vld [vmem:[%s14100_s3] ss:$8 sps:$4 sm:$0xff]  }
 0x150   :  { %v256_v60 = vpop.permute.xlu1 %255 }
 0x152   :  { %v220_v61 = vpop.permute.xlu0 %219 }
 0x153   :  { %223 = vst.msk [vmem:[#allocation2 + $0x4] sm:$0xf] %vm222_vm2, %v220_v61 }
 0x154   :  { %v229_v0 = vpop.permute.xlu1 %228 }
 0x155   :  { %232 = vst.msk [vmem:[#allocation2 + $0x4] sm:$0xf] %vm231_vm3, %v229_v0  ;;  %v11381_v0 = vcombine.low %v2141_v47, %v2148_v51 }
 0x156   :  { %v252_v1 = vpop.permute.xlu0 %251 }
 0x157   :  { %254 = vst.msk [vmem:[#allocation2 + $0x8] sm:$0xf] %vm231_vm3, %v252_v1  ;;  %v420_v1 = vrot.slane %v415_v52, %v11223_v19 }
 0x158   :  { %258 = vst.msk [vmem:[#allocation2 + $0x8] sm:$0xf] %vm236_vm4, %v256_v60  ;;  %v265_v2 = vpop.permute.xlu1 %264 }
 0x159   :  { %267 = vst.msk [vmem:[#allocation2 + $0xc] sm:$0xf] %vm222_vm2, %v265_v2  ;;  %v434_v2 = vrot.slane %v429_v62, %v11223_v19 }
 0x15a   :  { %v234_v3 = vpop.permute.xlu0 %233 }
 0x15b   :  { %237 = vst.msk [vmem:[#allocation2 + $0x4] sm:$0xf] %vm236_vm4, %v234_v3  ;;  %v441_v3 = vrot.slane %v436_v63, %v11223_v19 }
 0x15c   :  { %v273_v7 = vpop.permute.xlu1 %272 }
 0x15d   :  { %275 = vst.msk [vmem:[#allocation2 + $0xc] sm:$0xf] %vm231_vm3, %v273_v7  ;;  %v11403_v18 = vcombine.low %v434_v2, %v441_v3 }
 0x15e   :  { %v277_v15 = vpop.permute.xlu0 %276 }
 0x15f   :  { %279 = vst.msk [vmem:[#allocation2 + $0xc] sm:$0xf] %vm236_vm4, %v277_v15  ;;  %v11401_v15 = vcombine.low %v420_v1, %v427_v27 }
 0x160   :  { %v286_v22 = vpop.permute.xlu1 %285 }
 0x161   :  { %288 = vst.msk [vmem:[#allocation2 + $0x10] sm:$0xf] %vm222_vm2, %v286_v22 }
 0x162   :  { %v11352_v24 = vld [vmem:[#allocation2] sm:$0xff]  ;;  %v328_v25 = vpop.permute.xlu0 %327 }
 0x163   :  { %330 = vst.msk [vmem:[#allocation2 + $0x18] sm:$0xf] %vm222_vm2, %v328_v25  ;;  %v3560_v36 = vmul.bf16 %v3548_v5, %v11352_v24 }
 0x164   :  { %v294_v37 = vpop.permute.xlu1 %293 }
 0x165   :  { %296 = vst.msk [vmem:[#allocation2 + $0x10] sm:$0xf] %vm231_vm3, %v294_v37  ;;  %v9756_v41 = vcombine.low %v3560_v36, %v3560_v36  ;;  %v9757_v42 = vcombine.high %v3560_v36, %v3560_v36 }
 0x166   :  { %v11359_v44 = vld [vmem:[#allocation2 + $0x8] sm:$0xff]  ;;  %v307_v46 = vpop.permute.xlu0 %306 }
 0x167   :  { %309 = vst.msk [vmem:[#allocation2 + $0x14] sm:$0xf] %vm222_vm2, %v307_v46  ;;  %3592 = vrot.lane.b32.xlu1 %v9756_v41, %s11043_s2  ;;  %3594 = vrot.lane.b32.xlu0 %v9757_v42, %s11043_s2  ;;  %v3561_v55 = vmul.bf16 %v3550_v43, %v11359_v44 }
 0x168   :  { %v298_v6 = vpop.permute.xlu1 %297 }
 0x169   :  { %300 = vst.msk [vmem:[#allocation2 + $0x10] sm:$0xf] %vm236_vm4, %v298_v6  ;;  %v9758_v60 = vcombine.low %v3561_v55, %v3561_v55  ;;  %v9759_v62 = vcombine.high %v3561_v55, %v3561_v55 }
 0x16a   :  { %v315_v61 = vpop.permute.xlu0 %314 }
 0x16b   :  { %317 = vst.msk [vmem:[#allocation2 + $0x14] sm:$0xf] %vm231_vm3, %v315_v61  ;;  %3596 = vrot.lane.b32.xlu1 %v9758_v60, %s11043_s2  ;;  %3565 = vrot.lane.b32.xlu0 %v11374_v59, %s11040_s22 }
 0x16c   :  { %v3540_v4 = vpop.permute.xlu1 %3539 }
 0x16d   :  { %v3545_v13 = vrot.slane %v3540_v4, 4 }
 0x16e   :  { %v319_v7 = vpop.permute.xlu0 %318 }
 0x16f   :  { %321 = vst.msk [vmem:[#allocation2 + $0x14] sm:$0xf] %vm236_vm4, %v319_v7  ;;  %3567 = vrot.lane.b32.xlu1 %v11391_v26, %s11040_s22  ;;  %3883 = vrot.lane.b32.xlu0 %v11381_v0, %s11042_s15  ;;  %v3551_v5 = vsel %vm504_vm6, %v3544_v8, %v3545_v13 }
 0x170   :  { %v336_v21 = vpop.permute.xlu1 %335  ;;  %v3552_v30 = vsel %vm3547_vm7, %v3551_v5, %v3540_v4 }
 0x171   :  { %338 = vst.msk [vmem:[#allocation2 + $0x18] sm:$0xf] %vm231_vm3, %v336_v21 }
 0x172   :  { %v340_v22 = vpop.permute.xlu0 %339 }
 0x173   :  { %342 = vst.msk [vmem:[#allocation2 + $0x18] sm:$0xf] %vm236_vm4, %v340_v22  ;;  %490 = vrot.lane.b32.xlu1 %v11401_v15, %s11044_s25  ;;  %492 = vrot.lane.b32.xlu0 %v11403_v18, %s11044_s25 }
 0x174   :  { %v601_v23 = vpop.permute.xlu1 %600 }
 0x175   :  { %v608_v25 = vrot.slane %v601_v23, 4 }
 0x176   :  { %v11413_v31 = vld [vmem:[#allocation2 + $0x10] sm:$0xff]  ;;  %v370_v36 = vpop.permute.xlu0 %369 }
 0x177   :  { %v11416_v37 = vsel %vm14149_vm8, %v608_v25, %v601_v23  ;;  %372 = vst.msk [vmem:[#allocation2 + $0x20] sm:$0xf] %vm222_vm2, %v370_v36  ;;  %v11420_v8 = vmul.bf16 %v3552_v30, %v11413_v31 }
 0x178   :  { %14153 = vst [vmem:[#allocation3_spill] sm:$0xff] %v11416_v37  ;;  %v625_v41 = vmul.bf16 %v11416_v37, %v11352_v24  ;;  %v349_v42 = vpop.permute.xlu1 %348 }
 0x179   :  { %351 = vst.msk [vmem:[#allocation2 + $0x1c] sm:$0xf] %vm222_vm2, %v349_v42  ;;  %v9760_v43 = vcombine.low %v11420_v8, %v11420_v8  ;;  %vm969_vm2 = vcmask 539648  }
 0x17a   :  { %v382_v46 = vpop.permute.xlu0 %381  ;;  %v9560_v47 = vcombine.low %v625_v41, %v625_v41  ;;  %v9561_v52 = vcombine.high %v625_v41, %v625_v41 }
 0x17b   :  { %3600 = vrot.lane.b32.xlu0 %v9760_v43, %s11043_s2  ;;  %v450_v43 = vpack.i.b16 %v11255_v39, %v11255_v39 }
 0x17c   :  { %v378_v51 = vpop.permute.xlu1 %377  ;;  %665 = vrot.lane.b32.xlu1 %v9560_v47, %s11045_s26 }
 0x17d   :  { %380 = vst.msk [vmem:[#allocation2 + $0x20] sm:$0xf] %vm231_vm3, %v378_v51 }
 0x17e   :  { %384 = vst.msk [vmem:[#allocation2 + $0x20] sm:$0xf] %vm236_vm4, %v382_v46  ;;  %v357_v58 = vpop.permute.xlu0 %356 }
 0x17f   :  { %359 = vst.msk [vmem:[#allocation2 + $0x1c] sm:$0xf] %vm231_vm3, %v357_v58  ;;  %667 = vrot.lane.b32.xlu0 %v9561_v52, %s11045_s26  ;;  %v455_v52 = vrot.slane %v450_v43, %v11223_v19  ;;  %vm4294_vm3 = vcmask 15360  }
 0x180   :  { %3598 = vrot.lane.b32.xlu1 %v9759_v62, %s11043_s2  ;;  %v361_v63 = vpop.permute.xlu1 %360 }
 0x181   :  { %363 = vst.msk [vmem:[#allocation2 + $0x1c] sm:$0xf] %vm236_vm4, %v361_v63  ;;  %vm4636_vm4 = vcmask 7168  }
 0x182   :  { %v603_v6 = vpop.permute.xlu0 %602 }
 0x183   :  { %v609_v60 = vrot.slane %v603_v6, 4  ;;  %4219 = vrot.lane.b32.xlu0 %v11401_v15, %s11046_s27 }
 0x184   :  { %v3542_v61 = vpop.permute.xlu1 %3541 }
 0x185   :  { %v11437_v1 = vld [vmem:[#allocation2 + $0x20] sm:$0xf]  ;;  %v614_v55 = vsel %vm504_vm6, %v608_v25, %v609_v60  ;;  %v3546_v27 = vrot.slane %v3542_v61, 4 }
 0x186   :  { %v11441_v2 = vsel %vm14149_vm8, %v614_v55, %v603_v6  ;;  %v605_v25 = vpop.permute.xlu0 %604 }
 0x187   :  { %14154 = vst [vmem:[#allocation4_spill] sm:$0xff] %v11441_v2  ;;  %v626_v3 = vmul.bf16 %v11441_v2, %v11359_v44  ;;  %v3553_v4 = vsel %vm504_vm6, %v3545_v13, %v3546_v27  ;;  %v3564_v22 = vmul.bf16 %v3546_v27, %v11437_v1  ;;  %v610_v41 = vrot.slane %v605_v25, 4 }
 0x188   :  { %v11446_v7 = vld [vmem:[#allocation2 + $0x18] sm:$0xff]  ;;  %v3554_v21 = vsel %vm3547_vm7, %v3553_v4, %v3542_v61  ;;  %v3878_v42 = vpop.permute.xlu1 %3877  ;;  %v443_v13 = vpack.i.b16 %v11253_v38, %v11253_v38 }
 0x189   :  { %v3563_v5 = vmul.bf16 %v3554_v21, %v11446_v7  ;;  %v9764_v23 = vcombine.low %v3564_v22, %v3564_v22  ;;  %v9562_v30 = vcombine.low %v626_v3, %v626_v3  ;;  %v3885_v46 = vrot.slane %v3878_v42, 4 }
 0x18a   :  { %v616_v47 = vsel %vm504_vm6, %v609_v60, %v610_v41  ;;  %v448_v51 = vrot.slane %v443_v13, %v11223_v19  ;;  %v3880_v58 = vpop.permute.xlu0 %3879  ;;  %v9563_v38 = vcombine.high %v626_v3, %v626_v3 }
 0x18b   :  { %3608 = vrot.lane.b32.xlu0 %v9764_v23, %s11043_s2  ;;  %669 = vrot.lane.b32.xlu1 %v9562_v30, %s11045_s26  ;;  %v9762_v36 = vcombine.low %v3563_v5, %v3563_v5  ;;  %v9763_v62 = vcombine.high %v3563_v5, %v3563_v5  ;;  %v11468_v39 = vsel %vm14149_vm8, %v616_v47, %v605_v25  ;;  %v3886_v6 = vrot.slane %v3880_v58, 4 }
 0x18c   :  { %14155 = vst [vmem:[#allocation5_spill] sm:$0xff] %v11468_v39  ;;  %v3890_v63 = vsel %vm14151_vm9, %v3885_v46, %v3878_v42  ;;  %v11473_v60 = vcombine.low %v448_v51, %v455_v52  ;;  %v607_v61 = vpop.permute.xlu1 %606  ;;  %v627_v55 = vmul.bf16 %v11468_v39, %v11413_v31  ;;  %v457_v30 = vpack.i.b16 %v11275_v56, %v11275_v56 }
 0x18d   :  { %v3902_v27 = vmul.bf16 %v3890_v63, %v11352_v24  ;;  %v3891_v3 = vsel %vm504_vm6, %v3885_v46, %v3886_v6  ;;  %v11479_v4 = vrot.slane %v607_v61, 4  ;;  %v464_v25 = vpack.i.b16 %v11277_v57, %v11277_v57 }
 0x18e   :  { %v9564_v22 = vcombine.low %v627_v55, %v627_v55  ;;  %v3892_v5 = vsel %vm14151_vm9, %v3891_v3, %v3880_v58  ;;  %v3882_v46 = vpop.permute.xlu0 %3881  ;;  %v1244_v3 = vpack.i.b16 %v11135_v12, %v11135_v12 }
 0x18f   :  { %3604 = vrot.lane.b32.xlu0 %v9762_v36, %s11043_s2  ;;  %4221 = vrot.lane.b32.xlu1 %v11403_v18, %s11046_s27  ;;  %14156 = vst [vmem:[#allocation6_spill] sm:$0xff] %v11479_v4  ;;  %v9778_v21 = vcombine.high %v3902_v27, %v3902_v27  ;;  %v618_v23 = vsel %vm504_vm6, %v610_v41, %v11479_v4  ;;  %v3887_v47 = vrot.slane %v3882_v46, 4 }
 0x190   :  { %v3903_v36 = vmul.bf16 %v3892_v5, %v11359_v44  ;;  %v9777_v42 = vcombine.low %v3902_v27, %v3902_v27  ;;  %v11496_v13 = vsel %vm14149_vm8, %v618_v23, %v607_v61  ;;  %v462_v41 = vrot.slane %v457_v30, %v11223_v19 }
 0x191   :  { %14157 = vst [vmem:[#allocation7_spill] sm:$0xff] %v11496_v13  ;;  %v469_v43 = vrot.slane %v464_v25, %v11223_v19  ;;  %v11504_v56 = vmul.bf16 %v11496_v13, %v11446_v7  ;;  %v3893_v58 = vsel %vm504_vm6, %v3886_v6, %v3887_v47  ;;  %v629_v61 = vmul.bf16 %v11479_v4, %v11437_v1  ;;  %v4904_v13 = vld [vmem:[#allocation2 + $0xc] sm:$0xff] }
 0x192   :  { %v9779_v57 = vcombine.low %v3903_v36, %v3903_v36  ;;  %v9780_v19 = vcombine.high %v3903_v36, %v3903_v36  ;;  %v1237_v27 = vpack.i.b16 %v11133_v11, %v11133_v11 }
 0x193   :  { %640 = vrot.lane.b32.xlu0 %v11391_v26, %s11047_s28  ;;  %638 = vrot.lane.b32.xlu1 %v11374_v59, %s11047_s28  ;;  %v11508_v51 = vcombine.low %v462_v41, %v469_v43  ;;  %v9566_v52 = vcombine.low %v11504_v56, %v11504_v56 }
 0x197   :  { %671 = vrot.lane.b32.xlu0 %v9563_v38, %s11045_s26  ;;  %3606 = vrot.lane.b32.xlu1 %v9763_v62, %s11043_s2  ;;  %v9565_v38 = vcombine.high %v627_v55, %v627_v55  ;;  %v3894_v62 = vsel %vm14151_vm9, %v3893_v58, %v3882_v46  ;;  %v9568_v55 = vcombine.low %v629_v61, %v629_v61 }
 0x198   :  { %v11520_v63 = vmul.bf16 %v3894_v62, %v11413_v31 }
 0x19a   :  { %v9781_v6 = vcombine.low %v11520_v63, %v11520_v63 }
 0x19b   :  { %4223 = vrot.lane.b32.xlu0 %v11473_v60, %s11046_s27  ;;  %494 = vrot.lane.b32.xlu1 %v11473_v60, %s11044_s25 }
 0x19f   :  { %3936 = vrot.lane.b32.xlu0 %v9778_v21, %s11048_s1  ;;  %673 = vrot.lane.b32.xlu1 %v9564_v22, %s11045_s26  ;;  %v1242_v21 = vrot.slane %v1237_v27, %v11141_v14  ;;  %v1249_v22 = vrot.slane %v1244_v3, %v11141_v14 }
 0x1a1   :  { %v11540_v5 = vcombine.low %v1242_v21, %v1249_v22 }
 0x1a3   :  { %3907 = vrot.lane.b32.xlu0 %v11374_v59, %s11049_s29  ;;  %3934 = vrot.lane.b32.xlu1 %v9777_v42, %s11048_s1 }
 0x1a7   :  { %3909 = vrot.lane.b32.xlu0 %v11391_v26, %s11049_s29  ;;  %3938 = vrot.lane.b32.xlu1 %v9779_v57, %s11048_s1  ;;  %s11060_s29 = smov 16  }
 0x1ab   :  { %677 = vrot.lane.b32.xlu0 %v9566_v52, %s11045_s26  ;;  %496 = vrot.lane.b32.xlu1 %v11508_v51, %s11044_s25 }
 0x1af   :  { %3940 = vrot.lane.b32.xlu0 %v9780_v19, %s11048_s1  ;;  %675 = vrot.lane.b32.xlu1 %v9565_v38, %s11045_s26 }
 0x1b3   :  { %4561 = vrot.lane.b32.xlu0 %v11249_v34, %s11050_s7  ;;  %4225 = vrot.lane.b32.xlu1 %v11508_v51, %s11046_s27 }
 0x1b7   :  { %3942 = vrot.lane.b32.xlu1 %v9781_v6, %s11048_s1 }
 0x1bb   :  { %681 = vrot.lane.b32.xlu1 %v9568_v55, %s11045_s26 }
 0x1bf   :  { %4563 = vrot.lane.b32.xlu1 %v11293_v20, %s11050_s7 }
 0x1c3   :  { %1312 = vrot.lane.b32.xlu1 %v11540_v5, %s11040_s22 }
 0x1d9   :  { %v3593_v23 = vpop.permute.xlu1 %3592  ;;  %v3595_v30 = vpop.permute.xlu0 %3594 }
 0x1da   :  { %v3611_v11 = vsel %vm3610_vm10, %v3593_v23, %v3595_v30  ;;  %v9567_v23 = vcombine.high %v11504_v56, %v11504_v56 }
 0x1db   :  { %v3626_v42 = vsel %vm504_vm6, %v3611_v11, 0  ;;  %v1258_v11 = vpack.i.b16 %v11131_v10, %v11131_v10 }
 0x1dd   :  { %v3597_v12 = vpop.permute.xlu1 %3596  ;;  %v11545_v25 = vpop.permute.xlu0 %3565 }
 0x1de   :  { %14158 = vst [vmem:[#allocation8_spill] sm:$0xff] %v11545_v25  ;;  %v3612_v36 = vsel %vm3610_vm10, %v3595_v30, %v3597_v12  ;;  %v1251_v30 = vpack.i.b16 %v11129_v9, %v11129_v9 }
 0x1df   :  { %9765 = vmatprep.subr.msk.bf16.mxu1 %vm504_vm6, %v3612_v36 }
 0x1e0   :  { %3650 = vmatpush1.bf16.msra.mxu1 %v3626_v42  ;;  %v1256_v10 = vrot.slane %v1251_v30, %v11141_v14 }
 0x1e1   :  { %v11550_v41 = vpop.permute.xlu1 %3567  ;;  %v3884_v43 = vpop.permute.xlu0 %3883 }
 0x1e2   :  { %14159 = vst [vmem:[#allocation9_spill] sm:$0xff] %v11550_v41  ;;  %v3888_v46 = vrot.slane %v3884_v43, 4 }
 0x1e3   :  { %9766 = vmatmul.mubr.msk.bf16.vlgmr.msra.gmra.mrb[0].mxu1 %vm692_vm11, %v11545_v25 }
 0x1e4   :  { %v3895_v57 = vsel %vm504_vm6, %v3887_v47, %v3888_v46  ;;  %v3906_v52 = vmul.bf16 %v3888_v46, %v11437_v1  ;;  %3691 = vmatprep.mubr.bf16.mxu1 %v14110_v35  ;;  %v1263_v46 = vrot.slane %v1258_v11, %v11141_v14 }
 0x1e5   :  { %v3896_v58 = vsel %vm14151_vm9, %v3895_v57, %v3884_v43  ;;  %v491_v19 = vpop.permute.xlu1 %490  ;;  %v11558_v38 = vpop.permute.xlu0 %492 }
 0x1e6   :  { %v3905_v62 = vmul.bf16 %v3896_v58, %v11446_v7  ;;  %v498_v6 = vrot.slane %v491_v19, 4  ;;  %v499_v61 = vrot.slane %v11558_v38, 4  ;;  %v9785_v55 = vcombine.low %v3906_v52, %v3906_v52 }
 0x1e8   :  { %v11563_v27 = vsel %vm14148_vm12, %v498_v6, %v491_v19  ;;  %v505_v47 = vsel %vm504_vm6, %v498_v6, %v499_v61  ;;  %3950 = vrot.lane.b32.xlu0 %v9785_v55, %s11048_s1  ;;  %v9784_v3 = vcombine.high %v3905_v62, %v3905_v62  ;;  %v9783_v9 = vcombine.low %v3905_v62, %v3905_v62 }
 0x1e9   :  { %v516_v21 = vmul.bf16 %v11563_v27, %v11352_v24  ;;  %v11573_v22 = vsel %vm14148_vm12, %v505_v47, %v11558_v38  ;;  %v11599_v19 = vcombine.low %v1256_v10, %v1263_v46 }
 0x1ea   :  { %3948 = vrot.lane.b32.xlu1 %v9784_v3, %s11048_s1  ;;  %v11586_v42 = vmul.bf16 %v11573_v22, %v11359_v44 }
 0x1eb   :  { %9767 = vmatmul.mubr.msk.bf16.gmra.mrb[4].mxu1 %vm692_vm11, %v11550_v41  ;;  %v9581_v36 = vcombine.low %v516_v21, %v516_v21 }
 0x1ec   :  { %679 = vrot.lane.b32.xlu0 %v9567_v23, %s11045_s26  ;;  %3732 = vmatprep.mubr.bf16.mxu1 %v14110_v35  ;;  %v9583_v57 = vcombine.low %v11586_v42, %v11586_v42  ;;  %v9582_v23 = vcombine.high %v516_v21, %v516_v21 }
 0x1ed   :  { %v11590_v43 = vpop.permute.xlu0 %3600 }
 0x1ee   :  { %14160 = vst [vmem:[#allocation10_spill] sm:$0xff] %v11590_v43  ;;  %v666_v56 = vpop.permute.xlu1 %665  ;;  %951 = vrot.lane.b32.xlu1 %v9581_v36, %s11051_s8 }
 0x1f0   :  { %3946 = vrot.lane.b32.xlu0 %v9783_v9, %s11048_s1 }
 0x1f1   :  { %v668_v52 = vpop.permute.xlu0 %667 }
 0x1f2   :  { %v3599_v58 = vpop.permute.xlu1 %3598  ;;  %955 = vrot.lane.b32.xlu1 %v9583_v57, %s11051_s8  ;;  %v684_v36 = vsel %vm14152_vm14, %v666_v56, %v668_v52 }
 0x1f3   :  { %v3613_v6 = vsel %vm3610_vm10, %v3597_v12, %v3599_v58  ;;  %v3614_v62 = vsel %vm3610_vm10, %v3599_v58, %v11590_v43  ;;  %v701_v57 = vsel %vm504_vm6, %v684_v36, 0 }
 0x1f4   :  { %1314 = vrot.lane.b32.xlu0 %v11599_v19, %s11040_s22  ;;  %9768 = vmatprep.subr.msk.bf16.mxu1 %vm504_vm6, %v3614_v62  ;;  %v3632_v55 = vsel %vm504_vm6, %v3613_v6, 0 }
 0x1f5   :  { %3701 = vmatpush1.bf16.msra.mxu1 %v3632_v55  ;;  %v4220_v47 = vpop.permute.xlu0 %4219  ;;  %v1272_v55 = vpack.i.b16 %v11192_v49, %v11192_v49 }
 0x1f6   :  { %v4227_v3 = vrot.slane %v4220_v47, 4 }
 0x1f8   :  { %v4232_v30 = vsel %vm4231_vm13, %v4227_v3, %v4220_v47  ;;  %953 = vrot.lane.b32.xlu0 %v9582_v23, %s11051_s8  ;;  %9769 = vmatmul.mubr.msk.bf16.vlgmr.msra.gmra.mrb[8].mxu1 %vm692_vm11, %v11545_v25 }
 0x1f9   :  { %v4244_v12 = vmul.bf16 %v4232_v30, %v11352_v24  ;;  %3742 = vmatprep.mubr.bf16.mxu1 %v14110_v35 }
 0x1fb   :  { %v9798_v11 = vcombine.low %v4244_v12, %v4244_v12  ;;  %v9799_v46 = vcombine.high %v4244_v12, %v4244_v12 }
 0x1fc   :  { %4565 = vrot.lane.b32.xlu0 %v11303_v40, %s11050_s7 }
 0x1fd   :  { %4276 = vrot.lane.b32.xlu1 %v9798_v11, %s11052_s9  ;;  %v670_v21 = vpop.permute.xlu1 %669  ;;  %v3609_v9 = vpop.permute.xlu0 %3608 }
 0x1fe   :  { %v685_v10 = vsel %vm14152_vm14, %v668_v52, %v670_v21  ;;  %v1265_v52 = vpack.i.b16 %v11189_v48, %v11189_v48  ;;  %v1277_v48 = vrot.slane %v1272_v55, %v11141_v14 }
 0x1ff   :  { %9569 = vmatprep.subr.msk.bf16.mxu0 %vm504_vm6, %v685_v10 }
 0x200   :  { %9770 = vmatmul.mubr.msk.bf16.gmra.mrb[12].mxu1 %vm692_vm11, %v11550_v41  ;;  %725 = vmatpush1.bf16.msra.mxu0 %v701_v57  ;;  %v1270_v11 = vrot.slane %v1265_v52, %v11141_v14 }
 0x201   :  { %4278 = vrot.lane.b32.xlu0 %v9799_v46, %s11052_s9  ;;  %v4222_v58 = vpop.permute.xlu1 %4221  ;;  %v11624_v56 = vpop.permute.xlu0 %3604  ;;  %3834 = vmatprep.mubr.bf16.mxu1 %v14110_v35 }
 0x202   :  { %14161 = vst [vmem:[#allocation11_spill] sm:$0xff] %v11624_v56  ;;  %v4228_v6 = vrot.slane %v4222_v58, 4 }
 0x204   :  { %v4233_v62 = vsel %vm504_vm6, %v4227_v3, %v4228_v6 }
 0x205   :  { %4249 = vrot.lane.b32.xlu0 %v11374_v59, %s11053_s10  ;;  %v4234_v47 = vsel %vm4231_vm13, %v4233_v62, %v4222_v58  ;;  %v11634_v23 = vpop.permute.xlu1 %638  ;;  %v11636_v30 = vpop.permute.xlu0 %640  ;;  %v11651_v58 = vcombine.low %v1270_v11, %v1277_v48  ;;  %v9584_v48 = vcombine.high %v11586_v42, %v11586_v42 }
 0x206   :  { %v4245_v12 = vmul.bf16 %v4234_v47, %v11359_v44  ;;  %9570 = vmatmul.mubr.msk.bf16.vlgmr.msra.gmra.mrb[16].mxu0 %vm692_vm11, %v11634_v23 }
 0x207   :  { %766 = vmatprep.mubr.bf16.mxu0 %v14110_v35 }
 0x208   :  { %v9800_v3 = vcombine.low %v4245_v12, %v4245_v12 }
 0x209   :  { %4251 = vrot.lane.b32.xlu0 %v11391_v26, %s11053_s10  ;;  %v3607_v49 = vpop.permute.xlu1 %3606  ;;  %v672_v36 = vpop.permute.xlu0 %671  ;;  %s11061_s10 = smov 8  }
 0x20a   :  { %v3617_v10 = vsel %vm3610_vm10, %v11624_v56, %v3607_v49  ;;  %4280 = vrot.lane.b32.xlu1 %v9800_v3, %s11052_s9  ;;  %v3618_v46 = vsel %vm3610_vm10, %v3607_v49, %v3609_v9  ;;  %v686_v9 = vsel %vm14152_vm14, %v670_v21, %v672_v36 }
 0x20b   :  { %9774 = vmatprep.subr.msk.bf16.mxu1 %vm504_vm6, %v3618_v46  ;;  %v3644_v57 = vsel %vm504_vm6, %v3617_v10, 0  ;;  %v707_v42 = vsel %vm504_vm6, %v686_v9, 0  ;;  %v9801_v9 = vcombine.high %v4245_v12, %v4245_v12 }
 0x20c   :  { %3803 = vmatpush1.bf16.msra.mxu1 %v3644_v57  ;;  %v1286_v57 = vpack.i.b16 %v11246_v33, %v11246_v33 }
 0x20d   :  { %v495_v62 = vpop.permute.xlu1 %494  ;;  %v11653_v52 = vpop.permute.xlu0 %4223 }
 0x20e   :  { %v500_v55 = vrot.slane %v495_v62, 4  ;;  %v14104_v47 = vrot.slane %v11653_v52, 4  ;;  %1316 = vrot.lane.b32.xlu1 %v11651_v58, %s11040_s22  ;;  %9571 = vmatmul.mubr.msk.bf16.gmra.mrb[20].mxu0 %vm692_vm11, %v11636_v30  ;;  %v1291_v33 = vrot.slane %v1286_v57, %v11141_v14 }
 0x20f   :  { %9775 = vmatmul.mubr.msk.bf16.vlgmr.msra.gmra.mrb[16].mxu1 %vm692_vm11, %v11545_v25  ;;  %807 = vmatprep.mubr.bf16.mxu0 %v14110_v35 }
 0x210   :  { %v507_v3 = vsel %vm504_vm6, %v499_v61, %v500_v55  ;;  %v4235_v11 = vsel %vm504_vm6, %v4228_v6, %v14104_v47  ;;  %3844 = vmatprep.mubr.bf16.mxu1 %v14110_v35  ;;  %v1279_v6 = vpack.i.b16 %v11244_v32, %v11244_v32 }
 0x211   :  { %v11674_v49 = vsel %vm14148_vm12, %v507_v3, %v495_v62  ;;  %v4236_v10 = vsel %vm4231_vm13, %v4235_v11, %v11653_v52  ;;  %v674_v21 = vpop.permute.xlu1 %673  ;;  %v3937_v46 = vpop.permute.xlu0 %3936 }
 0x212   :  { %v518_v38 = vmul.bf16 %v11674_v49, %v11413_v31  ;;  %957 = vrot.lane.b32.xlu1 %v9584_v48, %s11051_s8  ;;  %v687_v61 = vsel %vm14152_vm14, %v672_v36, %v674_v21  ;;  %v11689_v62 = vmul.bf16 %v4236_v10, %v11413_v31  ;;  %v1284_v32 = vrot.slane %v1279_v6, %v11141_v14 }
 0x213   :  { %9572 = vmatprep.subr.msk.bf16.mxu0 %vm504_vm6, %v687_v61 }
 0x214   :  { %776 = vmatpush1.bf16.msra.mxu0 %v707_v42  ;;  %v9585_v3 = vcombine.low %v518_v38, %v518_v38  ;;  %v9802_v10 = vcombine.low %v11689_v62, %v11689_v62  ;;  %v11714_v12 = vcombine.low %v1284_v32, %v1291_v33  ;;  %v9586_v57 = vcombine.high %v518_v38, %v518_v38 }
 0x215   :  { %v3935_v11 = vpop.permute.xlu1 %3934  ;;  %v11691_v48 = vpop.permute.xlu0 %3907 }
 0x216   :  { %14162 = vst [vmem:[#allocation12_spill] sm:$0xff] %v11691_v48  ;;  %959 = vrot.lane.b32.xlu0 %v9585_v3, %s11051_s8  ;;  %4567 = vrot.lane.b32.xlu1 %v11323_v53, %s11050_s7  ;;  %v3953_v36 = vsel %vm3952_vm15, %v3935_v11, %v3937_v46 }
 0x217   :  { %9776 = vmatmul.mubr.msk.bf16.gmra.mrb[20].mxu1 %vm692_vm11, %v11550_v41  ;;  %9573 = vmatmul.mubr.msk.bf16.vlgmr.msra.gmra.mrb[24].mxu0 %vm692_vm11, %v11634_v23  ;;  %v3968_v6 = vsel %vm504_vm6, %v3953_v36, 0 }
 0x218   :  { %817 = vmatprep.mubr.bf16.mxu0 %v14110_v35  ;;  %4023 = vmatprep.mubr.bf16.mxu1 %v14110_v35 }
 0x219   :  { %v3939_v61 = vpop.permute.xlu1 %3938  ;;  %v11707_v42 = vpop.permute.xlu0 %3909 }
 0x21a   :  { %14163 = vst [vmem:[#allocation13_spill] sm:$0xff] %v11707_v42  ;;  %4282 = vrot.lane.b32.xlu0 %v9801_v9, %s11052_s9  ;;  %4284 = vrot.lane.b32.xlu1 %v9802_v10, %s11052_s9  ;;  %v3954_v14 = vsel %vm3952_vm15, %v3937_v46, %v3939_v61 }
 0x21b   :  { %9786 = vmatprep.subr.msk.bf16.mxu1 %vm504_vm6, %v3954_v14 }
 0x21c   :  { %3992 = vmatpush1.bf16.msra.mxu1 %v3968_v6 }
 0x21d   :  { %v497_v3 = vpop.permute.xlu1 %496  ;;  %v11716_v11 = vpop.permute.xlu0 %677 }
 0x21e   :  { %v11718_v47 = vrot.slane %v497_v3, 4  ;;  %1318 = vrot.lane.b32.xlu0 %v11714_v12, %s11040_s22  ;;  %961 = vrot.lane.b32.xlu1 %v9586_v57, %s11051_s8 }
 0x21f   :  { %9574 = vmatmul.mubr.msk.bf16.gmra.mrb[28].mxu0 %vm692_vm11, %v11636_v30  ;;  %9787 = vmatmul.mubr.msk.bf16.vlgmr.msra.gmra.mrb[0].mxu1 %vm692_vm11, %v11691_v48 }
 0x220   :  { %14164 = vst [vmem:[#allocation14_spill] sm:$0xff] %v11718_v47  ;;  %v509_v46 = vsel %vm504_vm6, %v500_v55, %v11718_v47  ;;  %858 = vmatprep.mubr.bf16.mxu0 %v14110_v35  ;;  %4033 = vmatprep.mubr.bf16.mxu1 %v14110_v35 }
 0x221   :  { %v11732_v38 = vsel %vm14148_vm12, %v509_v46, %v497_v3  ;;  %v676_v32 = vpop.permute.xlu1 %675  ;;  %v3941_v33 = vpop.permute.xlu0 %3940 }
 0x222   :  { %v11736_v36 = vmul.bf16 %v11732_v38, %v11446_v7  ;;  %v688_v9 = vsel %vm14152_vm14, %v674_v21, %v676_v32  ;;  %v689_v10 = vsel %vm14152_vm14, %v676_v32, %v11716_v11  ;;  %v3955_v21 = vsel %vm3952_vm15, %v3939_v61, %v3941_v33 }
 0x223   :  { %v713_v55 = vsel %vm504_vm6, %v688_v9, 0  ;;  %9575 = vmatprep.subr.msk.bf16.mxu0 %vm504_vm6, %v689_v10  ;;  %v14165_v32 = vrot.slane %v11653_v52, 4 }
 0x224   :  { %v9587_v14 = vcombine.low %v11736_v36, %v11736_v36  ;;  %827 = vmatpush1.bf16.msra.mxu0 %v713_v55 }
 0x225   :  { %v4226_v6 = vpop.permute.xlu1 %4225  ;;  %v4562_v57 = vpop.permute.xlu0 %4561 }
 0x226   :  { %v4230_v3 = vrot.slane %v4226_v6, 4  ;;  %v4569_v46 = vrot.slane %v4562_v57, 4  ;;  %963 = vrot.lane.b32.xlu0 %v9587_v14, %s11051_s8 }
 0x227   :  { %9788 = vmatmul.mubr.msk.bf16.gmra.mrb[4].mxu1 %vm692_vm11, %v11707_v42  ;;  %9576 = vmatmul.mubr.msk.bf16.vlgmr.msra.gmra.mrb[32].mxu0 %vm692_vm11, %v11634_v23 }
 0x228   :  { %v4237_v9 = vsel %vm504_vm6, %v14165_v32, %v4230_v3  ;;  %v4248_v10 = vmul.bf16 %v4230_v3, %v11437_v1  ;;  %4074 = vmatprep.mubr.bf16.mxu1 %v14110_v35  ;;  %v4574_v14 = vsel %vm4573_vm0, %v4569_v46, %v4562_v57  ;;  %868 = vmatprep.mubr.bf16.mxu0 %v14110_v35  ;;  %v3974_v3 = vsel %vm504_vm6, %v3955_v21, 0 }
 0x229   :  { %v4238_v55 = vsel %vm4231_vm13, %v4237_v9, %v4226_v6  ;;  %v11758_v41 = vpop.permute.xlu1 %3942  ;;  %v4586_v4 = vmul.bf16 %v4574_v14, %v11352_v24  ;;  %v520_v9 = vmul.bf16 %v11718_v47, %v11437_v1 }
 0x22a   :  { %14166 = vst [vmem:[#allocation15_spill] sm:$0xff] %v11758_v41  ;;  %v4247_v61 = vmul.bf16 %v4238_v55, %v11446_v7  ;;  %v3956_v52 = vsel %vm3952_vm15, %v3941_v33, %v11758_v41  ;;  %v9806_v32 = vcombine.low %v4248_v10, %v4248_v10 }
 0x22b   :  { %9789 = vmatprep.subr.msk.bf16.mxu1 %vm504_vm6, %v3956_v52  ;;  %v9819_v33 = vcombine.low %v4586_v4, %v4586_v4  ;;  %v9589_v10 = vcombine.low %v520_v9, %v520_v9  ;;  %v9820_v52 = vcombine.high %v4586_v4, %v4586_v4  ;;  %v9588_v4 = vcombine.high %v11736_v36, %v11736_v36 }
 0x22c   :  { %v9805_v25 = vcombine.high %v4247_v61, %v4247_v61  ;;  %4292 = vrot.lane.b32.xlu1 %v9806_v32, %s11052_s9  ;;  %4043 = vmatpush1.bf16.msra.mxu1 %v3974_v3  ;;  %v9804_v57 = vcombine.low %v4247_v61, %v4247_v61 }
 0x22d   :  { %v682_v6 = vpop.permute.xlu1 %681 }
 0x22e   :  { %4290 = vrot.lane.b32.xlu0 %v9805_v25, %s11052_s9 }
 0x22f   :  { %9790 = vmatmul.mubr.msk.bf16.vlgmr.msra.gmra.mrb[8].mxu1 %vm692_vm11, %v11691_v48  ;;  %9577 = vmatmul.mubr.msk.bf16.gmra.mrb[36].mxu0 %vm692_vm11, %v11636_v30 }
 0x230   :  { %4288 = vrot.lane.b32.xlu1 %v9804_v57, %s11052_s9  ;;  %4084 = vmatprep.mubr.bf16.mxu1 %v14110_v35 }
 0x231   :  { %v11776_v21 = vpop.permute.xlu1 %4563  ;;  %909 = vmatprep.mubr.bf16.mxu0 %v14110_v35 }
 0x232   :  { %v4570_v25 = vrot.slane %v11776_v21, 4  ;;  %4618 = vrot.lane.b32.xlu0 %v9819_v33, %s11054_s11 }
 0x234   :  { %v4575_v55 = vsel %vm504_vm6, %v4569_v46, %v4570_v25  ;;  %967 = vrot.lane.b32.xlu1 %v9589_v10, %s11051_s8 }
 0x235   :  { %v4576_v14 = vsel %vm4573_vm0, %v4575_v55, %v11776_v21  ;;  %v1313_v61 = vpop.permute.xlu1 %1312 }
 0x236   :  { %v4587_v32 = vmul.bf16 %v4576_v14, %v11359_v44  ;;  %v1320_v3 = vrot.slane %v1313_v61, 4 }
 0x237   :  { %9791 = vmatmul.mubr.msk.bf16.gmra.mrb[12].mxu1 %vm692_vm11, %v11707_v42 }
 0x238   :  { %v9821_v57 = vcombine.low %v4587_v32, %v4587_v32  ;;  %4620 = vrot.lane.b32.xlu1 %v9820_v52, %s11054_s11  ;;  %4176 = vmatprep.mubr.bf16.mxu1 %v14110_v35  ;;  %v11795_v46 = vsel %vm14150_vm1, %v1320_v3, %v1313_v61  ;;  %v9822_v10 = vcombine.high %v4587_v32, %v4587_v32 }
 0x239   :  { %14167 = vst [vmem:[#allocation16_spill] sm:$0xff] %v11795_v46  ;;  %v1337_v9 = vmul.bf16 %v11795_v46, %v11352_v24 }
 0x23a   :  { %4622 = vrot.lane.b32.xlu0 %v9821_v57, %s11054_s11 }
 0x23b   :  { %v9614_v33 = vcombine.low %v1337_v9, %v1337_v9  ;;  %v9615_v36 = vcombine.high %v1337_v9, %v1337_v9 }
 0x23c   :  { %4591 = vrot.lane.b32.xlu1 %v11374_v59, %s11055_s12 }
 0x23e   :  { %965 = vrot.lane.b32.xlu0 %v9588_v4, %s11051_s8 }
 0x240   :  { %1731 = vrot.lane.b32.xlu1 %v11156_v28, %s11045_s26 }
 0x242   :  { %1729 = vrot.lane.b32.xlu0 %v11158_v29, %s11045_s26 }
 0x244   :  { %1369 = vrot.lane.b32.xlu1 %v9614_v33, %s11040_s22 }
 0x246   :  { %4593 = vrot.lane.b32.xlu0 %v11391_v26, %s11055_s12  ;;  %s11062_s12 = smov 95  }
 0x24a   :  { %1371 = vrot.lane.b32.xlu0 %v9615_v36, %s11040_s22 }
 0x24e   :  { %4624 = vrot.lane.b32.xlu0 %v9822_v10, %s11054_s11 }
 0x252   :  { %1342 = vrot.lane.b32.xlu0 %v11374_v59, %s11056_s13 }
 0x256   :  { %1733 = vrot.lane.b32.xlu0 %v11218_v17, %s11045_s26 }
 0x25a   :  { %v3951_v24 = vpop.permute.xlu0 %3950 }
 0x25c   :  { %v3949_v55 = vpop.permute.xlu1 %3948 }
 0x25d   :  { %v3960_v14 = vsel %vm3952_vm15, %v3949_v55, %v3951_v24 }
 0x25e   :  { %9795 = vmatprep.subr.msk.bf16.mxu1 %vm504_vm6, %v3960_v14  ;;  %v680_v61 = vpop.permute.xlu0 %679 }
 0x25f   :  { %v690_v52 = vsel %vm14152_vm14, %v11716_v11, %v680_v61  ;;  %v691_v32 = vsel %vm14152_vm14, %v680_v61, %v682_v6 }
 0x260   :  { %9578 = vmatprep.subr.msk.bf16.mxu0 %vm504_vm6, %v691_v32  ;;  %v719_v57 = vsel %vm504_vm6, %v690_v52, 0  ;;  %v952_v33 = vpop.permute.xlu1 %951 }
 0x261   :  { %878 = vmatpush1.bf16.msra.mxu0 %v719_v57 }
 0x262   :  { %v11822_v4 = vpop.permute.xlu0 %3946 }
 0x263   :  { %14168 = vst [vmem:[#allocation17_spill] sm:$0xff] %v11822_v4  ;;  %v3959_v9 = vsel %vm3952_vm15, %v11822_v4, %v3949_v55 }
 0x264   :  { %9579 = vmatmul.mubr.msk.bf16.vlgmr.msra.gmra.mrb[40].mxu0 %vm692_vm11, %v11634_v23  ;;  %v3986_v36 = vsel %vm504_vm6, %v3959_v9, 0  ;;  %v956_v24 = vpop.permute.xlu1 %955 }
 0x265   :  { %4145 = vmatpush1.bf16.msra.mxu1 %v3986_v36  ;;  %919 = vmatprep.mubr.bf16.mxu0 %v14110_v35 }
 0x266   :  { %v1315_v11 = vpop.permute.xlu0 %1314 }
 0x267   :  { %v1321_v6 = vrot.slane %v1315_v11, 4 }
 0x268   :  { %9796 = vmatmul.mubr.msk.bf16.vlgmr.msra.gmra.mrb[16].mxu1 %vm692_vm11, %v11691_v48 }
 0x269   :  { %v1326_v10 = vsel %vm504_vm6, %v1320_v3, %v1321_v6  ;;  %4186 = vmatprep.mubr.bf16.mxu1 %v14110_v35 }
 0x26a   :  { %v11835_v55 = vsel %vm14150_vm1, %v1326_v10, %v1315_v11  ;;  %v954_v23 = vpop.permute.xlu0 %953 }
 0x26b   :  { %14169 = vst [vmem:[#allocation18_spill] sm:$0xff] %v11835_v55  ;;  %v1338_v14 = vmul.bf16 %v11835_v55, %v11359_v44  ;;  %v970_v61 = vsel %vm969_vm2, %v952_v33, %v954_v23  ;;  %v971_v52 = vsel %vm969_vm2, %v954_v23, %v956_v24 }
 0x26c   :  { %9580 = vmatmul.mubr.msk.bf16.gmra.mrb[44].mxu0 %vm692_vm11, %v11636_v30  ;;  %9590 = vmatprep.subr.msk.bf16.mxu0 %vm504_vm6, %v971_v52  ;;  %v985_v3 = vsel %vm504_vm6, %v970_v61, 0 }
 0x26d   :  { %v9616_v32 = vcombine.low %v1338_v14, %v1338_v14  ;;  %1009 = vmatpush1.bf16.msra.mxu0 %v985_v3  ;;  %1040 = vmatprep.mubr.bf16.mxu0 %v14110_v35  ;;  %v9617_v10 = vcombine.high %v1338_v14, %v1338_v14 }
 0x26e   :  { %v4566_v57 = vpop.permute.xlu0 %4565 }
 0x26f   :  { %v4571_v9 = vrot.slane %v4566_v57, 4  ;;  %1373 = vrot.lane.b32.xlu1 %v9616_v32, %s11040_s22  ;;  %v4277_v21 = vpop.permute.xlu1 %4276 }
 0x270   :  { %9797 = vmatmul.mubr.msk.bf16.gmra.mrb[20].mxu1 %vm692_vm11, %v11707_v42 }
 0x271   :  { %v4577_v44 = vsel %vm504_vm6, %v4570_v25, %v4571_v9  ;;  %4365 = vmatprep.mubr.bf16.mxu1 %v14110_v35 }
 0x272   :  { %v4578_v30 = vsel %vm4573_vm0, %v4577_v44, %v4566_v57 }
 0x273   :  { %v11855_v33 = vmul.bf16 %v4578_v30, %v11413_v31  ;;  %v4279_v25 = vpop.permute.xlu0 %4278 }
 0x274   :  { %9591 = vmatmul.mubr.msk.bf16.vlgmr.msra.gmra.mrb[16].mxu0 %vm692_vm11, %v11374_v59  ;;  %v4295_v11 = vsel %vm4294_vm3, %v4277_v21, %v4279_v25 }
 0x275   :  { %v9823_v36 = vcombine.low %v11855_v33, %v11855_v33  ;;  %1050 = vmatprep.mubr.bf16.mxu0 %v14110_v35  ;;  %v4310_v3 = vsel %vm504_vm6, %v4295_v11, 0 }
 0x277   :  { %4626 = vrot.lane.b32.xlu1 %v9823_v36, %s11054_s11  ;;  %v11868_v61 = vpop.permute.xlu0 %4249 }
 0x278   :  { %14170 = vst [vmem:[#allocation19_spill] sm:$0xff] %v11868_v61 }
 0x27b   :  { %1344 = vrot.lane.b32.xlu1 %v11391_v26, %s11056_s13 }
 0x27c   :  { %9592 = vmatmul.mubr.msk.bf16.gmra.mrb[20].mxu0 %vm692_vm11, %v11391_v26  ;;  %v4281_v23 = vpop.permute.xlu1 %4280  ;;  %v11877_v26 = vpop.permute.xlu0 %4251 }
 0x27d   :  { %1091 = vmatprep.mubr.bf16.mxu0 %v14110_v35  ;;  %v4296_v52 = vsel %vm4294_vm3, %v4279_v25, %v4281_v23  ;;  %14171 = vst [vmem:[#allocation20_spill] sm:$0xff] %v11877_v26 }
 0x27e   :  { %9807 = vmatprep.subr.msk.bf16.mxu1 %vm504_vm6, %v4296_v52 }
 0x27f   :  { %1375 = vrot.lane.b32.xlu1 %v9617_v10, %s11040_s22  ;;  %4334 = vmatpush1.bf16.msra.mxu1 %v4310_v3 }
 0x280   :  { %v1317_v32 = vpop.permute.xlu1 %1316 }
 0x281   :  { %v1322_v57 = vrot.slane %v1317_v32, 4 }
 0x282   :  { %9808 = vmatmul.mubr.msk.bf16.vlgmr.msra.gmra.mrb[0].mxu1 %vm692_vm11, %v11868_v61 }
 0x283   :  { %5202 = vrot.lane.b32.xlu1 %v11158_v29, %s11054_s11  ;;  %v1328_v14 = vsel %vm504_vm6, %v1321_v6, %v1322_v57  ;;  %4375 = vmatprep.mubr.bf16.mxu1 %v14110_v35 }
 0x284   :  { %v11884_v44 = vsel %vm14150_vm1, %v1328_v14, %v1317_v32  ;;  %v958_v30 = vpop.permute.xlu1 %957 }
 0x285   :  { %14172 = vst [vmem:[#allocation21_spill] sm:$0xff] %v11884_v44  ;;  %v1339_v36 = vmul.bf16 %v11884_v44, %v11413_v31  ;;  %v972_v25 = vsel %vm969_vm2, %v956_v24, %v958_v30 }
 0x286   :  { %v991_v6 = vsel %vm504_vm6, %v972_v25, 0 }
 0x287   :  { %v9618_v21 = vcombine.low %v1339_v36, %v1339_v36 }
 0x288   :  { %v4568_v11 = vpop.permute.xlu1 %4567  ;;  %v960_v10 = vpop.permute.xlu0 %959 }
 0x289   :  { %v4572_v52 = vrot.slane %v4568_v11, 4  ;;  %1377 = vrot.lane.b32.xlu0 %v9618_v21, %s11040_s22  ;;  %v973_v3 = vsel %vm969_vm2, %v958_v30, %v960_v10 }
 0x28a   :  { %9593 = vmatprep.subr.msk.bf16.mxu0 %vm504_vm6, %v973_v3  ;;  %9809 = vmatmul.mubr.msk.bf16.gmra.mrb[4].mxu1 %vm692_vm11, %v11877_v26 }
 0x28b   :  { %v4579_v32 = vsel %vm504_vm6, %v4571_v9, %v4572_v52  ;;  %1060 = vmatpush1.bf16.msra.mxu0 %v991_v6  ;;  %4416 = vmatprep.mubr.bf16.mxu1 %v14110_v35 }
 0x28c   :  { %v4580_v31 = vsel %vm4573_vm0, %v4579_v32, %v4568_v11  ;;  %v11898_v24 = vpop.permute.xlu1 %4284  ;;  %v4283_v14 = vpop.permute.xlu0 %4282  ;;  %v4590_v11 = vmul.bf16 %v4572_v52, %v11437_v1 }
 0x28d   :  { %14173 = vst [vmem:[#allocation22_spill] sm:$0xff] %v11898_v24  ;;  %v4589_v21 = vmul.bf16 %v4580_v31, %v11446_v7  ;;  %v4297_v30 = vsel %vm4294_vm3, %v4281_v23, %v4283_v14  ;;  %5204 = vrot.lane.b32.xlu0 %v11156_v28, %s11054_s11  ;;  %v4298_v25 = vsel %vm4294_vm3, %v4283_v14, %v11898_v24  ;;  %v12054_v24 = vld [vmem:[#allocation2 + $0x10] sm:$0xff] }
 0x28e   :  { %9810 = vmatprep.subr.msk.bf16.mxu1 %vm504_vm6, %v4298_v25  ;;  %v4316_v9 = vsel %vm504_vm6, %v4297_v30, 0  ;;  %9594 = vmatmul.mubr.msk.bf16.vlgmr.msra.gmra.mrb[24].mxu0 %vm692_vm11, %v11374_v59  ;;  %v9827_v31 = vcombine.low %v4590_v11, %v4590_v11  ;;  %v11932_v30 = vld [vmem:[%s14100_s3 + $0x10] ss:$0 sps:$4 sm:$0xff]  }
 0x28f   :  { %v9825_v3 = vcombine.low %v4589_v21, %v4589_v21  ;;  %v9826_v6 = vcombine.high %v4589_v21, %v4589_v21  ;;  %4385 = vmatpush1.bf16.msra.mxu1 %v4316_v9  ;;  %1101 = vmatprep.mubr.bf16.mxu0 %v14110_v35 }
 0x290   :  { %v1319_v23 = vpop.permute.xlu0 %1318  ;;  %v962_v52 = vpop.permute.xlu1 %961 }
 0x291   :  { %v11912_v32 = vrot.slane %v1319_v23, 4  ;;  %4632 = vrot.lane.b32.xlu0 %v9826_v6, %s11054_s11  ;;  %4630 = vrot.lane.b32.xlu1 %v9825_v3, %s11054_s11  ;;  %v974_v25 = vsel %vm969_vm2, %v960_v10, %v962_v52 }
 0x292   :  { %9811 = vmatmul.mubr.msk.bf16.vlgmr.msra.gmra.mrb[8].mxu1 %vm692_vm11, %v11868_v61  ;;  %v997_v3 = vsel %vm504_vm6, %v974_v25, 0 }
 0x293   :  { %14174 = vst [vmem:[#allocation23_spill] sm:$0xff] %v11912_v32  ;;  %v1330_v59 = vsel %vm504_vm6, %v1322_v57, %v11912_v32  ;;  %4426 = vmatprep.mubr.bf16.mxu1 %v14110_v35  ;;  %v9619_v57 = vcombine.high %v1339_v36, %v1339_v36  ;;  %v11951_v36 = vld [vmem:[%s14100_s3] ss:$8 sps:$4 sm:$0xff]   ;;  %v1341_v6 = vmul.bf16 %v11912_v32, %v11437_v1  ;;  %v14182_v32 = vmov 0  }
 0x294   :  { %v11922_v14 = vsel %vm14150_vm1, %v1330_v59, %v1319_v23 }
 0x295   :  { %14175 = vst [vmem:[#allocation24_spill] sm:$0xff] %v11922_v14  ;;  %v1340_v21 = vmul.bf16 %v11922_v14, %v11446_v7  ;;  %1735 = vrot.lane.b32.xlu0 %v11298_v16, %s11045_s26  ;;  %4634 = vrot.lane.b32.xlu1 %v9827_v31, %s11054_s11 }
 0x296   :  { %9595 = vmatmul.mubr.msk.bf16.gmra.mrb[28].mxu0 %vm692_vm11, %v11932_v30 }
 0x297   :  { %v9620_v9 = vcombine.low %v1340_v21, %v1340_v21  ;;  %1142 = vmatprep.mubr.bf16.mxu0 %v14110_v35 }
 0x298   :  { %v964_v7 = vpop.permute.xlu0 %963 }
 0x299   :  { %1379 = vrot.lane.b32.xlu1 %v9619_v57, %s11040_s22  ;;  %1381 = vrot.lane.b32.xlu0 %v9620_v9, %s11040_s22  ;;  %v975_v11 = vsel %vm969_vm2, %v962_v52, %v964_v7  ;;  %v9622_v57 = vcombine.low %v1341_v6, %v1341_v6  ;;  %v9621_v9 = vcombine.high %v1340_v21, %v1340_v21 }
 0x29a   :  { %9596 = vmatprep.subr.msk.bf16.mxu0 %vm504_vm6, %v975_v11  ;;  %9812 = vmatmul.mubr.msk.bf16.gmra.mrb[12].mxu1 %vm692_vm11, %v11877_v26 }
 0x29b   :  { %1111 = vmatpush1.bf16.msra.mxu0 %v997_v3  ;;  %4518 = vmatprep.mubr.bf16.mxu1 %v14110_v35 }
 0x29d   :  { %5206 = vrot.lane.b32.xlu1 %v11218_v17, %s11054_s11  ;;  %4915 = vrot.lane.b32.xlu0 %v11951_v36, %s11038_s0 }
 0x29e   :  { %v4293_v10 = vpop.permute.xlu1 %4292  ;;  %9597 = vmatmul.mubr.msk.bf16.vlgmr.msra.gmra.mrb[32].mxu0 %vm692_vm11, %v11951_v36 }
 0x29f   :  { %1152 = vmatprep.mubr.bf16.mxu0 %v14110_v35 }
 0x2a0   :  { %v4291_v23 = vpop.permute.xlu0 %4290 }
 0x2a1   :  { %4917 = vrot.lane.b32.xlu1 %v11932_v30, %s11038_s0  ;;  %5208 = vrot.lane.b32.xlu0 %v11298_v16, %s11054_s11  ;;  %v4302_v31 = vsel %vm4294_vm3, %v4291_v23, %v4293_v10 }
 0x2a2   :  { %v11965_v59 = vpop.permute.xlu1 %4288  ;;  %9816 = vmatprep.subr.msk.bf16.mxu1 %vm504_vm6, %v4302_v31 }
 0x2a3   :  { %14176 = vst [vmem:[#allocation25_spill] sm:$0xff] %v11965_v59  ;;  %v4301_v52 = vsel %vm4294_vm3, %v11965_v59, %v4291_v23 }
 0x2a4   :  { %v4328_v1 = vsel %vm504_vm6, %v4301_v52, 0  ;;  %v4619_v11 = vpop.permute.xlu0 %4618 }
 0x2a5   :  { %1385 = vrot.lane.b32.xlu1 %v9622_v57, %s11040_s22  ;;  %2171 = vrot.lane.b32.xlu0 %v11317_v50, %s11051_s8 }
 0x2a6   :  { %4487 = vmatpush1.bf16.msra.mxu1 %v4328_v1  ;;  %v968_v25 = vpop.permute.xlu1 %967  ;;  %9598 = vmatmul.mubr.msk.bf16.gmra.mrb[36].mxu0 %vm692_vm11, %v11932_v30 }
 0x2a7   :  { %1193 = vmatprep.mubr.bf16.mxu0 %v14110_v35 }
 0x2a9   :  { %2169 = vrot.lane.b32.xlu1 %v11311_v45, %s11051_s8  ;;  %1383 = vrot.lane.b32.xlu0 %v9621_v9, %s11040_s22 }
 0x2aa   :  { %v4621_v3 = vpop.permute.xlu1 %4620  ;;  %9817 = vmatmul.mubr.msk.bf16.vlgmr.msra.gmra.mrb[16].mxu1 %vm692_vm11, %v11868_v61  ;;  %v12015_v61 = vld [vmem:[#allocation2 + $0x8] sm:$0xff] }
 0x2ab   :  { %v4637_v10 = vsel %vm4636_vm4, %v4619_v11, %v4621_v3  ;;  %4528 = vmatprep.mubr.bf16.mxu1 %v14110_v35 }
 0x2ac   :  { %v11984_v6 = vpop.permute.xlu0 %4622  ;;  %v4652_v31 = vsel %vm504_vm6, %v4637_v10, 0 }
 0x2ad   :  { %v4638_v21 = vsel %vm4636_vm4, %v4621_v3, %v11984_v6 }
 0x2ae   :  { %v11988_v23 = vpop.permute.xlu1 %4591  ;;  %9828 = vmatprep.subr.msk.bf16.mxu1 %vm504_vm6, %v4638_v21 }
 0x2af   :  { %14177 = vst [vmem:[#allocation26_spill] sm:$0xff] %v11988_v23  ;;  %4676 = vmatpush1.bf16.msra.mxu1 %v4652_v31 }
 0x2b0   :  { %v966_v52 = vpop.permute.xlu0 %965 }
 0x2b1   :  { %v976_v57 = vsel %vm969_vm2, %v964_v7, %v966_v52  ;;  %v977_v1 = vsel %vm969_vm2, %v966_v52, %v968_v25  ;;  %v12009_v52 = vld [vmem:[#allocation2] sm:$0xff] }
 0x2b2   :  { %v1732_v9 = vpop.permute.xlu1 %1731  ;;  %9599 = vmatprep.subr.msk.bf16.mxu0 %vm504_vm6, %v977_v1  ;;  %v1003_v11 = vsel %vm504_vm6, %v976_v57, 0  ;;  %9818 = vmatmul.mubr.msk.bf16.gmra.mrb[20].mxu1 %vm692_vm11, %v11877_v26 }
 0x2b3   :  { %v1738_v3 = vrot.slane %v1732_v9, 4  ;;  %1162 = vmatpush1.bf16.msra.mxu0 %v1003_v11  ;;  %4707 = vmatprep.mubr.bf16.mxu1 %v14110_v35 }
 0x2b4   :  { %v1730_v21 = vpop.permute.xlu0 %1729 }
 0x2b5   :  { %v1737_v10 = vrot.slane %v1730_v21, 4 }
 0x2b6   :  { %9600 = vmatmul.mubr.msk.bf16.vlgmr.msra.gmra.mrb[40].mxu0 %vm692_vm11, %v11951_v36 }
 0x2b7   :  { %v12002_v7 = vsel %vm14152_vm14, %v1737_v10, %v1730_v21  ;;  %v1742_v25 = vsel %vm504_vm6, %v1737_v10, %v1738_v3  ;;  %1203 = vmatprep.mubr.bf16.mxu0 %v14110_v35 }
 0x2b8   :  { %14178 = vst [vmem:[#allocation27_spill] sm:$0xff] %v12002_v7  ;;  %v12007_v31 = vsel %vm14152_vm14, %v1742_v25, %v1732_v9  ;;  %v1753_v57 = vmul.bf16 %v12009_v52, %v12002_v7  ;;  %v12013_v1 = vpop.permute.xlu0 %4593 }
 0x2b9   :  { %14179 = vst [vmem:[#allocation28_spill] sm:$0xff] %v12007_v31  ;;  %14180 = vst [vmem:[#allocation29_spill] sm:$0xff] %v12013_v1  ;;  %v1754_v21 = vmul.bf16 %v12015_v61, %v12007_v31 }
 0x2ba   :  { %v9639_v11 = vcombine.low %v1753_v57, %v1753_v57  ;;  %v9640_v26 = vcombine.high %v1753_v57, %v1753_v57  ;;  %9829 = vmatmul.mubr.msk.bf16.vlgmr.msra.gmra.mrb[0].mxu1 %vm692_vm11, %v11988_v23 }
 0x2bb   :  { %4717 = vmatprep.mubr.bf16.mxu1 %v14110_v35  ;;  %v9641_v10 = vcombine.low %v1754_v21, %v1754_v21 }
 0x2bc   :  { %1787 = vrot.lane.b32.xlu0 %v9640_v26, %s11041_s30  ;;  %1785 = vrot.lane.b32.xlu1 %v9639_v11, %s11041_s30  ;;  %v1372_v9 = vpop.permute.xlu0 %1371 }
 0x2be   :  { %9601 = vmatmul.mubr.msk.bf16.gmra.mrb[44].mxu0 %vm692_vm11, %v11932_v30 }
 0x2bf   :  { %1457 = vmatprep.mubr.bf16.mxu0 %v14110_v35 }
 0x2c0   :  { %5542 = vrot.lane.b32.xlu0 %v11311_v45, %s11052_s9  ;;  %1789 = vrot.lane.b32.xlu1 %v9641_v10, %s11041_s30  ;;  %v4625_v25 = vpop.permute.xlu0 %4624  ;;  %v9642_v10 = vcombine.high %v1754_v21, %v1754_v21 }
 0x2c2   :  { %9830 = vmatmul.mubr.msk.bf16.gmra.mrb[4].mxu1 %vm692_vm11, %v12013_v1 }
 0x2c3   :  { %4758 = vmatprep.mubr.bf16.mxu1 %v14110_v35 }
 0x2c4   :  { %1758 = vrot.lane.b32.xlu0 %v11951_v36, %s11057_s21  ;;  %5544 = vrot.lane.b32.xlu1 %v11317_v50, %s11052_s9  ;;  %v12037_v26 = vpop.permute.xlu0 %1342 }
 0x2c8   :  { %2173 = vrot.lane.b32.xlu0 %v11327_v54, %s11051_s8  ;;  %1760 = vrot.lane.b32.xlu1 %v11932_v30, %s11057_s21  ;;  %v12043_v57 = vpop.permute.xlu0 %1733 }
 0x2c9   :  { %v14116_v11 = vrot.slane %v12043_v57, 4 }
 0x2cb   :  { %v1744_v35 = vsel %vm504_vm6, %v1738_v3, %v14116_v11  ;;  %v1370_v3 = vpop.permute.xlu1 %1369 }
 0x2cc   :  { %v12051_v59 = vsel %vm14152_vm14, %v1744_v35, %v12043_v57  ;;  %1791 = vrot.lane.b32.xlu1 %v9642_v10, %s11041_s30  ;;  %v1387_v35 = vsel %vm14150_vm1, %v1370_v3, %v1372_v9 }
 0x2cd   :  { %14181 = vst [vmem:[#allocation30_spill] sm:$0xff] %v12051_v59  ;;  %v12058_v31 = vmul.bf16 %v12054_v24, %v12051_v59  ;;  %v1402_v11 = vsel %vm504_vm6, %v1387_v35, 0  ;;  %v4639_v59 = vsel %vm4636_vm4, %v11984_v6, %v4625_v25 }
 0x2cf   :  { %v9643_v7 = vcombine.low %v12058_v31, %v12058_v31 }
 0x2d0   :  { %5546 = vrot.lane.b32.xlu1 %v11327_v54, %s11052_s9 }
 0x2d1   :  { %1793 = vrot.lane.b32.xlu0 %v9643_v7, %s11041_s30 }
 0x2e1   :  { %v1374_v21 = vpop.permute.xlu1 %1373 }
 0x2e2   :  { %v1388_v10 = vsel %vm14150_vm1, %v1372_v9, %v1374_v21  ;;  %v4658_v9 = vsel %vm504_vm6, %v4639_v59, 0  ;;  %v12090_v59 = vld [vmem:[#allocation2 + $0x4] sm:$0xff] }
 0x2e3   :  { %9623 = vmatprep.subr.msk.bf16.mxu0 %vm504_vm6, %v1388_v10 }
 0x2e4   :  { %1426 = vmatpush1.bf16.msra.mxu0 %v1402_v11 }
 0x2e7   :  { %9624 = vmatmul.mubr.msk.bf16.vlgmr.msra.gmra.mrb[16].mxu0 %vm692_vm11, %v12037_v26 }
 0x2e8   :  { %1467 = vmatprep.mubr.bf16.mxu0 %v14182_v32 }
 0x2e9   :  { %v12074_v7 = vpop.permute.xlu1 %4626 }
 0x2ea   :  { %14183 = vst [vmem:[#allocation31_spill] sm:$0xff] %v12074_v7  ;;  %v4640_v3 = vsel %vm4636_vm4, %v4625_v25, %v12074_v7 }
 0x2eb   :  { %9831 = vmatprep.subr.msk.bf16.mxu1 %vm504_vm6, %v4640_v3 }
 0x2ec   :  { %4727 = vmatpush1.bf16.msra.mxu1 %v4658_v9 }
 0x2ed   :  { %v12080_v35 = vpop.permute.xlu1 %1344 }
 0x2ef   :  { %9832 = vmatmul.mubr.msk.bf16.vlgmr.msra.gmra.mrb[8].mxu1 %vm692_vm11, %v11988_v23  ;;  %9625 = vmatmul.mubr.msk.bf16.gmra.mrb[20].mxu0 %vm692_vm11, %v12080_v35 }
 0x2f0   :  { %4768 = vmatprep.mubr.bf16.mxu1 %v14182_v32  ;;  %1508 = vmatprep.mubr.bf16.mxu0 %v14182_v32 }
 0x2f1   :  { %v1376_v6 = vpop.permute.xlu1 %1375 }
 0x2f2   :  { %v1389_v9 = vsel %vm14150_vm1, %v1374_v21, %v1376_v6 }
 0x2f3   :  { %v1408_v44 = vsel %vm504_vm6, %v1389_v9, 0 }
 0x2f5   :  { %v5203_v11 = vpop.permute.xlu1 %5202 }
 0x2f6   :  { %v5210_v25 = vrot.slane %v5203_v11, 4 }
 0x2f7   :  { %9833 = vmatmul.mubr.msk.bf16.gmra.mrb[12].mxu1 %vm692_vm11, %v12013_v1 }
 0x2f8   :  { %v5214_v10 = vsel %vm4636_vm4, %v5210_v25, %v5203_v11  ;;  %4860 = vmatprep.mubr.bf16.mxu1 %v14182_v32 }
 0x2f9   :  { %v5226_v3 = vmul.bf16 %v5214_v10, %v12090_v59 }
 0x2fb   :  { %v9860_v7 = vcombine.low %v5226_v3, %v5226_v3  ;;  %v9861_v42 = vcombine.high %v5226_v3, %v5226_v3  ;;  %v1378_v14 = vpop.permute.xlu0 %1377 }
 0x2fc   :  { %v1390_v48 = vsel %vm14150_vm1, %v1376_v6, %v1378_v14 }
 0x2fd   :  { %5260 = vrot.lane.b32.xlu1 %v9861_v42, %s11050_s7  ;;  %5258 = vrot.lane.b32.xlu0 %v9860_v7, %s11050_s7  ;;  %v4903_v42 = vld [vmem:[#allocation2 + $0x4] sm:$0xff]  ;;  %v12106_v7 = vld [vmem:[#allocation2 + $0xc] sm:$0xff] }
 0x2fe   :  { %9626 = vmatprep.subr.msk.bf16.mxu0 %vm504_vm6, %v1390_v48  ;;  %v4911_v3 = vmul.bf16 %v11540_v5, %v4903_v42 }
 0x2ff   :  { %1477 = vmatpush1.bf16.msra.mxu0 %v1408_v44  ;;  %v5205_v11 = vpop.permute.xlu0 %5204 }
 0x300   :  { %v5211_v55 = vrot.slane %v5205_v11, 4  ;;  %v9841_v42 = vcombine.high %v4911_v3, %v4911_v3 }
 0x301   :  { %5231 = vrot.lane.b32.xlu1 %v11951_v36, %s11058_s23 }
 0x302   :  { %9627 = vmatmul.mubr.msk.bf16.vlgmr.msra.gmra.mrb[24].mxu0 %vm692_vm11, %v12037_v26  ;;  %v5215_v21 = vsel %vm504_vm6, %v5210_v25, %v5211_v55 }
 0x303   :  { %1518 = vmatprep.mubr.bf16.mxu0 %v14182_v32  ;;  %v5216_v48 = vsel %vm4636_vm4, %v5215_v21, %v5205_v11  ;;  %v12109_v6 = vpop.permute.xlu1 %4630  ;;  %v4633_v44 = vpop.permute.xlu0 %4632 }
 0x304   :  { %14184 = vst [vmem:[#allocation32_spill] sm:$0xff] %v12109_v6  ;;  %v5227_v10 = vmul.bf16 %v5216_v48, %v12106_v7  ;;  %v4643_v25 = vsel %vm4636_vm4, %v12109_v6, %v4633_v44  ;;  %v14186_v48 = vrot.slane %v12043_v57, 4 }
 0x305   :  { %5233 = vrot.lane.b32.xlu1 %v11932_v30, %s11058_s23  ;;  %v4670_v21 = vsel %vm504_vm6, %v4643_v25, 0  ;;  %v12137_v25 = vld [vmem:[#allocation2 + $0x18] sm:$0xff] }
 0x306   :  { %v9862_v9 = vcombine.low %v5227_v10, %v5227_v10  ;;  %v9863_v46 = vcombine.high %v5227_v10, %v5227_v10 }
 0x307   :  { %v4635_v41 = vpop.permute.xlu1 %4634  ;;  %v1736_v4 = vpop.permute.xlu0 %1735 }
 0x308   :  { %v4644_v56 = vsel %vm4636_vm4, %v4633_v44, %v4635_v41  ;;  %v12117_v11 = vrot.slane %v1736_v4, 4  ;;  %5262 = vrot.lane.b32.xlu0 %v9862_v9, %s11050_s7  ;;  %v9840_v41 = vcombine.low %v4911_v3, %v4911_v3  ;;  %v12130_v44 = vmul.bf16 %v11599_v19, %v4904_v13 }
 0x309   :  { %5264 = vrot.lane.b32.xlu1 %v9863_v46, %s11050_s7  ;;  %9837 = vmatprep.subr.msk.bf16.mxu1 %vm504_vm6, %v4644_v56 }
 0x30a   :  { %14185 = vst [vmem:[#allocation33_spill] sm:$0xff] %v12117_v11  ;;  %9628 = vmatmul.mubr.msk.bf16.gmra.mrb[28].mxu0 %vm692_vm11, %v12080_v35  ;;  %v1746_v10 = vsel %vm504_vm6, %v14186_v48, %v12117_v11  ;;  %4829 = vmatpush1.bf16.msra.mxu1 %v4670_v21  ;;  %v9644_v21 = vcombine.high %v12058_v31, %v12058_v31 }
 0x30b   :  { %1559 = vmatprep.mubr.bf16.mxu0 %v14182_v32  ;;  %v12134_v46 = vsel %vm14152_vm14, %v1746_v10, %v1736_v4  ;;  %v1380_v9 = vpop.permute.xlu1 %1379  ;;  %9848 = vmatprep.subr.msk.bf16.mxu1 %vm504_vm6, %v9841_v42  ;;  %v1382_v56 = vpop.permute.xlu0 %1381  ;;  %v9843_v48 = vcombine.high %v12130_v44, %v12130_v44  ;;  %vm2926_vm14 = vcmask 269312  }
 0x30c   :  { %14187 = vst [vmem:[#allocation34_spill] sm:$0xff] %v12134_v46  ;;  %v12141_v57 = vmul.bf16 %v12137_v25, %v12134_v46  ;;  %v1391_v3 = vsel %vm14150_vm1, %v1378_v14, %v1380_v9  ;;  %2175 = vrot.lane.b32.xlu0 %v11381_v0, %s11051_s8  ;;  %v1392_v13 = vsel %vm14150_vm1, %v1380_v9, %v1382_v56  ;;  %v4946_v14 = vsel %vm504_vm6, %v9840_v41, 0  ;;  %v12169_v41 = vld [vmem:[#allocation2 + $0x14] sm:$0xff] }
 0x30d   :  { %5882 = vrot.lane.b32.xlu1 %v11401_v15, %s11048_s1  ;;  %9838 = vmatmul.mubr.msk.bf16.vlgmr.msra.gmra.mrb[16].mxu1 %vm692_vm11, %v11988_v23  ;;  %v1414_v4 = vsel %vm504_vm6, %v1391_v3, 0 }
 0x30e   :  { %v9645_v42 = vcombine.low %v12141_v57, %v12141_v57  ;;  %9629 = vmatprep.subr.msk.bf16.mxu0 %vm504_vm6, %v1392_v13  ;;  %4970 = vmatpush1.bf16.msra.mxu1 %v4946_v14 }
 0x30f   :  { %1528 = vmatpush1.bf16.msra.mxu0 %v1414_v4  ;;  %v5207_v10 = vpop.permute.xlu1 %5206  ;;  %v12160_v9 = vpop.permute.xlu0 %4915  ;;  %9851 = vmatprep.subr.msk.bf16.mxu1 %vm504_vm6, %v9843_v48 }
 0x310   :  { %14188 = vst [vmem:[#allocation35_spill] sm:$0xff] %v12160_v9  ;;  %v5212_v23 = vrot.slane %v5207_v10, 4  ;;  %1795 = vrot.lane.b32.xlu0 %v9644_v21, %s11041_s30  ;;  %4870 = vmatprep.mubr.bf16.mxu1 %v14182_v32 }
 0x311   :  { %1797 = vrot.lane.b32.xlu1 %v9645_v42, %s11041_s30 }
 0x312   :  { %v5217_v31 = vsel %vm504_vm6, %v5211_v55, %v5212_v23  ;;  %9630 = vmatmul.mubr.msk.bf16.vlgmr.msra.gmra.mrb[32].mxu0 %vm692_vm11, %v12037_v26  ;;  %v12180_v55 = vld [vmem:[#allocation2 + $0x24] sm:$0xf] }
 0x313   :  { %v5218_v3 = vsel %vm4636_vm4, %v5217_v31, %v5207_v10  ;;  %v12172_v13 = vpop.permute.xlu1 %4917  ;;  %v5209_v4 = vpop.permute.xlu0 %5208  ;;  %1569 = vmatprep.mubr.bf16.mxu0 %v14182_v32  ;;  %v12188_v10 = vld [vmem:[#allocation2 + $0x20] sm:$0xf] }
 0x314   :  { %14189 = vst [vmem:[#allocation36_spill] sm:$0xff] %v12172_v13  ;;  %v12176_v21 = vmul.bf16 %v5218_v3, %v12169_v41  ;;  %v5213_v42 = vrot.slane %v5209_v4, 4  ;;  %5548 = vrot.lane.b32.xlu0 %v11381_v0, %s11052_s9  ;;  %v1757_v31 = vmul.bf16 %v12188_v10, %v12117_v11  ;;  %v4906_v3 = vld [vmem:[#allocation2 + $0x1c] sm:$0xff] }
 0x315   :  { %9839 = vmatmul.mubr.msk.bf16.gmra.mrb[20].mxu1 %vm692_vm11, %v12013_v1  ;;  %v9842_v1 = vcombine.low %v12130_v44, %v12130_v44  ;;  %v4914_v39 = vmul.bf16 %v11714_v12, %v4906_v3 }
 0x316   :  { %14190 = vst [vmem:[#allocation37_spill] sm:$0xff] %v12176_v21  ;;  %v9864_v14 = vcombine.low %v12176_v21, %v12176_v21  ;;  %v5230_v48 = vmul.bf16 %v5213_v42, %v12180_v55  ;;  %5001 = vmatprep.mubr.bf16.mxu1 %v14182_v32  ;;  %v9647_v2 = vcombine.low %v1757_v31, %v1757_v31 }
 0x317   :  { %v1386_v6 = vpop.permute.xlu1 %1385  ;;  %v12192_v46 = vpop.permute.xlu0 %2171  ;;  %v9847_v3 = vcombine.high %v4914_v39, %v4914_v39 }
 0x318   :  { %v9868_v43 = vcombine.low %v5230_v48, %v5230_v48  ;;  %5266 = vrot.lane.b32.xlu0 %v9864_v14, %s11050_s7  ;;  %v2178_v37 = vrot.slane %v12192_v46, 4 }
 0x31a   :  { %9631 = vmatmul.mubr.msk.bf16.gmra.mrb[36].mxu0 %vm692_vm11, %v12080_v35  ;;  %5274 = vrot.lane.b32.xlu1 %v9868_v43, %s11050_s7  ;;  %v4952_v43 = vsel %vm504_vm6, %v9842_v1, 0 }
 0x31b   :  { %v2170_v21 = vpop.permute.xlu1 %2169  ;;  %v1384_v11 = vpop.permute.xlu0 %1383  ;;  %1610 = vmatprep.mubr.bf16.mxu0 %v14182_v32 }
 0x31c   :  { %v2177_v48 = vrot.slane %v2170_v21, 4  ;;  %v1393_v14 = vsel %vm14150_vm1, %v1382_v56, %v1384_v11  ;;  %1801 = vrot.lane.b32.xlu0 %v9647_v2, %s11041_s30  ;;  %v1394_v44 = vsel %vm14150_vm1, %v1384_v11, %v1386_v6  ;;  %v5219_v56 = vsel %vm504_vm6, %v5212_v23, %v5213_v42 }
 0x31d   :  { %9632 = vmatprep.subr.msk.bf16.mxu0 %vm504_vm6, %v1394_v44  ;;  %9849 = vmatmul.mubr.msk.bf16.vlgmr.msra.gmra.mrb[0].mxu1 %vm692_vm11, %v12160_v9  ;;  %v1420_v31 = vsel %vm504_vm6, %v1393_v14, 0  ;;  %v5220_v23 = vsel %vm4636_vm4, %v5219_v56, %v5209_v4  ;;  %vm3268_vm1 = vcmask 261120  }
 0x31e   :  { %v12212_v47 = vsel %vm969_vm2, %v2177_v48, %v2170_v21  ;;  %5021 = vmatpush1.bf16.msra.mxu1 %v4952_v43  ;;  %1579 = vmatpush1.bf16.msra.mxu0 %v1420_v31  ;;  %v2182_v1 = vsel %vm504_vm6, %v2177_v48, %v2178_v37  ;;  %v12235_v21 = vld [vmem:[#allocation2 + $0x1c] sm:$0xff]  ;;  %v9846_v48 = vcombine.low %v4914_v39, %v4914_v39 }
 0x31f   :  { %v2193_v2 = vmul.bf16 %v12009_v52, %v12212_v47  ;;  %9857 = vmatprep.subr.msk.bf16.mxu1 %vm504_vm6, %v9847_v3  ;;  %2511 = vrot.lane.b32.xlu1 %v11403_v18, %s11059_s24  ;;  %v12231_v11 = vsel %vm969_vm2, %v2182_v1, %v12192_v46  ;;  %v5229_v4 = vmul.bf16 %v5220_v23, %v12235_v21 }
 0x320   :  { %5884 = vrot.lane.b32.xlu0 %v11403_v18, %s11048_s1  ;;  %5011 = vmatprep.mubr.bf16.mxu1 %v14182_v32  ;;  %v9646_v18 = vcombine.high %v12141_v57, %v12141_v57  ;;  %v12247_v42 = vmul.bf16 %v12015_v61, %v12231_v11  ;;  %v4964_v14 = vsel %vm504_vm6, %v9846_v48, 0 }
 0x321   :  { %v9673_v6 = vcombine.high %v2193_v2, %v2193_v2  ;;  %v9867_v44 = vcombine.high %v5229_v4, %v5229_v4 }
 0x322   :  { %9633 = vmatmul.mubr.msk.bf16.vlgmr.msra.gmra.mrb[40].mxu0 %vm692_vm11, %v12037_v26  ;;  %v9672_v26 = vcombine.low %v2193_v2, %v2193_v2  ;;  %v9674_v57 = vcombine.low %v12247_v42, %v12247_v42 }
 0x323   :  { %2227 = vrot.lane.b32.xlu1 %v9673_v6, %s11044_s25  ;;  %1620 = vmatprep.mubr.bf16.mxu0 %v14182_v32 }
 0x324   :  { %2509 = vrot.lane.b32.xlu0 %v11401_v15, %s11059_s24  ;;  %v9866_v15 = vcombine.low %v5229_v4, %v5229_v4 }
 0x325   :  { %9850 = vmatmul.mubr.msk.bf16.gmra.mrb[4].mxu1 %vm692_vm11, %v12172_v13 }
 0x326   :  { %5052 = vmatprep.mubr.bf16.mxu1 %v14182_v32 }
 0x327   :  { %1799 = vrot.lane.b32.xlu1 %v9646_v18, %s11041_s30 }
 0x328   :  { %2225 = vrot.lane.b32.xlu0 %v9672_v26, %s11044_s25 }
 0x32a   :  { %9634 = vmatmul.mubr.msk.bf16.gmra.mrb[44].mxu0 %vm692_vm11, %v12080_v35 }
 0x32b   :  { %5270 = vrot.lane.b32.xlu1 %v9866_v15, %s11050_s7  ;;  %1873 = vmatprep.mubr.bf16.mxu0 %v14182_v32 }
 0x32c   :  { %2229 = vrot.lane.b32.xlu0 %v9674_v57, %s11044_s25 }
 0x32d   :  { %9852 = vmatmul.mubr.msk.bf16.vlgmr.msra.gmra.mrb[8].mxu1 %vm692_vm11, %v12160_v9 }
 0x32e   :  { %5123 = vmatpush1.bf16.msra.mxu1 %v4964_v14  ;;  %v1786_v39 = vpop.permute.xlu1 %1785  ;;  %v1788_v43 = vpop.permute.xlu0 %1787  ;;  %5062 = vmatprep.mubr.bf16.mxu1 %v14182_v32 }
 0x32f   :  { %5886 = vrot.lane.b32.xlu1 %v11473_v60, %s11048_s1  ;;  %v1803_v35 = vsel %vm14149_vm8, %v1786_v39, %v1788_v43 }
 0x330   :  { %5272 = vrot.lane.b32.xlu0 %v9867_v44, %s11050_s7  ;;  %v1818_v1 = vsel %vm504_vm6, %v1803_v35, 0 }
 0x332   :  { %v1790_v31 = vpop.permute.xlu1 %1789  ;;  %v5543_v3 = vpop.permute.xlu0 %5542 }
 0x333   :  { %v5550_v56 = vrot.slane %v5543_v3, 4  ;;  %v1804_v2 = vsel %vm14149_vm8, %v1788_v43, %v1790_v31 }
 0x334   :  { %9648 = vmatprep.subr.msk.bf16.mxu0 %vm504_vm6, %v1804_v2 }
 0x335   :  { %v5554_v6 = vsel %vm4294_vm3, %v5550_v56, %v5543_v3  ;;  %1842 = vmatpush1.bf16.msra.mxu0 %v1818_v1  ;;  %9853 = vmatmul.mubr.msk.bf16.gmra.mrb[12].mxu1 %vm692_vm11, %v12172_v13 }
 0x336   :  { %v5566_v23 = vmul.bf16 %v5554_v6, %v12090_v59  ;;  %v5545_v18 = vpop.permute.xlu1 %5544  ;;  %v12273_v4 = vpop.permute.xlu0 %1758  ;;  %5154 = vmatprep.mubr.bf16.mxu1 %v14182_v32 }
 0x337   :  { %v5551_v26 = vrot.slane %v5545_v18, 4 }
 0x338   :  { %v9881_v15 = vcombine.low %v5566_v23, %v5566_v23  ;;  %v9882_v48 = vcombine.high %v5566_v23, %v5566_v23  ;;  %9649 = vmatmul.mubr.msk.bf16.vlgmr.msra.gmra.mrb[16].mxu0 %vm692_vm11, %v12273_v4 }
 0x339   :  { %v5555_v57 = vsel %vm504_vm6, %v5550_v56, %v5551_v26  ;;  %1883 = vmatprep.mubr.bf16.mxu0 %v14182_v32 }
 0x33a   :  { %v5556_v14 = vsel %vm4294_vm3, %v5555_v57, %v5545_v18  ;;  %v12281_v44 = vpop.permute.xlu1 %1760  ;;  %5600 = vrot.lane.b32.xlu1 %v9882_v48, %s11046_s27  ;;  %5598 = vrot.lane.b32.xlu0 %v9881_v15, %s11046_s27  ;;  %v12285_v39 = vpop.permute.xlu0 %2173 }
 0x33b   :  { %v5567_v43 = vmul.bf16 %v5556_v14, %v12106_v7  ;;  %v2179_v35 = vrot.slane %v12285_v39, 4  ;;  %v9675_v14 = vcombine.high %v12247_v42, %v12247_v42 }
 0x33d   :  { %v9883_v3 = vcombine.low %v5567_v43, %v5567_v43  ;;  %9858 = vmatmul.mubr.msk.bf16.vlgmr.msra.gmra.mrb[16].mxu1 %vm692_vm11, %v12160_v9  ;;  %v2184_v56 = vsel %vm504_vm6, %v2178_v37, %v2179_v35 }
 0x33e   :  { %v1792_v2 = vpop.permute.xlu1 %1791  ;;  %2198 = vrot.lane.b32.xlu1 %v11951_v36, %s11039_s19  ;;  %5164 = vmatprep.mubr.bf16.mxu1 %v14182_v32  ;;  %v12304_v1 = vsel %vm969_vm2, %v2184_v56, %v12285_v39 }
 0x33f   :  { %5602 = vrot.lane.b32.xlu0 %v9883_v3, %s11046_s27  ;;  %14191 = vst [vmem:[#allocation38_spill] sm:$0xff] %v12304_v1  ;;  %v1805_v46 = vsel %vm14149_vm8, %v1790_v31, %v1792_v2  ;;  %v2195_v18 = vmul.bf16 %v12054_v24, %v12304_v1 }
 0x340   :  { %9650 = vmatmul.mubr.msk.bf16.gmra.mrb[20].mxu0 %vm692_vm11, %v12281_v44  ;;  %v1824_v31 = vsel %vm504_vm6, %v1805_v46, 0 }
 0x341   :  { %1924 = vmatprep.mubr.bf16.mxu0 %v14182_v32  ;;  %v9676_v57 = vcombine.low %v2195_v18, %v2195_v18 }
 0x342   :  { %v12308_v37 = vpop.permute.xlu1 %5546  ;;  %2200 = vrot.lane.b32.xlu1 %v11932_v30, %s11039_s19 }
 0x343   :  { %v14141_v6 = vrot.slane %v12308_v37, 4  ;;  %5571 = vrot.lane.b32.xlu0 %v11951_v36, %s11060_s29  ;;  %v1794_v23 = vpop.permute.xlu0 %1793 }
 0x344   :  { %v1806_v15 = vsel %vm14149_vm8, %v1792_v2, %v1794_v23 }
 0x345   :  { %9651 = vmatprep.subr.msk.bf16.mxu0 %vm504_vm6, %v1806_v15  ;;  %9859 = vmatmul.mubr.msk.bf16.gmra.mrb[20].mxu1 %vm692_vm11, %v12172_v13  ;;  %v5557_v48 = vsel %vm504_vm6, %v5551_v26, %v14141_v6  ;;  %v9884_v26 = vcombine.high %v5567_v43, %v5567_v43  ;;  %v9677_v43 = vcombine.high %v2195_v18, %v2195_v18 }
 0x346   :  { %5573 = vrot.lane.b32.xlu1 %v11932_v30, %s11060_s29  ;;  %1893 = vmatpush1.bf16.msra.mxu0 %v1824_v31  ;;  %v5558_v3 = vsel %vm4294_vm3, %v5557_v48, %v12308_v37  ;;  %s11066_s29 = smov 80  }
 0x347   :  { %2513 = vrot.lane.b32.xlu0 %v11473_v60, %s11059_s24  ;;  %5346 = vmatprep.mubr.bf16.mxu1 %v14182_v32  ;;  %v12338_v60 = vmul.bf16 %v5558_v3, %v12169_v41 }
 0x349   :  { %9652 = vmatmul.mubr.msk.bf16.vlgmr.msra.gmra.mrb[24].mxu0 %vm692_vm11, %v12273_v4  ;;  %v9885_v42 = vcombine.low %v12338_v60, %v12338_v60 }
 0x34a   :  { %2233 = vrot.lane.b32.xlu1 %v9676_v57, %s11044_s25  ;;  %1934 = vmatprep.mubr.bf16.mxu0 %v14182_v32 }
 0x34b   :  { %2231 = vrot.lane.b32.xlu0 %v9675_v14, %s11044_s25 }
 0x34e   :  { %5604 = vrot.lane.b32.xlu1 %v9884_v26, %s11046_s27 }
 0x34f   :  { %5888 = vrot.lane.b32.xlu0 %v11508_v51, %s11048_s1 }
 0x351   :  { %9653 = vmatmul.mubr.msk.bf16.gmra.mrb[28].mxu0 %vm692_vm11, %v12281_v44 }
 0x352   :  { %2515 = vrot.lane.b32.xlu1 %v11508_v51, %s11059_s24  ;;  %1975 = vmatprep.mubr.bf16.mxu0 %v14182_v32 }
 0x353   :  { %5606 = vrot.lane.b32.xlu0 %v9885_v42, %s11046_s27 }
 0x356   :  { %6224 = vrot.lane.b32.xlu1 %v11293_v20, %s11043_s2 }
 0x357   :  { %2235 = vrot.lane.b32.xlu0 %v9677_v43, %s11044_s25 }
 0x35b   :  { %6222 = vrot.lane.b32.xlu0 %v11249_v34, %s11043_s2 }
 0x36f   :  { %v5261_v56 = vpop.permute.xlu1 %5260  ;;  %v5259_v46 = vpop.permute.xlu0 %5258 }
 0x370   :  { %v5276_v51 = vsel %vm4573_vm0, %v5259_v46, %v5261_v56 }
 0x371   :  { %v5291_v57 = vsel %vm504_vm6, %v5276_v51, 0 }
 0x373   :  { %v12356_v2 = vpop.permute.xlu1 %5231 }
 0x377   :  { %v12358_v15 = vpop.permute.xlu1 %5233 }
 0x37a   :  { %v5263_v31 = vpop.permute.xlu0 %5262 }
 0x37b   :  { %v5265_v48 = vpop.permute.xlu1 %5264  ;;  %v5277_v18 = vsel %vm4573_vm0, %v5261_v56, %v5263_v31 }
 0x37c   :  { %9869 = vmatprep.subr.msk.bf16.mxu1 %vm504_vm6, %v5277_v18 }
 0x37d   :  { %5315 = vmatpush1.bf16.msra.mxu1 %v5291_v57 }
 0x37e   :  { %v2176_v14 = vpop.permute.xlu0 %2175 }
 0x37f   :  { %v5883_v3 = vpop.permute.xlu1 %5882  ;;  %v12364_v26 = vrot.slane %v2176_v14, 4 }
 0x380   :  { %9870 = vmatmul.mubr.msk.bf16.vlgmr.msra.gmra.mrb[0].mxu1 %vm692_vm11, %v12356_v2 }
 0x381   :  { %14192 = vst [vmem:[#allocation39_spill] sm:$0xff] %v12364_v26  ;;  %v2186_v42 = vsel %vm504_vm6, %v2179_v35, %v12364_v26  ;;  %5356 = vmatprep.mubr.bf16.mxu1 %v14182_v32 }
 0x382   :  { %v12374_v43 = vsel %vm969_vm2, %v2186_v42, %v2176_v14  ;;  %v1796_v56 = vpop.permute.xlu0 %1795  ;;  %v5278_v14 = vsel %vm4573_vm0, %v5263_v31, %v5265_v48 }
 0x383   :  { %14193 = vst [vmem:[#allocation40_spill] sm:$0xff] %v12374_v43  ;;  %v2196_v46 = vmul.bf16 %v12137_v25, %v12374_v43  ;;  %v1807_v51 = vsel %vm14149_vm8, %v1794_v23, %v1796_v56  ;;  %v1798_v18 = vpop.permute.xlu1 %1797  ;;  %v14194_v23 = vrot.slane %v12308_v37, 4 }
 0x384   :  { %v1808_v57 = vsel %vm14149_vm8, %v1796_v56, %v1798_v18  ;;  %v1830_v6 = vsel %vm504_vm6, %v1807_v51, 0  ;;  %v5297_v51 = vsel %vm504_vm6, %v5278_v14, 0 }
 0x385   :  { %v9678_v13 = vcombine.low %v2196_v46, %v2196_v46  ;;  %9654 = vmatprep.subr.msk.bf16.mxu0 %vm504_vm6, %v1808_v57 }
 0x386   :  { %1944 = vmatpush1.bf16.msra.mxu0 %v1830_v6  ;;  %v5549_v39 = vpop.permute.xlu0 %5548 }
 0x387   :  { %v5553_v35 = vrot.slane %v5549_v39, 4  ;;  %2237 = vrot.lane.b32.xlu1 %v9678_v13, %s11044_s25 }
 0x388   :  { %9871 = vmatmul.mubr.msk.bf16.gmra.mrb[4].mxu1 %vm692_vm11, %v12358_v15 }
 0x389   :  { %v5559_v42 = vsel %vm504_vm6, %v14194_v23, %v5553_v35  ;;  %9655 = vmatmul.mubr.msk.bf16.vlgmr.msra.gmra.mrb[32].mxu0 %vm692_vm11, %v12273_v4  ;;  %5397 = vmatprep.mubr.bf16.mxu1 %v14182_v32  ;;  %v5570_v57 = vmul.bf16 %v5553_v35, %v12180_v55  ;;  %v2197_v35 = vmul.bf16 %v12188_v10, %v12364_v26 }
 0x38a   :  { %v5560_v6 = vsel %vm4294_vm3, %v5559_v42, %v5549_v39  ;;  %v12393_v56 = vpop.permute.xlu0 %5266  ;;  %1985 = vmatprep.mubr.bf16.mxu0 %v14182_v32  ;;  %v5890_v39 = vrot.slane %v5883_v3, 4 }
 0x38b   :  { %14195 = vst [vmem:[#allocation41_spill] sm:$0xff] %v12393_v56  ;;  %v5569_v13 = vmul.bf16 %v5560_v6, %v12235_v21  ;;  %v5279_v31 = vsel %vm4573_vm0, %v5265_v48, %v12393_v56  ;;  %v9679_v48 = vcombine.high %v2196_v46, %v2196_v46  ;;  %v9889_v6 = vcombine.low %v5570_v57, %v5570_v57 }
 0x38c   :  { %9872 = vmatprep.subr.msk.bf16.mxu1 %vm504_vm6, %v5279_v31  ;;  %v12400_v37 = vpop.permute.xlu1 %5274  ;;  %v5894_v14 = vsel %vm3952_vm15, %v5890_v39, %v5883_v3 }
 0x38d   :  { %v9887_v23 = vcombine.low %v5569_v13, %v5569_v13  ;;  %v9888_v9 = vcombine.high %v5569_v13, %v5569_v13  ;;  %5366 = vmatpush1.bf16.msra.mxu1 %v5297_v51  ;;  %v5906_v46 = vmul.bf16 %v5894_v14, %v12090_v59 }
 0x38e   :  { %v1802_v42 = vpop.permute.xlu0 %1801 }
 0x38f   :  { %5612 = vrot.lane.b32.xlu1 %v9888_v9, %s11046_s27  ;;  %5610 = vrot.lane.b32.xlu0 %v9887_v23, %s11046_s27  ;;  %v9680_v23 = vcombine.low %v2197_v35, %v2197_v35  ;;  %v9902_v3 = vcombine.low %v5906_v46, %v5906_v46 }
 0x390   :  { %9873 = vmatmul.mubr.msk.bf16.vlgmr.msra.gmra.mrb[8].mxu1 %vm692_vm11, %v12356_v2 }
 0x391   :  { %v12408_v31 = vpop.permute.xlu1 %2511  ;;  %9656 = vmatmul.mubr.msk.bf16.gmra.mrb[36].mxu0 %vm692_vm11, %v12281_v44  ;;  %5407 = vmatprep.mubr.bf16.mxu1 %v14182_v32 }
 0x392   :  { %v5885_v9 = vpop.permute.xlu0 %5884  ;;  %2026 = vmatprep.mubr.bf16.mxu0 %v14182_v32  ;;  %v2518_v43 = vrot.slane %v12408_v31, 4 }
 0x393   :  { %v5891_v13 = vrot.slane %v5885_v9, 4  ;;  %2239 = vrot.lane.b32.xlu1 %v9679_v48, %s11044_s25  ;;  %5614 = vrot.lane.b32.xlu0 %v9889_v6, %s11046_s27  ;;  %v9903_v48 = vcombine.high %v5906_v46, %v5906_v46 }
 0x395   :  { %v5895_v51 = vsel %vm504_vm6, %v5890_v39, %v5891_v13  ;;  %v2228_v57 = vpop.permute.xlu1 %2227 }
 0x396   :  { %v5896_v56 = vsel %vm3952_vm15, %v5895_v51, %v5885_v9  ;;  %v2510_v26 = vpop.permute.xlu0 %2509 }
 0x397   :  { %6226 = vrot.lane.b32.xlu1 %v11303_v40, %s11043_s2  ;;  %2241 = vrot.lane.b32.xlu0 %v9680_v23, %s11044_s25  ;;  %v5907_v6 = vmul.bf16 %v5896_v56, %v12106_v7  ;;  %v2517_v39 = vrot.slane %v2510_v26, 4 }
 0x398   :  { %9874 = vmatmul.mubr.msk.bf16.gmra.mrb[12].mxu1 %vm692_vm11, %v12358_v15 }
 0x399   :  { %v1800_v14 = vpop.permute.xlu1 %1799  ;;  %5499 = vmatprep.mubr.bf16.mxu1 %v14182_v32  ;;  %v9904_v56 = vcombine.low %v5907_v6, %v5907_v6 }
 0x39a   :  { %v1809_v35 = vsel %vm14149_vm8, %v1798_v18, %v1800_v14  ;;  %v2226_v9 = vpop.permute.xlu0 %2225  ;;  %v1810_v51 = vsel %vm14149_vm8, %v1800_v14, %v1802_v42  ;;  %v2522_v18 = vsel %vm2521_vm5, %v2517_v39, %v2510_v26  ;;  %vm2584_vm8 = vcmask 277504  }
 0x39b   :  { %5940 = vrot.lane.b32.xlu1 %v9903_v48, %s11042_s15  ;;  %5938 = vrot.lane.b32.xlu0 %v9902_v3, %s11042_s15  ;;  %v1836_v46 = vsel %vm504_vm6, %v1809_v35, 0  ;;  %v2243_v23 = vsel %vm14148_vm12, %v2226_v9, %v2228_v57  ;;  %v2523_v48 = vsel %vm504_vm6, %v2517_v39, %v2518_v43  ;;  %v2534_v26 = vmul.bf16 %v12009_v52, %v2522_v18 }
 0x39c   :  { %9657 = vmatprep.subr.msk.bf16.mxu0 %vm504_vm6, %v1810_v51  ;;  %v2258_v14 = vsel %vm504_vm6, %v2243_v23, 0  ;;  %v2524_v39 = vsel %vm2521_vm5, %v2523_v48, %v12408_v31  ;;  %v9905_v18 = vcombine.high %v5907_v6, %v5907_v6 }
 0x39d   :  { %1995 = vmatpush1.bf16.msra.mxu0 %v1836_v46  ;;  %v12437_v1 = vpop.permute.xlu1 %5270  ;;  %v9693_v46 = vcombine.low %v2534_v26, %v2534_v26 }
 0x39e   :  { %v12440_v42 = vpop.permute.xlu0 %2229 }
 0x39f   :  { %5911 = vrot.lane.b32.xlu1 %v11951_v36, %s11061_s10  ;;  %5942 = vrot.lane.b32.xlu0 %v9904_v56, %s11042_s15  ;;  %v2244_v3 = vsel %vm14148_vm12, %v2228_v57, %v12440_v42  ;;  %v2535_v56 = vmul.bf16 %v12015_v61, %v2524_v39 }
 0x3a0   :  { %9658 = vmatmul.mubr.msk.bf16.vlgmr.msra.gmra.mrb[40].mxu0 %vm692_vm11, %v12273_v4  ;;  %9681 = vmatprep.subr.msk.bf16.mxu0 %vm504_vm6, %v2244_v3 }
 0x3a1   :  { %v12454_v35 = vpop.permute.xlu1 %5886  ;;  %2282 = vmatpush1.bf16.msra.mxu0 %v2258_v14  ;;  %2036 = vmatprep.mubr.bf16.mxu0 %v14182_v32 }
 0x3a2   :  { %v5273_v9 = vpop.permute.xlu0 %5272  ;;  %v5892_v57 = vrot.slane %v12454_v35, 4 }
 0x3a3   :  { %v5282_v51 = vsel %vm4573_vm0, %v12437_v1, %v5273_v9  ;;  %2853 = vrot.lane.b32.xlu1 %v11293_v20, %s11062_s12  ;;  %2851 = vrot.lane.b32.xlu0 %v11249_v34, %s11062_s12  ;;  %v5283_v52 = vsel %vm4573_vm0, %v5273_v9, %v12400_v37  ;;  %v9694_v34 = vcombine.high %v2534_v26, %v2534_v26 }
 0x3a4   :  { %9878 = vmatprep.subr.msk.bf16.mxu1 %vm504_vm6, %v5283_v52  ;;  %v5309_v4 = vsel %vm504_vm6, %v5282_v51, 0  ;;  %v5897_v23 = vsel %vm504_vm6, %v5891_v13, %v5892_v57  ;;  %v9695_v20 = vcombine.low %v2535_v56, %v2535_v56 }
 0x3a5   :  { %5468 = vmatpush1.bf16.msra.mxu1 %v5309_v4  ;;  %v5898_v61 = vsel %vm3952_vm15, %v5897_v23, %v12454_v35  ;;  %v9696_v4 = vcombine.high %v2535_v56, %v2535_v56 }
 0x3a7   :  { %5913 = vrot.lane.b32.xlu0 %v11932_v30, %s11061_s10  ;;  %2566 = vrot.lane.b32.xlu1 %v9693_v46, %s11063_s14 }
 0x3a8   :  { %9659 = vmatmul.mubr.msk.bf16.gmra.mrb[44].mxu0 %vm692_vm11, %v12281_v44  ;;  %9879 = vmatmul.mubr.msk.bf16.vlgmr.msra.gmra.mrb[16].mxu1 %vm692_vm11, %v12356_v2  ;;  %v12487_v44 = vmul.bf16 %v5898_v61, %v12169_v41 }
 0x3a9   :  { %5509 = vmatprep.mubr.bf16.mxu1 %v14182_v32  ;;  %2313 = vmatprep.mubr.bf16.mxu0 %v14182_v32 }
 0x3aa   :  { %v9906_v3 = vcombine.low %v12487_v44, %v12487_v44 }
 0x3ab   :  { %2568 = vrot.lane.b32.xlu0 %v9694_v34, %s11063_s14  ;;  %2570 = vrot.lane.b32.xlu1 %v9695_v20, %s11063_s14 }
 0x3ac   :  { %v5601_v37 = vpop.permute.xlu1 %5600  ;;  %v5599_v13 = vpop.permute.xlu0 %5598 }
 0x3ad   :  { %v5616_v14 = vsel %vm4231_vm13, %v5599_v13, %v5601_v37 }
 0x3ae   :  { %v5631_v39 = vsel %vm504_vm6, %v5616_v14, 0 }
 0x3af   :  { %6228 = vrot.lane.b32.xlu0 %v11323_v53, %s11043_s2  ;;  %5944 = vrot.lane.b32.xlu1 %v9905_v18, %s11042_s15 }
 0x3b0   :  { %v12492_v48 = vpop.permute.xlu1 %2198  ;;  %9880 = vmatmul.mubr.msk.bf16.gmra.mrb[20].mxu1 %vm692_vm11, %v12358_v15 }
 0x3b1   :  { %v5603_v26 = vpop.permute.xlu0 %5602  ;;  %9682 = vmatmul.mubr.msk.bf16.vlgmr.msra.gmra.mrb[16].mxu0 %vm692_vm11, %v12492_v48  ;;  %5686 = vmatprep.mubr.bf16.mxu1 %v14182_v32 }
 0x3b2   :  { %v5617_v6 = vsel %vm4231_vm13, %v5601_v37, %v5603_v26  ;;  %2323 = vmatprep.mubr.bf16.mxu0 %v14182_v32 }
 0x3b3   :  { %5946 = vrot.lane.b32.xlu0 %v9906_v3, %s11042_s15  ;;  %2539 = vrot.lane.b32.xlu1 %v11951_v36, %s11064_s17 }
 0x3b4   :  { %9890 = vmatprep.subr.msk.bf16.mxu1 %vm504_vm6, %v5617_v6  ;;  %v12509_v9 = vpop.permute.xlu1 %2200 }
 0x3b5   :  { %5655 = vmatpush1.bf16.msra.mxu1 %v5631_v39  ;;  %v12511_v51 = vpop.permute.xlu0 %5571 }
 0x3b7   :  { %2541 = vrot.lane.b32.xlu0 %v11932_v30, %s11064_s17  ;;  %2855 = vrot.lane.b32.xlu1 %v11303_v40, %s11062_s12 }
 0x3b8   :  { %v12517_v52 = vpop.permute.xlu1 %5573  ;;  %9891 = vmatmul.mubr.msk.bf16.vlgmr.msra.gmra.mrb[0].mxu1 %vm692_vm11, %v12511_v51 }
 0x3b9   :  { %v2514_v36 = vpop.permute.xlu0 %2513  ;;  %9683 = vmatmul.mubr.msk.bf16.gmra.mrb[20].mxu0 %vm692_vm11, %v12509_v9  ;;  %5696 = vmatprep.mubr.bf16.mxu1 %v14182_v32 }
 0x3ba   :  { %v2519_v46 = vrot.slane %v2514_v36, 4  ;;  %2364 = vmatprep.mubr.bf16.mxu0 %v14182_v32 }
 0x3bb   :  { %2572 = vrot.lane.b32.xlu0 %v9696_v4, %s11063_s14 }
 0x3bc   :  { %v2525_v40 = vsel %vm504_vm6, %v2518_v43, %v2519_v46  ;;  %v12529_v30 = vpop.permute.xlu1 %2233 }
 0x3bd   :  { %v2526_v23 = vsel %vm2521_vm5, %v2525_v40, %v2514_v36  ;;  %v2232_v34 = vpop.permute.xlu0 %2231 }
 0x3be   :  { %v2536_v56 = vmul.bf16 %v12054_v24, %v2526_v23  ;;  %v2245_v20 = vsel %vm14148_vm12, %v12440_v42, %v2232_v34  ;;  %v2246_v61 = vsel %vm14148_vm12, %v2232_v34, %v12529_v30 }
 0x3bf   :  { %6569 = vrot.lane.b32.xlu0 %v11540_v5, %s11038_s0  ;;  %9684 = vmatprep.subr.msk.bf16.mxu0 %vm504_vm6, %v2246_v61  ;;  %v2264_v43 = vsel %vm504_vm6, %v2245_v20, 0 }
 0x3c0   :  { %v9697_v31 = vcombine.low %v2536_v56, %v2536_v56  ;;  %v5605_v37 = vpop.permute.xlu1 %5604  ;;  %2333 = vmatpush1.bf16.msra.mxu0 %v2264_v43  ;;  %9892 = vmatmul.mubr.msk.bf16.gmra.mrb[4].mxu1 %vm692_vm11, %v12517_v52 }
 0x3c1   :  { %v5889_v24 = vpop.permute.xlu0 %5888  ;;  %5737 = vmatprep.mubr.bf16.mxu1 %v14182_v32  ;;  %v5618_v13 = vsel %vm4231_vm13, %v5603_v26, %v5605_v37 }
 0x3c2   :  { %v5893_v42 = vrot.slane %v5889_v24, 4  ;;  %2574 = vrot.lane.b32.xlu1 %v9697_v31, %s11063_s14  ;;  %v5637_v26 = vsel %vm504_vm6, %v5618_v13, 0 }
 0x3c3   :  { %9685 = vmatmul.mubr.msk.bf16.vlgmr.msra.gmra.mrb[24].mxu0 %vm692_vm11, %v12492_v48 }
 0x3c4   :  { %v5899_v18 = vsel %vm504_vm6, %v5892_v57, %v5893_v42  ;;  %v2516_v3 = vpop.permute.xlu1 %2515  ;;  %2374 = vmatprep.mubr.bf16.mxu0 %v14182_v32  ;;  %v5910_v4 = vmul.bf16 %v5893_v42, %v12180_v55  ;;  %v9698_v42 = vcombine.high %v2536_v56, %v2536_v56 }
 0x3c5   :  { %v5900_v14 = vsel %vm3952_vm15, %v5899_v18, %v5889_v24  ;;  %v2520_v6 = vrot.slane %v2516_v3, 4  ;;  %v12553_v39 = vpop.permute.xlu0 %5606 }
 0x3c6   :  { %v5909_v36 = vmul.bf16 %v5900_v14, %v12235_v21  ;;  %6571 = vrot.lane.b32.xlu1 %v11599_v19, %s11038_s0  ;;  %v5619_v35 = vsel %vm4231_vm13, %v5605_v37, %v12553_v39  ;;  %v9910_v43 = vcombine.low %v5910_v4, %v5910_v4 }
 0x3c7   :  { %v2527_v57 = vsel %vm504_vm6, %v2519_v46, %v2520_v6  ;;  %9893 = vmatprep.subr.msk.bf16.mxu1 %vm504_vm6, %v5619_v35  ;;  %v2538_v56 = vmul.bf16 %v12188_v10, %v2520_v6 }
 0x3c8   :  { %v9908_v40 = vcombine.low %v5909_v36, %v5909_v36  ;;  %v9909_v23 = vcombine.high %v5909_v36, %v5909_v36  ;;  %5706 = vmatpush1.bf16.msra.mxu1 %v5637_v26  ;;  %v2528_v34 = vsel %vm2521_vm5, %v2527_v57, %v2516_v3  ;;  %v12565_v61 = vpop.permute.xlu1 %6224 }
 0x3c9   :  { %v2236_v20 = vpop.permute.xlu0 %2235  ;;  %v2537_v46 = vmul.bf16 %v12137_v25, %v2528_v34  ;;  %v6231_v31 = vrot.slane %v12565_v61, 4  ;;  %v9701_v57 = vcombine.low %v2538_v56, %v2538_v56 }
 0x3ca   :  { %5952 = vrot.lane.b32.xlu1 %v9909_v23, %s11042_s15  ;;  %5950 = vrot.lane.b32.xlu0 %v9908_v40, %s11042_s15  ;;  %v2247_v10 = vsel %vm14148_vm12, %v12529_v30, %v2236_v20 }
 0x3cb   :  { %9894 = vmatmul.mubr.msk.bf16.vlgmr.msra.gmra.mrb[8].mxu1 %vm692_vm11, %v12511_v51  ;;  %9686 = vmatmul.mubr.msk.bf16.gmra.mrb[28].mxu0 %vm692_vm11, %v12509_v9  ;;  %v9699_v13 = vcombine.low %v2537_v46, %v2537_v46  ;;  %v9700_v35 = vcombine.high %v2537_v46, %v2537_v46  ;;  %v2270_v40 = vsel %vm504_vm6, %v2247_v10, 0 }
 0x3cc   :  { %5747 = vmatprep.mubr.bf16.mxu1 %v14182_v32  ;;  %2415 = vmatprep.mubr.bf16.mxu0 %v14182_v32 }
 0x3cd   :  { %v6223_v37 = vpop.permute.xlu0 %6222 }
 0x3ce   :  { %v6230_v24 = vrot.slane %v6223_v37, 4  ;;  %2857 = vrot.lane.b32.xlu1 %v11323_v53, %s11062_s12  ;;  %5954 = vrot.lane.b32.xlu0 %v9910_v43, %s11042_s15 }
 0x3d0   :  { %v6234_v18 = vsel %vm3610_vm10, %v6230_v24, %v6223_v37  ;;  %v6235_v3 = vsel %vm504_vm6, %v6230_v24, %v6231_v31 }
 0x3d1   :  { %v6236_v25 = vsel %vm3610_vm10, %v6235_v3, %v12565_v61  ;;  %v6246_v14 = vmul.bf16 %v6234_v18, %v12090_v59 }
 0x3d2   :  { %2578 = vrot.lane.b32.xlu1 %v9699_v13, %s11063_s14  ;;  %2576 = vrot.lane.b32.xlu0 %v9698_v42, %s11063_s14  ;;  %v6247_v53 = vmul.bf16 %v6236_v25, %v12106_v7 }
 0x3d3   :  { %v9925_v36 = vcombine.low %v6246_v14, %v6246_v14  ;;  %9895 = vmatmul.mubr.msk.bf16.gmra.mrb[12].mxu1 %vm692_vm11, %v12517_v52  ;;  %v9926_v59 = vcombine.high %v6246_v14, %v6246_v14 }
 0x3d4   :  { %5839 = vmatprep.mubr.bf16.mxu1 %v14182_v32  ;;  %v9927_v4 = vcombine.low %v6247_v53, %v6247_v53  ;;  %v9928_v7 = vcombine.high %v6247_v53, %v6247_v53 }
 0x3d6   :  { %6573 = vrot.lane.b32.xlu0 %v11651_v58, %s11038_s0  ;;  %6285 = vrot.lane.b32.xlu1 %v9925_v36, %s11036_s16 }
 0x3da   :  { %6287 = vrot.lane.b32.xlu0 %v9926_v59, %s11036_s16  ;;  %6289 = vrot.lane.b32.xlu1 %v9927_v4, %s11036_s16 }
 0x3de   :  { %2580 = vrot.lane.b32.xlu0 %v9700_v35, %s11063_s14  ;;  %2582 = vrot.lane.b32.xlu1 %v9701_v57, %s11063_s14 }
 0x3e2   :  { %6575 = vrot.lane.b32.xlu0 %v11714_v12, %s11038_s0  ;;  %6291 = vrot.lane.b32.xlu1 %v9928_v7, %s11036_s16 }
 0x3e6   :  { %3193 = vrot.lane.b32.xlu1 %v11540_v5, %s11039_s19 }
 0x3f9   :  { %v2238_v6 = vpop.permute.xlu1 %2237 }
 0x3fa   :  { %v2248_v26 = vsel %vm14148_vm12, %v2236_v20, %v2238_v6 }
 0x3fb   :  { %9687 = vmatprep.subr.msk.bf16.mxu0 %vm504_vm6, %v2248_v26 }
 0x3fc   :  { %2384 = vmatpush1.bf16.msra.mxu0 %v2270_v40 }
 0x3ff   :  { %9688 = vmatmul.mubr.msk.bf16.vlgmr.msra.gmra.mrb[32].mxu0 %vm692_vm11, %v12492_v48 }
 0x400   :  { %2425 = vmatprep.mubr.bf16.mxu0 %v14182_v32 }
 0x401   :  { %v5613_v23 = vpop.permute.xlu1 %5612  ;;  %v12612_v34 = vpop.permute.xlu0 %5610 }
 0x402   :  { %v5622_v5 = vsel %vm4231_vm13, %v12612_v34, %v5613_v23 }
 0x403   :  { %v5649_v43 = vsel %vm504_vm6, %v5622_v5, 0 }
 0x405   :  { %v2240_v30 = vpop.permute.xlu1 %2239  ;;  %v5615_v61 = vpop.permute.xlu0 %5614 }
 0x406   :  { %v5623_v20 = vsel %vm4231_vm13, %v5613_v23, %v5615_v61  ;;  %v2249_v46 = vsel %vm14148_vm12, %v2238_v6, %v2240_v30  ;;  %v12667_v23 = vld [vmem:[#allocation2] sm:$0xff] }
 0x407   :  { %9689 = vmatmul.mubr.msk.bf16.gmra.mrb[36].mxu0 %vm692_vm11, %v12509_v9  ;;  %9899 = vmatprep.subr.msk.bf16.mxu1 %vm504_vm6, %v5623_v20  ;;  %v2276_v18 = vsel %vm504_vm6, %v2249_v46, 0 }
 0x408   :  { %5808 = vmatpush1.bf16.msra.mxu1 %v5649_v43  ;;  %2466 = vmatprep.mubr.bf16.mxu0 %v14182_v32 }
 0x409   :  { %v12623_v37 = vpop.permute.xlu1 %6226  ;;  %v2242_v24 = vpop.permute.xlu0 %2241 }
 0x40a   :  { %v6232_v42 = vrot.slane %v12623_v37, 4  ;;  %v2250_v13 = vsel %vm14148_vm12, %v2240_v30, %v2242_v24  ;;  %vm2863_vm12 = vcmask 777216  }
 0x40b   :  { %9690 = vmatprep.subr.msk.bf16.mxu0 %vm504_vm6, %v2250_v13  ;;  %9900 = vmatmul.mubr.msk.bf16.vlgmr.msra.gmra.mrb[16].mxu1 %vm692_vm11, %v12511_v51 }
 0x40c   :  { %v6237_v3 = vsel %vm504_vm6, %v6231_v31, %v6232_v42  ;;  %2435 = vmatpush1.bf16.msra.mxu0 %v2276_v18  ;;  %5849 = vmatprep.mubr.bf16.mxu1 %v14182_v32 }
 0x40d   :  { %v6238_v25 = vsel %vm3610_vm10, %v6237_v3, %v12623_v37  ;;  %v5941_v14 = vpop.permute.xlu1 %5940  ;;  %v5939_v36 = vpop.permute.xlu0 %5938 }
 0x40e   :  { %v12638_v53 = vmul.bf16 %v6238_v25, %v12169_v41  ;;  %v5956_v59 = vsel %vm14151_vm9, %v5939_v36, %v5941_v14 }
 0x40f   :  { %9691 = vmatmul.mubr.msk.bf16.vlgmr.msra.gmra.mrb[40].mxu0 %vm692_vm11, %v12492_v48  ;;  %v5971_v41 = vsel %vm504_vm6, %v5956_v59, 0 }
 0x410   :  { %v9929_v56 = vcombine.low %v12638_v53, %v12638_v53  ;;  %2476 = vmatprep.mubr.bf16.mxu0 %v14182_v32 }
 0x411   :  { %v12646_v31 = vpop.permute.xlu1 %5911  ;;  %v5943_v4 = vpop.permute.xlu0 %5942 }
 0x412   :  { %6293 = vrot.lane.b32.xlu0 %v9929_v56, %s11036_s16  ;;  %v5957_v35 = vsel %vm14151_vm9, %v5941_v14, %v5943_v4 }
 0x413   :  { %9901 = vmatmul.mubr.msk.bf16.gmra.mrb[20].mxu1 %vm692_vm11, %v12517_v52  ;;  %9911 = vmatprep.subr.msk.bf16.mxu1 %vm504_vm6, %v5957_v35 }
 0x414   :  { %5995 = vmatpush1.bf16.msra.mxu1 %v5971_v41  ;;  %6026 = vmatprep.mubr.bf16.mxu1 %v14182_v32 }
 0x415   :  { %v12655_v48 = vpop.permute.xlu1 %2853  ;;  %v2852_v57 = vpop.permute.xlu0 %2851 }
 0x416   :  { %v2860_v7 = vrot.slane %v12655_v48, 4  ;;  %v2859_v10 = vrot.slane %v2852_v57, 4  ;;  %3195 = vrot.lane.b32.xlu0 %v11599_v19, %s11039_s19 }
 0x417   :  { %9692 = vmatmul.mubr.msk.bf16.gmra.mrb[44].mxu0 %vm692_vm11, %v12509_v9  ;;  %v12672_v9 = vld [vmem:[#allocation2 + $0x8] sm:$0xff] }
 0x418   :  { %v2864_v6 = vsel %vm2863_vm12, %v2859_v10, %v2852_v57  ;;  %v2865_v26 = vsel %vm504_vm6, %v2859_v10, %v2860_v7  ;;  %2655 = vmatprep.mubr.bf16.mxu0 %v14182_v32 }
 0x419   :  { %v2866_v40 = vsel %vm2863_vm12, %v2865_v26, %v12655_v48  ;;  %v2876_v5 = vmul.bf16 %v12667_v23, %v2864_v6  ;;  %v2567_v30 = vpop.permute.xlu1 %2566  ;;  %v12670_v61 = vpop.permute.xlu0 %5913 }
 0x41a   :  { %v12675_v43 = vmul.bf16 %v12672_v9, %v2866_v40 }
 0x41b   :  { %v9714_v19 = vcombine.low %v2876_v5, %v2876_v5  ;;  %v9715_v20 = vcombine.high %v2876_v5, %v2876_v5  ;;  %9912 = vmatmul.mubr.msk.bf16.vlgmr.msra.gmra.mrb[0].mxu1 %vm692_vm11, %v12646_v31 }
 0x41c   :  { %6036 = vmatprep.mubr.bf16.mxu1 %v14182_v32  ;;  %v9716_v25 = vcombine.low %v12675_v43, %v12675_v43 }
 0x41d   :  { %v2571_v46 = vpop.permute.xlu1 %2570  ;;  %2910 = vrot.lane.b32.xlu0 %v9715_v20, %s11065_s18  ;;  %2908 = vrot.lane.b32.xlu1 %v9714_v19, %s11065_s18  ;;  %v2569_v24 = vpop.permute.xlu0 %2568  ;;  %v12732_v19 = vld [vmem:[%s14100_s3] ss:$8 sps:$4 sm:$0xff]  }
 0x41e   :  { %v2585_v13 = vsel %vm2584_vm8, %v2567_v30, %v2569_v24  ;;  %v2586_v18 = vsel %vm2584_vm8, %v2569_v24, %v2571_v46 }
 0x41f   :  { %9702 = vmatprep.subr.msk.bf16.mxu0 %vm504_vm6, %v2586_v18  ;;  %v2600_v3 = vsel %vm504_vm6, %v2585_v13, 0  ;;  %v12750_v18 = vld [vmem:[%s14100_s3 + $0x10] ss:$0 sps:$4 sm:$0xff]  }
 0x420   :  { %2624 = vmatpush1.bf16.msra.mxu0 %v2600_v3 }
 0x421   :  { %v5945_v14 = vpop.permute.xlu1 %5944  ;;  %6909 = vrot.lane.b32.xlu0 %v11158_v29, %s11065_s18  ;;  %2912 = vrot.lane.b32.xlu1 %v9716_v25, %s11065_s18  ;;  %v6229_v36 = vpop.permute.xlu0 %6228 }
 0x422   :  { %v6233_v56 = vrot.slane %v6229_v36, 4  ;;  %v5958_v59 = vsel %vm14151_vm9, %v5943_v4, %v5945_v14 }
 0x423   :  { %9913 = vmatmul.mubr.msk.bf16.gmra.mrb[4].mxu1 %vm692_vm11, %v12670_v61 }
 0x424   :  { %v6239_v35 = vsel %vm504_vm6, %v6232_v42, %v6233_v56  ;;  %6077 = vmatprep.mubr.bf16.mxu1 %v14182_v32  ;;  %v6250_v10 = vmul.bf16 %v6233_v56, %v12180_v55  ;;  %v5977_v42 = vsel %vm504_vm6, %v5958_v59, 0  ;;  %v9717_v56 = vcombine.high %v12675_v43, %v12675_v43  ;;  %v12763_v59 = vld [vmem:[#allocation2 + $0x4] sm:$0xff] }
 0x425   :  { %v6240_v41 = vsel %vm3610_vm10, %v6239_v35, %v6229_v36  ;;  %v12699_v48 = vpop.permute.xlu1 %2539  ;;  %6911 = vrot.lane.b32.xlu1 %v11156_v28, %s11065_s18  ;;  %v12703_v29 = vpop.permute.xlu0 %5946 }
 0x426   :  { %v6249_v57 = vmul.bf16 %v6240_v41, %v12235_v21  ;;  %v5959_v37 = vsel %vm14151_vm9, %v5945_v14, %v12703_v29  ;;  %9703 = vmatmul.mubr.msk.bf16.vlgmr.msra.gmra.mrb[16].mxu0 %vm692_vm11, %v12699_v48  ;;  %v9933_v55 = vcombine.low %v6250_v10, %v6250_v10 }
 0x427   :  { %9914 = vmatprep.subr.msk.bf16.mxu1 %vm504_vm6, %v5959_v37  ;;  %2665 = vmatprep.mubr.bf16.mxu0 %v14182_v32 }
 0x428   :  { %v9931_v4 = vcombine.low %v6249_v57, %v6249_v57  ;;  %v9932_v28 = vcombine.high %v6249_v57, %v6249_v57  ;;  %6046 = vmatpush1.bf16.msra.mxu1 %v5977_v42 }
 0x429   :  { %v12714_v6 = vpop.permute.xlu1 %2855  ;;  %v12716_v21 = vpop.permute.xlu0 %2541 }
 0x42a   :  { %v2861_v26 = vrot.slane %v12714_v6, 4  ;;  %6299 = vrot.lane.b32.xlu1 %v9932_v28, %s11036_s16  ;;  %6297 = vrot.lane.b32.xlu0 %v9931_v4, %s11036_s16 }
 0x42b   :  { %9915 = vmatmul.mubr.msk.bf16.vlgmr.msra.gmra.mrb[8].mxu1 %vm692_vm11, %v12646_v31 }
 0x42c   :  { %v2867_v40 = vsel %vm504_vm6, %v2860_v7, %v2861_v26  ;;  %6087 = vmatprep.mubr.bf16.mxu1 %v14182_v32  ;;  %v12739_v7 = vld [vmem:[#allocation2 + $0x10] sm:$0xff] }
 0x42d   :  { %v2868_v5 = vsel %vm2863_vm12, %v2867_v40, %v12714_v6  ;;  %v2573_v30 = vpop.permute.xlu0 %2572  ;;  %v12781_v40 = vld [vmem:[#allocation2 + $0xc] sm:$0xff] }
 0x42e   :  { %2881 = vrot.lane.b32.xlu1 %v12732_v19, %s11066_s29  ;;  %6301 = vrot.lane.b32.xlu0 %v9933_v55, %s11036_s16  ;;  %v12742_v20 = vmul.bf16 %v12739_v7, %v2868_v5  ;;  %v2587_v25 = vsel %vm2584_vm8, %v2571_v46, %v2573_v30 }
 0x42f   :  { %9704 = vmatmul.mubr.msk.bf16.gmra.mrb[20].mxu0 %vm692_vm11, %v12716_v21  ;;  %v2606_v46 = vsel %vm504_vm6, %v2587_v25, 0 }
 0x430   :  { %2706 = vmatprep.mubr.bf16.mxu0 %v14182_v32  ;;  %v9718_v3 = vcombine.low %v12742_v20, %v12742_v20 }
 0x431   :  { %v6570_v24 = vpop.permute.xlu0 %6569 }
 0x432   :  { %v6577_v13 = vrot.slane %v6570_v24, 4  ;;  %3197 = vrot.lane.b32.xlu1 %v11651_v58, %s11039_s19  ;;  %2883 = vrot.lane.b32.xlu0 %v12750_v18, %s11066_s29 }
 0x433   :  { %9916 = vmatmul.mubr.msk.bf16.gmra.mrb[12].mxu1 %vm692_vm11, %v12670_v61 }
 0x434   :  { %v6581_v14 = vsel %vm3268_vm1, %v6577_v13, %v6570_v24  ;;  %v2575_v36 = vpop.permute.xlu1 %2574  ;;  %6179 = vmatprep.mubr.bf16.mxu1 %v14182_v32 }
 0x435   :  { %v6593_v35 = vmul.bf16 %v12763_v59, %v6581_v14  ;;  %v2588_v41 = vsel %vm2584_vm8, %v2573_v30, %v2575_v36 }
 0x436   :  { %2916 = vrot.lane.b32.xlu1 %v9718_v3, %s11065_s18  ;;  %2914 = vrot.lane.b32.xlu0 %v9717_v56, %s11065_s18 }
 0x437   :  { %v9946_v57 = vcombine.low %v6593_v35, %v6593_v35  ;;  %9705 = vmatprep.subr.msk.bf16.mxu0 %vm504_vm6, %v2588_v41  ;;  %v9947_v42 = vcombine.high %v6593_v35, %v6593_v35  ;;  %v12801_v35 = vld [vmem:[%s14100_s3 + $0x14] ss:$0 sps:$4 sm:$0xff]  }
 0x438   :  { %2675 = vmatpush1.bf16.msra.mxu0 %v2606_v46  ;;  %v6572_v10 = vpop.permute.xlu1 %6571 }
 0x439   :  { %v6578_v43 = vrot.slane %v6572_v10, 4 }
 0x43a   :  { %6913 = vrot.lane.b32.xlu0 %v11218_v17, %s11065_s18  ;;  %6625 = vrot.lane.b32.xlu1 %v9946_v57, %s11039_s19  ;;  %v12788_v17 = vld [vmem:[%s14100_s3 + $0x4] ss:$8 sps:$4 sm:$0xff]  }
 0x43b   :  { %v6582_v37 = vsel %vm504_vm6, %v6577_v13, %v6578_v43  ;;  %9706 = vmatmul.mubr.msk.bf16.vlgmr.msra.gmra.mrb[24].mxu0 %vm692_vm11, %v12699_v48 }
 0x43c   :  { %v6583_v4 = vsel %vm3268_vm1, %v6582_v37, %v6572_v10  ;;  %v5953_v28 = vpop.permute.xlu1 %5952  ;;  %v12778_v55 = vpop.permute.xlu0 %5950  ;;  %2716 = vmatprep.mubr.bf16.mxu0 %v14182_v32  ;;  %v12810_v37 = vld [vmem:[#allocation2 + $0x18] sm:$0xff] }
 0x43d   :  { %v6594_v5 = vmul.bf16 %v12781_v40, %v6583_v4  ;;  %v5962_v24 = vsel %vm14151_vm9, %v12778_v55, %v5953_v28 }
 0x43e   :  { %6627 = vrot.lane.b32.xlu0 %v9947_v42, %s11039_s19  ;;  %v5989_v56 = vsel %vm504_vm6, %v5962_v24, 0 }
 0x43f   :  { %v9948_v30 = vcombine.low %v6594_v5, %v6594_v5 }
 0x440   :  { %v2858_v13 = vpop.permute.xlu1 %2857  ;;  %v5955_v3 = vpop.permute.xlu0 %5954 }
 0x441   :  { %v2862_v25 = vrot.slane %v2858_v13, 4  ;;  %v5963_v14 = vsel %vm14151_vm9, %v5953_v28, %v5955_v3  ;;  %6629 = vrot.lane.b32.xlu1 %v9948_v30, %s11039_s19  ;;  %v9719_v28 = vcombine.high %v12742_v20, %v12742_v20  ;;  %v9949_v20 = vcombine.high %v6594_v5, %v6594_v5 }
 0x442   :  { %6598 = vrot.lane.b32.xlu0 %v12788_v17, %s11047_s28  ;;  %9920 = vmatprep.subr.msk.bf16.mxu1 %vm504_vm6, %v5963_v14  ;;  %vm3205_vm9 = vcmask 785408  }
 0x443   :  { %v2869_v41 = vsel %vm504_vm6, %v2861_v26, %v2862_v25  ;;  %9707 = vmatmul.mubr.msk.bf16.gmra.mrb[28].mxu0 %vm692_vm11, %v12716_v21  ;;  %6148 = vmatpush1.bf16.msra.mxu1 %v5989_v56 }
 0x444   :  { %v2870_v57 = vsel %vm2863_vm12, %v2869_v41, %v2858_v13  ;;  %v2579_v46 = vpop.permute.xlu1 %2578  ;;  %v2577_v10 = vpop.permute.xlu0 %2576  ;;  %2757 = vmatprep.mubr.bf16.mxu0 %v14182_v32  ;;  %v12835_v41 = vld [vmem:[#allocation2 + $0x14] sm:$0xff] }
 0x445   :  { %v2879_v42 = vmul.bf16 %v12810_v37, %v2870_v57  ;;  %v2589_v4 = vsel %vm2584_vm8, %v2575_v36, %v2577_v10  ;;  %3199 = vrot.lane.b32.xlu1 %v11714_v12, %s11039_s19  ;;  %v2590_v6 = vsel %vm2584_vm8, %v2577_v10, %v2579_v46 }
 0x446   :  { %6600 = vrot.lane.b32.xlu0 %v12801_v35, %s11047_s28  ;;  %9708 = vmatprep.subr.msk.bf16.mxu0 %vm504_vm6, %v2590_v6  ;;  %v2612_v26 = vsel %vm504_vm6, %v2589_v4, 0  ;;  %v12848_v4 = vld [vmem:[#allocation2 + $0x20] sm:$0xf]  ;;  %s11067_s28 = smov 72  }
 0x447   :  { %v9720_v30 = vcombine.low %v2879_v42, %v2879_v42  ;;  %9921 = vmatmul.mubr.msk.bf16.vlgmr.msra.gmra.mrb[16].mxu1 %vm692_vm11, %v12646_v31  ;;  %2726 = vmatpush1.bf16.msra.mxu0 %v2612_v26  ;;  %v2880_v6 = vmul.bf16 %v12848_v4, %v2862_v25 }
 0x448   :  { %v6286_v36 = vpop.permute.xlu1 %6285  ;;  %v6574_v24 = vpop.permute.xlu0 %6573  ;;  %6189 = vmatprep.mubr.bf16.mxu1 %v14182_v32 }
 0x449   :  { %v6579_v12 = vrot.slane %v6574_v24, 4  ;;  %2918 = vrot.lane.b32.xlu1 %v9719_v28, %s11065_s18 }
 0x44a   :  { %2920 = vrot.lane.b32.xlu0 %v9720_v30, %s11065_s18 }
 0x44b   :  { %v6584_v13 = vsel %vm504_vm6, %v6578_v43, %v6579_v12  ;;  %9709 = vmatmul.mubr.msk.bf16.vlgmr.msra.gmra.mrb[32].mxu0 %vm692_vm11, %v12699_v48 }
 0x44c   :  { %v6585_v3 = vsel %vm3268_vm1, %v6584_v13, %v6574_v24  ;;  %v12832_v14 = vpop.permute.xlu1 %6289  ;;  %v6288_v56 = vpop.permute.xlu0 %6287  ;;  %2767 = vmatprep.mubr.bf16.mxu0 %v14182_v32  ;;  %v9722_v13 = vcombine.low %v2880_v6, %v2880_v6  ;;  %v12876_v6 = vld [vmem:[#allocation2 + $0x24] sm:$0xf] }
 0x44d   :  { %v12838_v57 = vmul.bf16 %v12835_v41, %v6585_v3  ;;  %v6303_v10 = vsel %vm3547_vm7, %v6286_v36, %v6288_v56  ;;  %6915 = vrot.lane.b32.xlu1 %v11298_v16, %s11065_s18  ;;  %v6304_v43 = vsel %vm3547_vm7, %v6288_v56, %v12832_v14  ;;  %v9721_v16 = vcombine.high %v2879_v42, %v2879_v42 }
 0x44e   :  { %6631 = vrot.lane.b32.xlu0 %v9949_v20, %s11039_s19  ;;  %9934 = vmatprep.subr.msk.bf16.mxu1 %vm504_vm6, %v6304_v43  ;;  %v6318_v5 = vsel %vm504_vm6, %v6303_v10, 0  ;;  %v12873_v43 = vld [vmem:[#allocation2 + $0x1c] sm:$0xff] }
 0x44f   :  { %v9950_v26 = vcombine.low %v12838_v57, %v12838_v57  ;;  %9922 = vmatmul.mubr.msk.bf16.gmra.mrb[20].mxu1 %vm692_vm11, %v12670_v61 }
 0x450   :  { %6342 = vmatpush1.bf16.msra.mxu1 %v6318_v5  ;;  %v2583_v28 = vpop.permute.xlu1 %2582  ;;  %v2581_v30 = vpop.permute.xlu0 %2580  ;;  %6373 = vmatprep.mubr.bf16.mxu1 %v14182_v32 }
 0x451   :  { %v2591_v36 = vsel %vm2584_vm8, %v2579_v46, %v2581_v30  ;;  %6633 = vrot.lane.b32.xlu1 %v9950_v26, %s11039_s19  ;;  %v2592_v24 = vsel %vm2584_vm8, %v2581_v30, %v2583_v28 }
 0x452   :  { %2922 = vrot.lane.b32.xlu0 %v9721_v16, %s11065_s18  ;;  %9711 = vmatprep.subr.msk.bf16.mxu0 %vm504_vm6, %v2592_v24  ;;  %v2618_v25 = vsel %vm504_vm6, %v2591_v36, 0 }
 0x453   :  { %9710 = vmatmul.mubr.msk.bf16.gmra.mrb[36].mxu0 %vm692_vm11, %v12716_v21 }
 0x454   :  { %2777 = vmatpush1.bf16.msra.mxu0 %v2618_v25  ;;  %v6292_v42 = vpop.permute.xlu1 %6291  ;;  %v6576_v20 = vpop.permute.xlu0 %6575  ;;  %2808 = vmatprep.mubr.bf16.mxu0 %v14182_v32 }
 0x455   :  { %v6580_v46 = vrot.slane %v6576_v20, 4  ;;  %2924 = vrot.lane.b32.xlu1 %v9722_v13, %s11065_s18 }
 0x456   :  { %7249 = vrot.lane.b32.xlu0 %v11311_v45, %s11063_s14 }
 0x457   :  { %v6586_v3 = vsel %vm504_vm6, %v6579_v12, %v6580_v46  ;;  %9935 = vmatmul.mubr.msk.bf16.vlgmr.msra.gmra.mrb[0].mxu1 %vm692_vm11, %v12788_v17  ;;  %v6597_v26 = vmul.bf16 %v12876_v6, %v6580_v46 }
 0x458   :  { %v6587_v56 = vsel %vm3268_vm1, %v6586_v3, %v6576_v20  ;;  %v3194_v10 = vpop.permute.xlu1 %3193  ;;  %6383 = vmatprep.mubr.bf16.mxu1 %v14182_v32 }
 0x459   :  { %v6596_v5 = vmul.bf16 %v12873_v43, %v6587_v56  ;;  %v3201_v45 = vrot.slane %v3194_v10, 4  ;;  %7251 = vrot.lane.b32.xlu1 %v11317_v50, %s11063_s14  ;;  %v9954_v36 = vcombine.low %v6597_v26, %v6597_v26 }
 0x45b   :  { %v9952_v12 = vcombine.low %v6596_v5, %v6596_v5  ;;  %v9953_v16 = vcombine.high %v6596_v5, %v6596_v5  ;;  %v3206_v28 = vsel %vm3205_vm9, %v3201_v45, %v3194_v10  ;;  %9712 = vmatmul.mubr.msk.bf16.vlgmr.msra.gmra.mrb[40].mxu0 %vm692_vm11, %v12699_v48 }
 0x45c   :  { %v3218_v30 = vmul.bf16 %v12667_v23, %v3206_v28  ;;  %2818 = vmatprep.mubr.bf16.mxu0 %v14182_v32  ;;  %v6305_v23 = vsel %vm3547_vm7, %v12832_v14, %v6292_v42 }
 0x45d   :  { %6639 = vrot.lane.b32.xlu1 %v9953_v16, %s11039_s19  ;;  %6637 = vrot.lane.b32.xlu0 %v9952_v12, %s11039_s19  ;;  %v6324_v13 = vsel %vm504_vm6, %v6305_v23, 0 }
 0x45e   :  { %v9735_v24 = vcombine.low %v3218_v30, %v3218_v30  ;;  %v9736_v50 = vcombine.high %v3218_v30, %v3218_v30 }
 0x45f   :  { %9936 = vmatmul.mubr.msk.bf16.gmra.mrb[4].mxu1 %vm692_vm11, %v12801_v35 }
 0x460   :  { %6424 = vmatprep.mubr.bf16.mxu1 %v14182_v32 }
 0x461   :  { %3250 = vrot.lane.b32.xlu1 %v9735_v24, %s11038_s0  ;;  %6641 = vrot.lane.b32.xlu0 %v9954_v36, %s11039_s19 }
 0x463   :  { %9713 = vmatmul.mubr.msk.bf16.gmra.mrb[44].mxu0 %vm692_vm11, %v12716_v21 }
 0x464   :  { %2997 = vmatprep.mubr.bf16.mxu0 %v14182_v32 }
 0x465   :  { %3252 = vrot.lane.b32.xlu0 %v9736_v50, %s11038_s0 }
 0x469   :  { %7253 = vrot.lane.b32.xlu0 %v11327_v54, %s11063_s14 }
 0x484   :  { %v12901_v48 = vpop.permute.xlu0 %6293 }
 0x485   :  { %v6306_v25 = vsel %vm3547_vm7, %v6292_v42, %v12901_v48 }
 0x486   :  { %9937 = vmatprep.subr.msk.bf16.mxu1 %vm504_vm6, %v6306_v25 }
 0x487   :  { %6393 = vmatpush1.bf16.msra.mxu1 %v6324_v13 }
 0x488   :  { %v3196_v21 = vpop.permute.xlu0 %3195 }
 0x489   :  { %v3202_v20 = vrot.slane %v3196_v21, 4 }
 0x48a   :  { %9938 = vmatmul.mubr.msk.bf16.vlgmr.msra.gmra.mrb[8].mxu1 %vm692_vm11, %v12788_v17 }
 0x48b   :  { %v3207_v54 = vsel %vm504_vm6, %v3201_v45, %v3202_v20  ;;  %6434 = vmatprep.mubr.bf16.mxu1 %v14182_v32 }
 0x48c   :  { %v3208_v14 = vsel %vm3205_vm9, %v3207_v54, %v3196_v21 }
 0x48d   :  { %v3219_v46 = vmul.bf16 %v12672_v9, %v3208_v14 }
 0x48f   :  { %v9737_v3 = vcombine.low %v3219_v46, %v3219_v46  ;;  %v2909_v42 = vpop.permute.xlu1 %2908  ;;  %v2911_v56 = vpop.permute.xlu0 %2910 }
 0x490   :  { %v2927_v10 = vsel %vm2926_vm14, %v2909_v42, %v2911_v56 }
 0x491   :  { %3254 = vrot.lane.b32.xlu1 %v9737_v3, %s11038_s0  ;;  %v2942_v9 = vsel %vm504_vm6, %v2927_v10, 0 }
 0x492   :  { %9939 = vmatmul.mubr.msk.bf16.gmra.mrb[12].mxu1 %vm692_vm11, %v12801_v35 }
 0x493   :  { %v2913_v5 = vpop.permute.xlu1 %2912  ;;  %v6910_v26 = vpop.permute.xlu0 %6909  ;;  %6526 = vmatprep.mubr.bf16.mxu1 %v14182_v32 }
 0x494   :  { %v6917_v45 = vrot.slane %v6910_v26, 4  ;;  %v2928_v12 = vsel %vm2926_vm14, %v2911_v56, %v2913_v5 }
 0x495   :  { %9723 = vmatprep.subr.msk.bf16.mxu0 %vm504_vm6, %v2928_v12  ;;  %v9738_v12 = vcombine.high %v3219_v46, %v3219_v46 }
 0x496   :  { %v6921_v16 = vsel %vm2926_vm14, %v6917_v45, %v6910_v26  ;;  %2966 = vmatpush1.bf16.msra.mxu0 %v2942_v9 }
 0x497   :  { %v6933_v28 = vmul.bf16 %v12763_v59, %v6921_v16  ;;  %v6912_v30 = vpop.permute.xlu1 %6911 }
 0x498   :  { %v6918_v36 = vrot.slane %v6912_v30, 4 }
 0x499   :  { %v9967_v24 = vcombine.low %v6933_v28, %v6933_v28  ;;  %v9968_v50 = vcombine.high %v6933_v28, %v6933_v28 }
 0x49a   :  { %v6922_v23 = vsel %vm504_vm6, %v6917_v45, %v6918_v36 }
 0x49b   :  { %v6923_v25 = vsel %vm2926_vm14, %v6922_v23, %v6912_v30  ;;  %6967 = vrot.lane.b32.xlu0 %v9968_v50, %s11062_s12  ;;  %6965 = vrot.lane.b32.xlu1 %v9967_v24, %s11062_s12 }
 0x49c   :  { %v6934_v13 = vmul.bf16 %v12781_v40, %v6923_v25  ;;  %v6300_v21 = vpop.permute.xlu1 %6299  ;;  %v12928_v54 = vpop.permute.xlu0 %6297 }
 0x49d   :  { %v6309_v3 = vsel %vm3547_vm7, %v12928_v54, %v6300_v21 }
 0x49e   :  { %v9969_v14 = vcombine.low %v6934_v13, %v6934_v13  ;;  %v6336_v26 = vsel %vm504_vm6, %v6309_v3, 0 }
 0x49f   :  { %3223 = vrot.lane.b32.xlu0 %v12732_v19, %s11067_s28 }
 0x4a0   :  { %v12934_v42 = vpop.permute.xlu1 %2881  ;;  %6969 = vrot.lane.b32.xlu1 %v9969_v14, %s11062_s12  ;;  %v6302_v56 = vpop.permute.xlu0 %6301 }
 0x4a1   :  { %v6310_v10 = vsel %vm3547_vm7, %v6300_v21, %v6302_v56  ;;  %9724 = vmatmul.mubr.msk.bf16.vlgmr.msra.gmra.mrb[16].mxu0 %vm692_vm11, %v12934_v42 }
 0x4a2   :  { %9943 = vmatprep.subr.msk.bf16.mxu1 %vm504_vm6, %v6310_v10  ;;  %3007 = vmatprep.mubr.bf16.mxu0 %v14182_v32 }
 0x4a3   :  { %3225 = vrot.lane.b32.xlu0 %v12750_v18, %s11067_s28  ;;  %6495 = vmatpush1.bf16.msra.mxu1 %v6336_v26 }
 0x4a4   :  { %v3198_v19 = vpop.permute.xlu1 %3197  ;;  %v12945_v45 = vpop.permute.xlu0 %2883  ;;  %6938 = vrot.lane.b32.xlu1 %v12788_v17, %s11056_s13 }
 0x4a5   :  { %v3203_v9 = vrot.slane %v3198_v19, 4 }
 0x4a6   :  { %9944 = vmatmul.mubr.msk.bf16.vlgmr.msra.gmra.mrb[16].mxu1 %vm692_vm11, %v12788_v17 }
 0x4a7   :  { %v3209_v16 = vsel %vm504_vm6, %v3202_v20, %v3203_v9  ;;  %3256 = vrot.lane.b32.xlu0 %v9738_v12, %s11038_s0  ;;  %6536 = vmatprep.mubr.bf16.mxu1 %v14182_v32 }
 0x4a8   :  { %v3210_v18 = vsel %vm3205_vm9, %v3209_v16, %v3198_v19  ;;  %v2917_v28 = vpop.permute.xlu1 %2916  ;;  %v2915_v30 = vpop.permute.xlu0 %2914  ;;  %6940 = vrot.lane.b32.xlu1 %v12801_v35, %s11056_s13 }
 0x4a9   :  { %v3220_v24 = vmul.bf16 %v12739_v7, %v3210_v18  ;;  %v2929_v46 = vsel %vm2926_vm14, %v2913_v5, %v2915_v30  ;;  %9725 = vmatmul.mubr.msk.bf16.gmra.mrb[20].mxu0 %vm692_vm11, %v12945_v45  ;;  %v2930_v20 = vsel %vm2926_vm14, %v2915_v30, %v2917_v28  ;;  %v9970_v5 = vcombine.high %v6934_v13, %v6934_v13 }
 0x4aa   :  { %9726 = vmatprep.subr.msk.bf16.mxu0 %vm504_vm6, %v2930_v20  ;;  %v2948_v50 = vsel %vm504_vm6, %v2929_v46, 0  ;;  %3048 = vmatprep.mubr.bf16.mxu0 %v14182_v32 }
 0x4ab   :  { %v9739_v23 = vcombine.low %v3220_v24, %v3220_v24  ;;  %7255 = vrot.lane.b32.xlu0 %v11381_v0, %s11063_s14  ;;  %3017 = vmatpush1.bf16.msra.mxu0 %v2948_v50  ;;  %v9740_v0 = vcombine.high %v3220_v24, %v3220_v24 }
 0x4ac   :  { %v6914_v25 = vpop.permute.xlu0 %6913  ;;  %v6626_v21 = vpop.permute.xlu1 %6625 }
 0x4ad   :  { %v6919_v7 = vrot.slane %v6914_v25, 4  ;;  %3258 = vrot.lane.b32.xlu1 %v9739_v23, %s11038_s0 }
 0x4ae   :  { %9945 = vmatmul.mubr.msk.bf16.gmra.mrb[20].mxu1 %vm692_vm11, %v12801_v35 }
 0x4af   :  { %v6924_v14 = vsel %vm504_vm6, %v6918_v36, %v6919_v7  ;;  %6713 = vmatprep.mubr.bf16.mxu1 %v14182_v32 }
 0x4b0   :  { %v6925_v3 = vsel %vm2926_vm14, %v6924_v14, %v6914_v25  ;;  %v6628_v56 = vpop.permute.xlu0 %6627 }
 0x4b1   :  { %v12974_v10 = vmul.bf16 %v12835_v41, %v6925_v3  ;;  %6971 = vrot.lane.b32.xlu1 %v9970_v5, %s11062_s12  ;;  %9727 = vmatmul.mubr.msk.bf16.vlgmr.msra.gmra.mrb[24].mxu0 %vm692_vm11, %v12934_v42  ;;  %v6643_v36 = vsel %vm3205_vm9, %v6626_v21, %v6628_v56 }
 0x4b2   :  { %3058 = vmatprep.mubr.bf16.mxu0 %v14182_v32  ;;  %v6658_v16 = vsel %vm504_vm6, %v6643_v36, 0 }
 0x4b3   :  { %v9971_v13 = vcombine.low %v12974_v10, %v12974_v10  ;;  %v6630_v26 = vpop.permute.xlu1 %6629 }
 0x4b4   :  { %v12983_v19 = vpop.permute.xlu0 %6598  ;;  %v6644_v12 = vsel %vm3205_vm9, %v6628_v56, %v6630_v26 }
 0x4b5   :  { %3260 = vrot.lane.b32.xlu1 %v9740_v0, %s11038_s0  ;;  %6973 = vrot.lane.b32.xlu0 %v9971_v13, %s11062_s12 }
 0x4b6   :  { %9955 = vmatprep.subr.msk.bf16.mxu1 %vm504_vm6, %v6644_v12 }
 0x4b7   :  { %6682 = vmatpush1.bf16.msra.mxu1 %v6658_v16  ;;  %v3200_v18 = vpop.permute.xlu1 %3199 }
 0x4b8   :  { %v3204_v30 = vrot.slane %v3200_v18, 4  ;;  %v12990_v24 = vpop.permute.xlu0 %6600 }
 0x4b9   :  { %9728 = vmatmul.mubr.msk.bf16.gmra.mrb[28].mxu0 %vm692_vm11, %v12945_v45 }
 0x4ba   :  { %v3211_v46 = vsel %vm504_vm6, %v3203_v9, %v3204_v30  ;;  %3099 = vmatprep.mubr.bf16.mxu0 %v14182_v32  ;;  %9956 = vmatmul.mubr.msk.bf16.vlgmr.msra.gmra.mrb[0].mxu1 %vm692_vm11, %v12983_v19 }
 0x4bb   :  { %v3212_v20 = vsel %vm3205_vm9, %v3211_v46, %v3200_v18  ;;  %v2919_v50 = vpop.permute.xlu1 %2918  ;;  %6723 = vmatprep.mubr.bf16.mxu1 %v14182_v32 }
 0x4bc   :  { %v3221_v23 = vmul.bf16 %v12810_v37, %v3212_v20  ;;  %v2931_v25 = vsel %vm2926_vm14, %v2917_v28, %v2919_v50  ;;  %v2921_v5 = vpop.permute.xlu0 %2920 }
 0x4bd   :  { %v2932_v21 = vsel %vm2926_vm14, %v2919_v50, %v2921_v5  ;;  %v2954_v14 = vsel %vm504_vm6, %v2931_v25, 0 }
 0x4be   :  { %v9741_v9 = vcombine.low %v3221_v23, %v3221_v23  ;;  %9729 = vmatprep.subr.msk.bf16.mxu0 %vm504_vm6, %v2932_v21 }
 0x4bf   :  { %v6916_v3 = vpop.permute.xlu1 %6915  ;;  %3068 = vmatpush1.bf16.msra.mxu0 %v2954_v14 }
 0x4c0   :  { %v6920_v56 = vrot.slane %v6916_v3, 4  ;;  %3262 = vrot.lane.b32.xlu0 %v9741_v9, %s11038_s0  ;;  %v6632_v0 = vpop.permute.xlu0 %6631 }
 0x4c1   :  { %v6645_v37 = vsel %vm3205_vm9, %v6630_v26, %v6632_v0 }
 0x4c2   :  { %v6926_v13 = vsel %vm504_vm6, %v6919_v7, %v6920_v56  ;;  %9730 = vmatmul.mubr.msk.bf16.vlgmr.msra.gmra.mrb[32].mxu0 %vm692_vm11, %v12934_v42  ;;  %9957 = vmatmul.mubr.msk.bf16.gmra.mrb[4].mxu1 %vm692_vm11, %v12990_v24  ;;  %v6937_v7 = vmul.bf16 %v12876_v6, %v6920_v56  ;;  %v6664_v18 = vsel %vm504_vm6, %v6645_v37, 0  ;;  %v3222_v56 = vmul.bf16 %v12848_v4, %v3204_v30 }
 0x4c3   :  { %v6927_v28 = vsel %vm2926_vm14, %v6926_v13, %v6916_v3  ;;  %v13013_v36 = vpop.permute.xlu1 %6633  ;;  %3109 = vmatprep.mubr.bf16.mxu0 %v14182_v32  ;;  %6764 = vmatprep.mubr.bf16.mxu1 %v14182_v32 }
 0x4c4   :  { %v6936_v12 = vmul.bf16 %v12873_v43, %v6927_v28  ;;  %v2923_v16 = vpop.permute.xlu0 %2922  ;;  %v6646_v26 = vsel %vm3205_vm9, %v6632_v0, %v13013_v36  ;;  %v9975_v21 = vcombine.low %v6937_v7, %v6937_v7  ;;  %v9742_v0 = vcombine.high %v3221_v23, %v3221_v23 }
 0x4c5   :  { %9958 = vmatprep.subr.msk.bf16.mxu1 %vm504_vm6, %v6646_v26  ;;  %v2933_v50 = vsel %vm2926_vm14, %v2921_v5, %v2923_v16  ;;  %v9743_v4 = vcombine.low %v3222_v56, %v3222_v56 }
 0x4c6   :  { %v9973_v46 = vcombine.low %v6936_v12, %v6936_v12  ;;  %v9974_v20 = vcombine.high %v6936_v12, %v6936_v12  ;;  %6733 = vmatpush1.bf16.msra.mxu1 %v6664_v18  ;;  %v2960_v5 = vsel %vm504_vm6, %v2933_v50, 0 }
 0x4c7   :  { %v2925_v25 = vpop.permute.xlu1 %2924 }
 0x4c8   :  { %v2934_v14 = vsel %vm2926_vm14, %v2923_v16, %v2925_v25  ;;  %6977 = vrot.lane.b32.xlu1 %v9973_v46, %s11062_s12  ;;  %6979 = vrot.lane.b32.xlu0 %v9974_v20, %s11062_s12  ;;  %v7250_v9 = vpop.permute.xlu0 %7249 }
 0x4c9   :  { %v7257_v3 = vrot.slane %v7250_v9, 4  ;;  %9732 = vmatprep.subr.msk.bf16.mxu0 %vm504_vm6, %v2934_v14 }
 0x4ca   :  { %9731 = vmatmul.mubr.msk.bf16.gmra.mrb[36].mxu0 %vm692_vm11, %v12945_v45  ;;  %9959 = vmatmul.mubr.msk.bf16.vlgmr.msra.gmra.mrb[8].mxu1 %vm692_vm11, %v12983_v19 }
 0x4cb   :  { %v7261_v13 = vsel %vm2584_vm8, %v7257_v3, %v7250_v9  ;;  %3119 = vmatpush1.bf16.msra.mxu0 %v2960_v5  ;;  %v7252_v37 = vpop.permute.xlu1 %7251  ;;  %3150 = vmatprep.mubr.bf16.mxu0 %v14182_v32  ;;  %v9782_v5 = vcombine.high %v11520_v63, %v11520_v63 }
 0x4cc   :  { %v7273_v28 = vmul.bf16 %v12763_v59, %v7261_v13  ;;  %v7258_v12 = vrot.slane %v7252_v37, 4  ;;  %6981 = vrot.lane.b32.xlu1 %v9975_v21, %s11062_s12  ;;  %3264 = vrot.lane.b32.xlu0 %v9742_v0, %s11038_s0 }
 0x4cd   :  { %6774 = vmatprep.mubr.bf16.mxu1 %v14182_v32 }
 0x4ce   :  { %v9988_v30 = vcombine.low %v7273_v28, %v7273_v28  ;;  %v7262_v23 = vsel %vm504_vm6, %v7257_v3, %v7258_v12  ;;  %v9989_v46 = vcombine.high %v7273_v28, %v7273_v28  ;;  %v9761_v3 = vcombine.high %v11420_v8, %v11420_v8 }
 0x4cf   :  { %v7263_v7 = vsel %vm2584_vm8, %v7262_v23, %v7252_v37  ;;  %v6640_v16 = vpop.permute.xlu1 %6639  ;;  %v13042_v26 = vpop.permute.xlu0 %6637 }
 0x4d0   :  { %v7274_v18 = vmul.bf16 %v12781_v40, %v7263_v7  ;;  %3266 = vrot.lane.b32.xlu1 %v9743_v4, %s11038_s0  ;;  %7305 = vrot.lane.b32.xlu0 %v9988_v30, %s11059_s24  ;;  %v6649_v50 = vsel %vm3205_vm9, %v13042_v26, %v6640_v16 }
 0x4d1   :  { %v6676_v14 = vsel %vm504_vm6, %v6649_v50, 0 }
 0x4d2   :  { %v9990_v20 = vcombine.low %v7274_v18, %v7274_v18  ;;  %9733 = vmatmul.mubr.msk.bf16.vlgmr.msra.gmra.mrb[40].mxu0 %vm692_vm11, %v12934_v42  ;;  %9960 = vmatmul.mubr.msk.bf16.gmra.mrb[12].mxu1 %vm692_vm11, %v12990_v24  ;;  %v9991_v9 = vcombine.high %v7274_v18, %v7274_v18 }
 0x4d3   :  { %v6642_v25 = vpop.permute.xlu0 %6641  ;;  %3160 = vmatprep.mubr.bf16.mxu0 %v14182_v32  ;;  %6866 = vmatprep.mubr.bf16.mxu1 %v14182_v32  ;;  %v3251_v63 = vpop.permute.xlu1 %3250 }
 0x4d4   :  { %v6650_v21 = vsel %vm3205_vm9, %v6640_v16, %v6642_v25  ;;  %7307 = vrot.lane.b32.xlu1 %v9989_v46, %s11059_s24  ;;  %7309 = vrot.lane.b32.xlu0 %v9990_v20, %s11059_s24 }
 0x4d5   :  { %9964 = vmatprep.subr.msk.bf16.mxu1 %vm504_vm6, %v6650_v21 }
 0x4d6   :  { %6835 = vmatpush1.bf16.msra.mxu1 %v6676_v14 }
 0x4d7   :  { %v3253_v42 = vpop.permute.xlu0 %3252 }
 0x4d8   :  { %7278 = vrot.lane.b32.xlu1 %v12788_v17, %s11057_s21  ;;  %7280 = vrot.lane.b32.xlu0 %v12801_v35, %s11057_s21  ;;  %v3269_v28 = vsel %vm3268_vm1, %v3251_v63, %v3253_v42 }
 0x4d9   :  { %v3284_v30 = vsel %vm504_vm6, %v3269_v28, 0 }
 0x4da   :  { %9734 = vmatmul.mubr.msk.bf16.gmra.mrb[44].mxu0 %vm692_vm11, %v12945_v45  ;;  %9965 = vmatmul.mubr.msk.bf16.vlgmr.msra.gmra.mrb[16].mxu1 %vm692_vm11, %v12983_v19 }
 0x4db   :  { %v7254_v56 = vpop.permute.xlu0 %7253  ;;  %6876 = vmatprep.mubr.bf16.mxu1 %v14182_v32  ;;  %3339 = vmatprep.mubr.bf16.mxu0 %v14182_v32 }
 0x4dc   :  { %v7259_v0 = vrot.slane %v7254_v56, 4  ;;  %3602 = vrot.lane.b32.xlu1 %v9761_v3, %s11043_s2  ;;  %7311 = vrot.lane.b32.xlu0 %v9991_v9, %s11059_s24 }
 0x4de   :  { %v7264_v45 = vsel %vm504_vm6, %v7258_v12, %v7259_v0 }
 0x4df   :  { %v7265_v8 = vsel %vm2584_vm8, %v7264_v45, %v7254_v56 }
 0x4e0   :  { %v13079_v13 = vmul.bf16 %v12835_v41, %v7265_v8  ;;  %3944 = vrot.lane.b32.xlu0 %v9782_v5, %s11048_s1 }
 0x4e2   :  { %v9992_v37 = vcombine.low %v13079_v13, %v13079_v13  ;;  %9966 = vmatmul.mubr.msk.bf16.gmra.mrb[20].mxu1 %vm692_vm11, %v12990_v24 }
 0x4e3   :  { %7053 = vmatprep.mubr.bf16.mxu1 %v14182_v32 }
 0x4e4   :  { %7313 = vrot.lane.b32.xlu1 %v9992_v37, %s11059_s24 }
 0x503   :  { %v3255_v12 = vpop.permute.xlu1 %3254 }
 0x504   :  { %v3270_v4 = vsel %vm3268_vm1, %v3253_v42, %v3255_v12 }
 0x505   :  { %9744 = vmatprep.subr.msk.bf16.mxu0 %vm504_vm6, %v3270_v4 }
 0x506   :  { %3308 = vmatpush1.bf16.msra.mxu0 %v3284_v30 }
 0x50d   :  { %v6966_v23 = vpop.permute.xlu1 %6965  ;;  %v6968_v7 = vpop.permute.xlu0 %6967 }
 0x50e   :  { %v6983_v16 = vsel %vm2863_vm12, %v6966_v23, %v6968_v7 }
 0x50f   :  { %v6998_v50 = vsel %vm504_vm6, %v6983_v16, 0  ;;  %v7589_v16 = vmul.bf16 %v12763_v59, %v11563_v27  ;;  %v7590_v27 = vmul.bf16 %v12781_v40, %v11573_v22 }
 0x511   :  { %v13093_v18 = vpop.permute.xlu0 %3223 }
 0x512   :  { %v6970_v46 = vpop.permute.xlu1 %6969  ;;  %9745 = vmatmul.mubr.msk.bf16.vlgmr.msra.gmra.mrb[16].mxu0 %vm692_vm11, %v13093_v18 }
 0x513   :  { %v6984_v20 = vsel %vm2863_vm12, %v6968_v7, %v6970_v46  ;;  %3349 = vmatprep.mubr.bf16.mxu0 %v14182_v32 }
 0x514   :  { %9976 = vmatprep.subr.msk.bf16.mxu1 %vm504_vm6, %v6984_v20  ;;  %v9803_v20 = vcombine.high %v11689_v62, %v11689_v62 }
 0x515   :  { %7022 = vmatpush1.bf16.msra.mxu1 %v6998_v50  ;;  %v13101_v25 = vpop.permute.xlu0 %3225 }
 0x516   :  { %v13103_v21 = vpop.permute.xlu1 %6938 }
 0x518   :  { %9977 = vmatmul.mubr.msk.bf16.vlgmr.msra.gmra.mrb[0].mxu1 %vm692_vm11, %v13103_v21 }
 0x519   :  { %v3257_v14 = vpop.permute.xlu0 %3256  ;;  %7063 = vmatprep.mubr.bf16.mxu1 %v14182_v32 }
 0x51a   :  { %9746 = vmatmul.mubr.msk.bf16.gmra.mrb[20].mxu0 %vm692_vm11, %v13101_v25  ;;  %v13110_v42 = vpop.permute.xlu1 %6940  ;;  %v3271_v3 = vsel %vm3268_vm1, %v3255_v12, %v3257_v14 }
 0x51b   :  { %3390 = vmatprep.mubr.bf16.mxu0 %v14182_v32  ;;  %v3290_v37 = vsel %vm504_vm6, %v3271_v3, 0  ;;  %v10010_v3 = vcombine.high %v7589_v16, %v7589_v16 }
 0x51d   :  { %v7256_v9 = vpop.permute.xlu0 %7255 }
 0x51e   :  { %v7260_v56 = vrot.slane %v7256_v9, 4 }
 0x51f   :  { %v3259_v5 = vpop.permute.xlu1 %3258 }
 0x520   :  { %v7266_v45 = vsel %vm504_vm6, %v7259_v0, %v7260_v56  ;;  %v3272_v8 = vsel %vm3268_vm1, %v3257_v14, %v3259_v5  ;;  %9978 = vmatmul.mubr.msk.bf16.gmra.mrb[4].mxu1 %vm692_vm11, %v13110_v42  ;;  %v7277_v12 = vmul.bf16 %v12876_v6, %v7260_v56  ;;  %v10011_v56 = vcombine.low %v7590_v27, %v7590_v27 }
 0x521   :  { %v7267_v63 = vsel %vm2584_vm8, %v7266_v45, %v7256_v9  ;;  %9747 = vmatprep.subr.msk.bf16.mxu0 %vm504_vm6, %v3272_v8  ;;  %7104 = vmatprep.mubr.bf16.mxu1 %v14182_v32  ;;  %vm14234_vm8 = vcmask 531456  }
 0x522   :  { %v7276_v28 = vmul.bf16 %v12873_v43, %v7267_v63  ;;  %3359 = vmatpush1.bf16.msra.mxu0 %v3290_v37  ;;  %v9996_v50 = vcombine.low %v7277_v12, %v7277_v12  ;;  %v13159_v37 = vmul.bf16 %v12835_v41, %v11674_v49  ;;  %v9824_v63 = vcombine.high %v11855_v33, %v11855_v33  ;;  %vm14237_vm14 = vmmov %vm14234_vm8 }
 0x523   :  { %v6972_v30 = vpop.permute.xlu1 %6971  ;;  %v7592_v33 = vmul.bf16 %v12873_v43, %v11732_v38 }
 0x524   :  { %v9994_v4 = vcombine.low %v7276_v28, %v7276_v28  ;;  %v9995_v0 = vcombine.high %v7276_v28, %v7276_v28  ;;  %v6985_v23 = vsel %vm2863_vm12, %v6970_v46, %v6972_v30  ;;  %v10009_v46 = vcombine.low %v7589_v16, %v7589_v16 }
 0x525   :  { %9748 = vmatmul.mubr.msk.bf16.vlgmr.msra.gmra.mrb[24].mxu0 %vm692_vm11, %v13093_v18  ;;  %v7004_v9 = vsel %vm504_vm6, %v6985_v23, 0  ;;  %v10013_v49 = vcombine.low %v13159_v37, %v13159_v37  ;;  %v14196_v23 = vld [vmem:[#allocation14_spill] sm:$0xff] }
 0x526   :  { %7319 = vrot.lane.b32.xlu0 %v9995_v0, %s11059_s24  ;;  %7317 = vrot.lane.b32.xlu1 %v9994_v4, %s11059_s24  ;;  %v10015_v0 = vcombine.low %v7592_v33, %v7592_v33  ;;  %v7593_v16 = vmul.bf16 %v12876_v6, %v14196_v23 }
 0x527   :  { %v13129_v7 = vpop.permute.xlu0 %6973  ;;  %3400 = vmatprep.mubr.bf16.mxu0 %v14182_v32  ;;  %v3261_v62 = vpop.permute.xlu1 %3260 }
 0x528   :  { %v6986_v14 = vsel %vm2863_vm12, %v6972_v30, %v13129_v7  ;;  %v3273_v45 = vsel %vm3268_vm1, %v3259_v5, %v3261_v62  ;;  %v10012_v5 = vcombine.high %v7590_v27, %v7590_v27  ;;  %v10016_v30 = vcombine.high %v7592_v33, %v7592_v33  ;;  %v14199_v33 = vld [vmem:[#allocation4_spill] sm:$0xff] }
 0x529   :  { %9979 = vmatprep.subr.msk.bf16.mxu1 %vm504_vm6, %v6986_v14  ;;  %v3296_v28 = vsel %vm504_vm6, %v3273_v45, 0 }
 0x52a   :  { %4286 = vrot.lane.b32.xlu0 %v9803_v20, %s11052_s9  ;;  %7321 = vrot.lane.b32.xlu1 %v9996_v50, %s11059_s24 }
 0x52b   :  { %7073 = vmatpush1.bf16.msra.mxu1 %v7004_v9  ;;  %v14197_v9 = vld [vmem:[#allocation3_spill] sm:$0xff] }
 0x52d   :  { %9749 = vmatmul.mubr.msk.bf16.gmra.mrb[28].mxu0 %vm692_vm11, %v13101_v25 }
 0x52e   :  { %7623 = vrot.lane.b32.xlu0 %v10010_v3, %s11051_s8  ;;  %7621 = vrot.lane.b32.xlu1 %v10009_v46, %s11051_s8  ;;  %v7905_v46 = vmul.bf16 %v12763_v59, %v14197_v9  ;;  %v14198_v3 = vld [vmem:[#allocation37_spill] sm:$0xff] }
 0x52f   :  { %3441 = vmatprep.mubr.bf16.mxu0 %v14182_v32  ;;  %9980 = vmatmul.mubr.msk.bf16.vlgmr.msra.gmra.mrb[8].mxu1 %vm692_vm11, %v13103_v21  ;;  %v9865_v27 = vcombine.high %v14198_v3, %v14198_v3  ;;  %v14200_v9 = vld [vmem:[#allocation5_spill] sm:$0xff] }
 0x530   :  { %7114 = vmatprep.mubr.bf16.mxu1 %v14182_v32 }
 0x532   :  { %7594 = vrot.lane.b32.xlu0 %v12788_v17, %s11039_s19  ;;  %7625 = vrot.lane.b32.xlu1 %v10011_v56, %s11051_s8  ;;  %v3263_v22 = vpop.permute.xlu0 %3262  ;;  %v10017_v56 = vcombine.low %v7593_v16, %v7593_v16 }
 0x533   :  { %v3274_v8 = vsel %vm3268_vm1, %v3261_v62, %v3263_v22 }
 0x534   :  { %9750 = vmatprep.subr.msk.bf16.mxu0 %vm504_vm6, %v3274_v8 }
 0x535   :  { %3410 = vmatpush1.bf16.msra.mxu0 %v3296_v28 }
 0x536   :  { %4628 = vrot.lane.b32.xlu0 %v9824_v63, %s11054_s11  ;;  %7596 = vrot.lane.b32.xlu1 %v12801_v35, %s11039_s19 }
 0x537   :  { %9981 = vmatmul.mubr.msk.bf16.gmra.mrb[12].mxu1 %vm692_vm11, %v13110_v42 }
 0x538   :  { %9751 = vmatmul.mubr.msk.bf16.vlgmr.msra.gmra.mrb[32].mxu0 %vm692_vm11, %v13093_v18  ;;  %7206 = vmatprep.mubr.bf16.mxu1 %v14182_v32 }
 0x539   :  { %3451 = vmatprep.mubr.bf16.mxu0 %v14182_v32 }
 0x53a   :  { %v13178_v12 = vpop.permute.xlu1 %6977  ;;  %7629 = vrot.lane.b32.xlu0 %v10013_v49, %s11051_s8  ;;  %7627 = vrot.lane.b32.xlu1 %v10012_v5, %s11051_s8  ;;  %v6980_v4 = vpop.permute.xlu0 %6979  ;;  %v10030_v5 = vcombine.low %v7905_v46, %v7905_v46  ;;  %v10031_v49 = vcombine.high %v7905_v46, %v7905_v46  ;;  %v13227_v46 = vmul.bf16 %v12835_v41, %v14200_v9 }
 0x53b   :  { %v6989_v38 = vsel %vm2863_vm12, %v13178_v12, %v6980_v4 }
 0x53c   :  { %v7016_v62 = vsel %vm504_vm6, %v6989_v38, 0 }
 0x53e   :  { %v6982_v20 = vpop.permute.xlu1 %6981  ;;  %7635 = vrot.lane.b32.xlu0 %v10016_v30, %s11051_s8  ;;  %7633 = vrot.lane.b32.xlu1 %v10015_v0, %s11051_s8  ;;  %v3265_v50 = vpop.permute.xlu0 %3264 }
 0x53f   :  { %v6990_v14 = vsel %vm2863_vm12, %v6980_v4, %v6982_v20  ;;  %v3275_v45 = vsel %vm3268_vm1, %v3263_v22, %v3265_v50  ;;  %v7906_v4 = vmul.bf16 %v12781_v40, %v14199_v33  ;;  %v14204_v33 = vld [vmem:[#allocation17_spill] sm:$0xff] }
 0x540   :  { %9752 = vmatmul.mubr.msk.bf16.gmra.mrb[36].mxu0 %vm692_vm11, %v13101_v25  ;;  %9985 = vmatprep.subr.msk.bf16.mxu1 %vm504_vm6, %v6990_v14  ;;  %v3302_v0 = vsel %vm504_vm6, %v3275_v45, 0 }
 0x541   :  { %7175 = vmatpush1.bf16.msra.mxu1 %v7016_v62  ;;  %3492 = vmatprep.mubr.bf16.mxu0 %v14182_v32  ;;  %v10032_v38 = vcombine.low %v7906_v4, %v7906_v4 }
 0x542   :  { %v3267_v8 = vpop.permute.xlu1 %3266  ;;  %5268 = vrot.lane.b32.xlu0 %v9865_v27, %s11050_s7  ;;  %7637 = vrot.lane.b32.xlu1 %v10017_v56, %s11051_s8  ;;  %v7306_v63 = vpop.permute.xlu0 %7305  ;;  %v14201_v27 = vld [vmem:[#allocation10_spill] sm:$0xff]  ;;  %v14202_v56 = vld [vmem:[#allocation11_spill] sm:$0xff] }
 0x543   :  { %v3276_v28 = vsel %vm3268_vm1, %v3265_v50, %v3267_v8  ;;  %v10033_v8 = vcombine.high %v7906_v4, %v7906_v4  ;;  %vm14241_vm1 = vmmov %vm14234_vm8 }
 0x544   :  { %9753 = vmatprep.subr.msk.bf16.mxu0 %vm504_vm6, %v3276_v28  ;;  %9986 = vmatmul.mubr.msk.bf16.vlgmr.msra.gmra.mrb[16].mxu1 %vm692_vm11, %v13103_v21 }
 0x545   :  { %3461 = vmatpush1.bf16.msra.mxu0 %v3302_v0  ;;  %7216 = vmatprep.mubr.bf16.mxu1 %v14182_v32 }
 0x546   :  { %v7308_v22 = vpop.permute.xlu1 %7307  ;;  %7939 = vrot.lane.b32.xlu0 %v10031_v49, %s11045_s26  ;;  %7937 = vrot.lane.b32.xlu1 %v10030_v5, %s11045_s26  ;;  %v7310_v30 = vpop.permute.xlu0 %7309 }
 0x547   :  { %v7323_v23 = vsel %vm2521_vm5, %v7306_v63, %v7308_v22  ;;  %v7324_v16 = vsel %vm2521_vm5, %v7308_v22, %v7310_v30  ;;  %v14203_v63 = vld [vmem:[#allocation7_spill] sm:$0xff]  ;;  %v9907_v22 = vcombine.high %v12487_v44, %v12487_v44 }
 0x548   :  { %v7338_v20 = vsel %vm504_vm6, %v7323_v23, 0  ;;  %9754 = vmatmul.mubr.msk.bf16.vlgmr.msra.gmra.mrb[40].mxu0 %vm692_vm11, %v13093_v18  ;;  %9997 = vmatprep.subr.msk.bf16.mxu1 %vm504_vm6, %v7324_v16  ;;  %v9886_v18 = vcombine.high %v12338_v60, %v12338_v60  ;;  %v10034_v60 = vcombine.low %v13227_v46, %v13227_v46  ;;  %v7908_v28 = vmul.bf16 %v12873_v43, %v14203_v63 }
 0x549   :  { %7362 = vmatpush1.bf16.msra.mxu1 %v7338_v20  ;;  %3502 = vmatprep.mubr.bf16.mxu0 %v14182_v32 }
 0x54a   :  { %v13218_v50 = vpop.permute.xlu1 %7278  ;;  %7910 = vrot.lane.b32.xlu0 %v12788_v17, %s11064_s17  ;;  %7941 = vrot.lane.b32.xlu1 %v10032_v38, %s11045_s26  ;;  %v13223_v14 = vpop.permute.xlu0 %7280  ;;  %v10036_v0 = vcombine.low %v7908_v28, %v7908_v28  ;;  %v14206_v38 = vld [vmem:[#allocation15_spill] sm:$0xff]  ;;  %v10037_v44 = vcombine.high %v7908_v28, %v7908_v28 }
 0x54c   :  { %9987 = vmatmul.mubr.msk.bf16.gmra.mrb[20].mxu1 %vm692_vm11, %v13110_v42 }
 0x54d   :  { %7393 = vmatprep.mubr.bf16.mxu1 %v14182_v32 }
 0x54e   :  { %v3603_v3 = vpop.permute.xlu1 %3602  ;;  %5608 = vrot.lane.b32.xlu0 %v9886_v18, %s11046_s27  ;;  %7912 = vrot.lane.b32.xlu1 %v12801_v35, %s11064_s17  ;;  %v7312_v17 = vpop.permute.xlu0 %7311 }
 0x54f   :  { %v3615_v62 = vsel %vm3610_vm10, %v14201_v27, %v3603_v3  ;;  %v3616_v45 = vsel %vm3610_vm10, %v3603_v3, %v14202_v56  ;;  %v7325_v16 = vsel %vm2521_vm5, %v7310_v30, %v7312_v17  ;;  %v14207_v3 = vld [vmem:[#allocation16_spill] sm:$0xff]  ;;  %vm14236_vm10 = vmmov %vm14234_vm8 }
 0x550   :  { %v3638_v5 = vsel %vm504_vm6, %v3615_v62, 0  ;;  %9755 = vmatmul.mubr.msk.bf16.gmra.mrb[44].mxu0 %vm692_vm11, %v13101_v25  ;;  %9771 = vmatprep.subr.msk.bf16.mxu0 %vm504_vm6, %v3616_v45  ;;  %v14205_v25 = vld [vmem:[#allocation6_spill] sm:$0xff]  ;;  %v8221_v27 = vmul.bf16 %v12763_v59, %v14207_v3  ;;  %v7344_v30 = vsel %vm504_vm6, %v7325_v16, 0  ;;  %v14208_v56 = vld [vmem:[#allocation8_spill] sm:$0xff] }
 0x551   :  { %3752 = vmatpush1.bf16.msra.mxu0 %v3638_v5  ;;  %3783 = vmatprep.mubr.bf16.mxu0 %v14182_v32  ;;  %v7909_v23 = vmul.bf16 %v12876_v6, %v14205_v25  ;;  %v14209_v59 = vld [vmem:[#allocation18_spill] sm:$0xff]  ;;  %v14210_v5 = vld [vmem:[#allocation9_spill] sm:$0xff] }
 0x552   :  { %7945 = vrot.lane.b32.xlu0 %v10034_v60, %s11045_s26  ;;  %7943 = vrot.lane.b32.xlu1 %v10033_v8, %s11045_s26  ;;  %v3945_v49 = vpop.permute.xlu0 %3944  ;;  %v8222_v8 = vmul.bf16 %v12781_v40, %v14209_v59  ;;  %v9930_v60 = vcombine.high %v12638_v53, %v12638_v53  ;;  %v10052_v63 = vcombine.high %v8221_v27, %v8221_v27  ;;  %v13303_v53 = vld [vmem:[%s14100_s3 + $0x4] ss:$8 sps:$4 sm:$0xff]  }
 0x553   :  { %v3958_v4 = vsel %vm3952_vm15, %v3945_v49, %v14204_v33  ;;  %v3957_v20 = vsel %vm3952_vm15, %v14206_v38, %v3945_v49  ;;  %v10038_v45 = vcombine.low %v7909_v23, %v7909_v23  ;;  %v14211_v49 = vld [vmem:[#allocation21_spill] sm:$0xff]  ;;  %v9972_v23 = vcombine.high %v12974_v10, %v12974_v10  ;;  %v11030_v10 = vld [vmem:[#allocation2 + $0x4] sm:$0xff] }
 0x554   :  { %9792 = vmatprep.subr.msk.bf16.mxu0 %vm504_vm6, %v3958_v4  ;;  %9998 = vmatmul.mubr.msk.bf16.vlgmr.msra.gmra.mrb[0].mxu1 %vm692_vm11, %v13218_v50  ;;  %v3980_v62 = vsel %vm504_vm6, %v3957_v20, 0  ;;  %v10053_v28 = vcombine.low %v8222_v8, %v8222_v8  ;;  %v10054_v40 = vcombine.high %v8222_v8, %v8222_v8  ;;  %v8223_v33 = vmul.bf16 %v12835_v41, %v14211_v49  ;;  %v14214_v38 = vld [vmem:[#allocation13_spill] sm:$0xff]  ;;  %v14215_v20 = vld [vmem:[#allocation23_spill] sm:$0xff] }
 0x555   :  { %7403 = vmatprep.mubr.bf16.mxu1 %v14182_v32  ;;  %v9951_v4 = vcombine.high %v12838_v57, %v12838_v57  ;;  %vm14238_vm15 = vcmask 801792  }
 0x556   :  { %v13265_v9 = vpop.permute.xlu1 %7313  ;;  %7949 = vrot.lane.b32.xlu0 %v10036_v0, %s11045_s26  ;;  %5948 = vrot.lane.b32.xlu1 %v9907_v22, %s11042_s15  ;;  %v14212_v0 = vld [vmem:[#allocation12_spill] sm:$0xff] }
 0x557   :  { %v7326_v18 = vsel %vm2521_vm5, %v7312_v17, %v13265_v9  ;;  %v10051_v17 = vcombine.low %v8221_v27, %v8221_v27  ;;  %v14213_v22 = vld [vmem:[#allocation24_spill] sm:$0xff]  ;;  %v9993_v27 = vcombine.high %v13079_v13, %v13079_v13  ;;  %v10014_v13 = vcombine.high %v13159_v37, %v13159_v37 }
 0x558   :  { %9772 = vmatmul.mubr.msk.bf16.vlgmr.msra.gmra.mrb[32].mxu0 %vm692_vm11, %v14208_v56  ;;  %10000 = vmatprep.subr.msk.bf16.mxu1 %vm504_vm6, %v7326_v18  ;;  %v8224_v25 = vmul.bf16 %v12873_v43, %v14213_v22  ;;  %v14216_v18 = vld [vmem:[#allocation27_spill] sm:$0xff] }
 0x559   :  { %4094 = vmatpush1.bf16.msra.mxu0 %v3980_v62  ;;  %7413 = vmatpush1.bf16.msra.mxu1 %v7344_v30  ;;  %v8537_v3 = vmul.bf16 %v11030_v10, %v14216_v18 }
 0x55a   :  { %7953 = vrot.lane.b32.xlu0 %v10038_v45, %s11045_s26  ;;  %7951 = vrot.lane.b32.xlu1 %v10037_v44, %s11045_s26  ;;  %v10057_v57 = vcombine.low %v8224_v25, %v8224_v25  ;;  %v10058_v16 = vcombine.high %v8224_v25, %v8224_v25  ;;  %v8225_v44 = vmul.bf16 %v12876_v6, %v14215_v20  ;;  %v11031_v45 = vld [vmem:[#allocation2 + $0xc] sm:$0xff]  ;;  %v14221_v20 = vld [vmem:[#allocation38_spill] sm:$0xff] }
 0x55b   :  { %3793 = vmatprep.mubr.bf16.mxu0 %v14182_v32  ;;  %v10072_v62 = vcombine.low %v8537_v3, %v8537_v3  ;;  %v10073_v56 = vcombine.high %v8537_v3, %v8537_v3  ;;  %v8853_v25 = vmul.bf16 %v11030_v10, %v12212_v47 }
 0x55c   :  { %9999 = vmatmul.mubr.msk.bf16.gmra.mrb[4].mxu1 %vm692_vm11, %v13223_v14  ;;  %v10059_v30 = vcombine.low %v8225_v44, %v8225_v44 }
 0x55d   :  { %7444 = vmatprep.mubr.bf16.mxu1 %v14182_v32 }
 0x55e   :  { %8253 = vrot.lane.b32.xlu0 %v10051_v17, %s11040_s22  ;;  %6295 = vrot.lane.b32.xlu1 %v9930_v60, %s11036_s16  ;;  %v14217_v17 = vld [vmem:[#allocation28_spill] sm:$0xff]  ;;  %v14218_v60 = vld [vmem:[#allocation30_spill] sm:$0xff] }
 0x55f   :  { %v8538_v59 = vmul.bf16 %v11031_v45, %v14217_v17 }
 0x560   :  { %9773 = vmatmul.mubr.msk.bf16.gmra.mrb[36].mxu0 %vm692_vm11, %v14210_v5 }
 0x561   :  { %4125 = vmatprep.mubr.bf16.mxu0 %v14182_v32  ;;  %v10074_v8 = vcombine.low %v8538_v59, %v8538_v59 }
 0x562   :  { %8257 = vrot.lane.b32.xlu0 %v10053_v28, %s11040_s22  ;;  %8255 = vrot.lane.b32.xlu1 %v10052_v63, %s11040_s22  ;;  %v8539_v63 = vmul.bf16 %v12835_v41, %v14218_v60  ;;  %v13351_v28 = vld [vmem:[%s14100_s3 + $0x14] ss:$0 sps:$4 sm:$0xff]   ;;  %v10035_v41 = vcombine.high %v13227_v46, %v13227_v46  ;;  %v8854_v46 = vmul.bf16 %v11031_v45, %v12231_v11  ;;  %v14223_v45 = vld [vmem:[#allocation25_spill] sm:$0xff] }
 0x564   :  { %10001 = vmatmul.mubr.msk.bf16.vlgmr.msra.gmra.mrb[8].mxu1 %vm692_vm11, %v13218_v50  ;;  %v10076_v5 = vcombine.low %v8539_v63, %v8539_v63  ;;  %v10077_v11 = vcombine.high %v8539_v63, %v8539_v63  ;;  %v11034_v63 = vld [vmem:[#allocation2 + $0x1c] sm:$0xff] }
 0x565   :  { %7454 = vmatprep.mubr.bf16.mxu1 %v14182_v32 }
 0x566   :  { %8228 = vrot.lane.b32.xlu0 %v12801_v35, %s11066_s29  ;;  %8226 = vrot.lane.b32.xlu1 %v13303_v53, %s11066_s29  ;;  %v10055_v35 = vcombine.low %v8223_v33, %v8223_v33 }
 0x568   :  { %9793 = vmatmul.mubr.msk.bf16.vlgmr.msra.gmra.mrb[32].mxu0 %vm692_vm11, %v14212_v0  ;;  %v14220_v0 = vld [vmem:[#allocation33_spill] sm:$0xff] }
 0x569   :  { %4135 = vmatprep.mubr.bf16.mxu0 %v14182_v32 }
 0x56a   :  { %8259 = vrot.lane.b32.xlu0 %v10054_v40, %s11040_s22  ;;  %6635 = vrot.lane.b32.xlu1 %v9951_v4, %s11039_s19  ;;  %v14219_v40 = vld [vmem:[#allocation34_spill] sm:$0xff]  ;;  %v10075_v4 = vcombine.high %v8538_v59, %v8538_v59 }
 0x56b   :  { %v8540_v49 = vmul.bf16 %v12873_v43, %v14219_v40 }
 0x56c   :  { %10002 = vmatmul.mubr.msk.bf16.gmra.mrb[12].mxu1 %vm692_vm11, %v13223_v14 }
 0x56d   :  { %7546 = vmatprep.mubr.bf16.mxu1 %v14182_v32  ;;  %v10078_v37 = vcombine.low %v8540_v49, %v8540_v49  ;;  %v10079_v22 = vcombine.high %v8540_v49, %v8540_v49 }
 0x56e   :  { %6975 = vrot.lane.b32.xlu0 %v9972_v23, %s11062_s12  ;;  %8261 = vrot.lane.b32.xlu1 %v10055_v35, %s11040_s22  ;;  %v8541_v35 = vmul.bf16 %v12876_v6, %v14220_v0  ;;  %v10056_v23 = vcombine.high %v8223_v33, %v8223_v33  ;;  %v10094_v6 = vcombine.high %v8853_v25, %v8853_v25  ;;  %v11033_v33 = vld [vmem:[#allocation2 + $0x14] sm:$0xff]  ;;  %v14226_v0 = vld [vmem:[#allocation39_spill] sm:$0xff] }
 0x56f   :  { %v8855_v44 = vmul.bf16 %v11033_v33, %v14221_v20 }
 0x570   :  { %9794 = vmatmul.mubr.msk.bf16.gmra.mrb[36].mxu0 %vm692_vm11, %v14214_v38  ;;  %v10080_v43 = vcombine.low %v8541_v35, %v8541_v35 }
 0x571   :  { %4467 = vmatprep.mubr.bf16.mxu0 %v14182_v32  ;;  %v10098_v60 = vcombine.high %v8855_v44, %v8855_v44 }
 0x572   :  { %8267 = vrot.lane.b32.xlu0 %v10058_v16, %s11040_s22  ;;  %8265 = vrot.lane.b32.xlu1 %v10057_v57, %s11040_s22  ;;  %v10093_v57 = vcombine.low %v8853_v25, %v8853_v25  ;;  %v10095_v16 = vcombine.low %v8854_v46, %v8854_v46 }
 0x576   :  { %7315 = vrot.lane.b32.xlu0 %v9993_v27, %s11059_s24  ;;  %8269 = vrot.lane.b32.xlu1 %v10059_v30, %s11040_s22  ;;  %v10096_v27 = vcombine.high %v8854_v46, %v8854_v46  ;;  %v4905_v46 = vld [vmem:[#allocation2 + $0x14] sm:$0xff] }
 0x57a   :  { %8571 = vrot.lane.b32.xlu0 %v10073_v56, %s11041_s30  ;;  %8569 = vrot.lane.b32.xlu1 %v10072_v62, %s11041_s30  ;;  %v14222_v62 = vld [vmem:[#allocation22_spill] sm:$0xff] }
 0x57e   :  { %8542 = vrot.lane.b32.xlu0 %v13303_v53, %s11067_s28  ;;  %8573 = vrot.lane.b32.xlu1 %v10074_v8, %s11041_s30 }
 0x582   :  { %7631 = vrot.lane.b32.xlu0 %v10014_v13, %s11051_s8  ;;  %8544 = vrot.lane.b32.xlu1 %v13351_v28, %s11067_s28  ;;  %v10097_v13 = vcombine.low %v8855_v44, %v8855_v44  ;;  %v14227_v44 = vld [vmem:[#allocation31_spill] sm:$0xff] }
 0x586   :  { %8577 = vrot.lane.b32.xlu0 %v10076_v5, %s11041_s30  ;;  %8575 = vrot.lane.b32.xlu1 %v10075_v4, %s11041_s30  ;;  %v14224_v5 = vld [vmem:[#allocation40_spill] sm:$0xff] }
 0x587   :  { %v8856_v40 = vmul.bf16 %v11034_v63, %v14224_v5  ;;  %v14230_v63 = vld [vmem:[#allocation26_spill] sm:$0xff] }
 0x589   :  { %v10100_v25 = vcombine.high %v8856_v40, %v8856_v40 }
 0x58a   :  { %8581 = vrot.lane.b32.xlu0 %v10078_v37, %s11041_s30  ;;  %7947 = vrot.lane.b32.xlu1 %v10035_v41, %s11045_s26  ;;  %v14225_v41 = vld [vmem:[#allocation19_spill] sm:$0xff]  ;;  %v11035_v37 = vld [vmem:[#allocation2 + $0x24] sm:$0xf] }
 0x58b   :  { %v8857_v35 = vmul.bf16 %v11035_v37, %v14226_v0 }
 0x58d   :  { %v10101_v20 = vcombine.low %v8857_v35, %v8857_v35  ;;  %v14231_v35 = vld [vmem:[#allocation29_spill] sm:$0xff] }
 0x58e   :  { %8585 = vrot.lane.b32.xlu0 %v10080_v43, %s11041_s30  ;;  %8583 = vrot.lane.b32.xlu1 %v10079_v22, %s11041_s30  ;;  %v10099_v22 = vcombine.low %v8856_v40, %v8856_v40 }
 0x592   :  { %8885 = vrot.lane.b32.xlu0 %v10093_v57, %s11044_s25  ;;  %8263 = vrot.lane.b32.xlu1 %v10056_v23, %s11040_s22 }
 0x596   :  { %8889 = vrot.lane.b32.xlu0 %v10095_v16, %s11044_s25  ;;  %8887 = vrot.lane.b32.xlu1 %v10094_v6, %s11044_s25 }
 0x598   :  { %v13373_v47 = vpop.permute.xlu1 %7317  ;;  %v7320_v38 = vpop.permute.xlu0 %7319 }
 0x599   :  { %v7329_v10 = vsel %vm2521_vm5, %v13373_v47, %v7320_v38 }
 0x59a   :  { %8860 = vrot.lane.b32.xlu0 %v13351_v28, %s11040_s22  ;;  %8858 = vrot.lane.b32.xlu1 %v13303_v53, %s11040_s22  ;;  %v7356_v8 = vsel %vm504_vm6, %v7329_v10, 0 }
 0x59c   :  { %v7322_v18 = vpop.permute.xlu1 %7321  ;;  %v4287_v3 = vpop.permute.xlu0 %4286 }
 0x59d   :  { %v7330_v30 = vsel %vm2521_vm5, %v7320_v38, %v7322_v18  ;;  %v4299_v56 = vsel %vm4294_vm3, %v14222_v62, %v4287_v3  ;;  %v4300_v17 = vsel %vm4294_vm3, %v4287_v3, %v14223_v45  ;;  %v4913_v38 = vmul.bf16 %v11651_v58, %v4905_v46  ;;  %v14228_v18 = vld [vmem:[#allocation32_spill] sm:$0xff]  ;;  %vm14242_vm3 = vmmov %vm14241_vm1 }
 0x59e   :  { %v4322_v59 = vsel %vm504_vm6, %v4299_v56, 0  ;;  %8891 = vrot.lane.b32.xlu0 %v10096_v27, %s11044_s25  ;;  %8579 = vrot.lane.b32.xlu1 %v10077_v11, %s11041_s30 }
 0x59f   :  { %9813 = vmatprep.subr.msk.bf16.mxu0 %vm504_vm6, %v4300_v17  ;;  %10006 = vmatprep.subr.msk.bf16.mxu1 %vm504_vm6, %v7330_v30  ;;  %v14229_v30 = vld [vmem:[#allocation20_spill] sm:$0xff]  ;;  %v9845_v58 = vcombine.high %v4913_v38, %v4913_v38  ;;  %v9844_v17 = vcombine.low %v4913_v38, %v4913_v38 }
 0x5a0   :  { %4436 = vmatpush1.bf16.msra.mxu0 %v4322_v59  ;;  %7515 = vmatpush1.bf16.msra.mxu1 %v7356_v8  ;;  %v7622_v49 = vpop.permute.xlu1 %7621  ;;  %v7624_v4 = vpop.permute.xlu0 %7623 }
 0x5a1   :  { %v7639_v43 = vsel %vm969_vm2, %v7622_v49, %v7624_v4  ;;  %v4958_v5 = vsel %vm504_vm6, %v9844_v17, 0 }
 0x5a2   :  { %8895 = vrot.lane.b32.xlu0 %v10098_v60, %s11044_s25  ;;  %8893 = vrot.lane.b32.xlu1 %v10097_v13, %s11044_s25  ;;  %v7654_v16 = vsel %vm504_vm6, %v7639_v43, 0  ;;  %v14232_v43 = vld [vmem:[#allocation41_spill] sm:$0xff] }
 0x5a3   :  { %9814 = vmatmul.mubr.msk.bf16.vlgmr.msra.gmra.mrb[32].mxu0 %vm692_vm11, %v14225_v41  ;;  %10007 = vmatmul.mubr.msk.bf16.vlgmr.msra.gmra.mrb[16].mxu1 %vm692_vm11, %v13218_v50 }
 0x5a4   :  { %v7626_v23 = vpop.permute.xlu1 %7625  ;;  %v13402_v57 = vpop.permute.xlu0 %7594  ;;  %4477 = vmatprep.mubr.bf16.mxu0 %v14182_v32  ;;  %7556 = vmatprep.mubr.bf16.mxu1 %v14182_v32 }
 0x5a5   :  { %v7640_v6 = vsel %vm969_vm2, %v7624_v4, %v7626_v23 }
 0x5a6   :  { %8899 = vrot.lane.b32.xlu0 %v10100_v25, %s11044_s25  ;;  %8897 = vrot.lane.b32.xlu1 %v10099_v22, %s11044_s25 }
 0x5a7   :  { %10018 = vmatprep.subr.msk.bf16.mxu1 %vm504_vm6, %v7640_v6 }
 0x5a8   :  { %7678 = vmatpush1.bf16.msra.mxu1 %v7654_v16  ;;  %v13412_v11 = vpop.permute.xlu1 %7596  ;;  %v4629_v33 = vpop.permute.xlu0 %4628 }
 0x5a9   :  { %v4641_v10 = vsel %vm4636_vm4, %v14227_v44, %v4629_v33  ;;  %v4642_v3 = vsel %vm4636_vm4, %v4629_v33, %v14228_v18  ;;  %v14233_v33 = vld [vmem:[#allocation35_spill] sm:$0xff]  ;;  %vm14243_vm4 = vcmask 523264  }
 0x5aa   :  { %v4664_v27 = vsel %vm504_vm6, %v4641_v10, 0  ;;  %8901 = vrot.lane.b32.xlu1 %v10101_v20, %s11044_s25  ;;  %9834 = vmatprep.subr.msk.bf16.mxu0 %vm504_vm6, %v4642_v3  ;;  %v14235_v10 = vld [vmem:[#allocation36_spill] sm:$0xff] }
 0x5ab   :  { %9815 = vmatmul.mubr.msk.bf16.gmra.mrb[36].mxu0 %vm692_vm11, %v14229_v30  ;;  %10008 = vmatmul.mubr.msk.bf16.gmra.mrb[20].mxu1 %vm692_vm11, %v13223_v14 }
 0x5ac   :  { %4778 = vmatpush1.bf16.msra.mxu0 %v4664_v27  ;;  %v7628_v62 = vpop.permute.xlu1 %7627  ;;  %v13425_v56 = vpop.permute.xlu0 %7629  ;;  %4809 = vmatprep.mubr.bf16.mxu0 %v14182_v32 }
 0x5ad   :  { %9854 = vmatprep.subr.msk.bf16.mxu0 %vm504_vm6, %v9845_v58  ;;  %v7642_v45 = vsel %vm969_vm2, %v7628_v62, %v13425_v56  ;;  %7709 = vmatprep.mubr.bf16.mxu1 %v14182_v32  ;;  %v7641_v59 = vsel %vm969_vm2, %v7626_v23, %v7628_v62 }
 0x5ae   :  { %10021 = vmatprep.subr.msk.bf16.mxu1 %vm504_vm6, %v7642_v45  ;;  %v7660_v60 = vsel %vm504_vm6, %v7641_v59, 0 }
 0x5b0   :  { %v13434_v8 = vpop.permute.xlu1 %7633  ;;  %v7636_v13 = vpop.permute.xlu0 %7635 }
 0x5b1   :  { %v7645_v25 = vsel %vm969_vm2, %v13434_v8, %v7636_v13 }
 0x5b2   :  { %v7672_v16 = vsel %vm504_vm6, %v7645_v25, 0 }
 0x5b3   :  { %9835 = vmatmul.mubr.msk.bf16.vlgmr.msra.gmra.mrb[32].mxu0 %vm692_vm11, %v14230_v63  ;;  %10019 = vmatmul.mubr.msk.bf16.vlgmr.msra.gmra.mrb[0].mxu1 %vm692_vm11, %v13402_v57 }
 0x5b4   :  { %5072 = vmatpush1.bf16.msra.mxu0 %v4958_v5  ;;  %7729 = vmatpush1.bf16.msra.mxu1 %v7660_v60  ;;  %v7638_v40 = vpop.permute.xlu1 %7637  ;;  %v5269_v49 = vpop.permute.xlu0 %5268 }
 0x5b5   :  { %v7646_v4 = vsel %vm969_vm2, %v7636_v13, %v7638_v40  ;;  %v5281_v41 = vsel %vm4573_vm0, %v5269_v49, %v12437_v1  ;;  %4819 = vmatprep.mubr.bf16.mxu0 %v14182_v32  ;;  %7719 = vmatprep.mubr.bf16.mxu1 %v14182_v32  ;;  %v5280_v23 = vsel %vm4573_vm0, %v14232_v43, %v5269_v49  ;;  %vm14240_vm0 = vmmov %vm14238_vm15 }
 0x5b6   :  { %9875 = vmatprep.subr.msk.bf16.mxu0 %vm504_vm6, %v5281_v41  ;;  %10027 = vmatprep.subr.msk.bf16.mxu1 %vm504_vm6, %v7646_v4  ;;  %v5303_v38 = vsel %vm504_vm6, %v5280_v23, 0 }
 0x5b8   :  { %v7940_v37 = vpop.permute.xlu0 %7939  ;;  %v7938_v0 = vpop.permute.xlu1 %7937 }
 0x5b9   :  { %v7955_v18 = vsel %vm14236_vm10, %v7938_v0, %v7940_v37  ;;  %vm14247_vm10 = vmmov %vm14243_vm4 }
 0x5ba   :  { %v7970_v58 = vsel %vm504_vm6, %v7955_v18, 0 }
 0x5bb   :  { %9836 = vmatmul.mubr.msk.bf16.gmra.mrb[36].mxu0 %vm692_vm11, %v14231_v35  ;;  %10020 = vmatmul.mubr.msk.bf16.gmra.mrb[4].mxu1 %vm692_vm11, %v13412_v11 }
 0x5bc   :  { %v13453_v22 = vpop.permute.xlu0 %7910  ;;  %5103 = vmatprep.mubr.bf16.mxu0 %v14182_v32  ;;  %7760 = vmatprep.mubr.bf16.mxu1 %v14182_v32  ;;  %v7942_v1 = vpop.permute.xlu1 %7941 }
 0x5bd   :  { %v7956_v20 = vsel %vm14234_vm8, %v7940_v37, %v7942_v1 }
 0x5c0   :  { %v5609_v46 = vpop.permute.xlu0 %5608  ;;  %v13470_v44 = vpop.permute.xlu1 %7912 }
 0x5c1   :  { %v5621_v6 = vsel %vm4231_vm13, %v5609_v46, %v12612_v34  ;;  %v5620_v3 = vsel %vm4231_vm13, %v12553_v39, %v5609_v46  ;;  %vm14239_vm13 = vmmov %vm14234_vm8 }
 0x5c2   :  { %v5643_v62 = vsel %vm504_vm6, %v5620_v3, 0  ;;  %vm14246_vm8 = vmmov %vm14243_vm4 }
 0x5c3   :  { %9855 = vmatmul.mubr.msk.bf16.vlgmr.msra.gmra.mrb[32].mxu0 %vm692_vm11, %v14233_v33  ;;  %10022 = vmatmul.mubr.msk.bf16.vlgmr.msra.gmra.mrb[8].mxu1 %vm692_vm11, %v13402_v57 }
 0x5c4   :  { %5417 = vmatpush1.bf16.msra.mxu0 %v5303_v38  ;;  %7831 = vmatpush1.bf16.msra.mxu1 %v7672_v16  ;;  %v7944_v34 = vpop.permute.xlu1 %7943  ;;  %v13485_v27 = vpop.permute.xlu0 %7945 }
 0x5c5   :  { %9896 = vmatprep.subr.msk.bf16.mxu0 %vm504_vm6, %v5621_v6  ;;  %10039 = vmatprep.subr.msk.bf16.mxu1 %vm504_vm6, %v7956_v20  ;;  %v7958_v45 = vsel %vm14237_vm14, %v7944_v34, %v13485_v27  ;;  %v7957_v59 = vsel %vm14239_vm13, %v7942_v1, %v7944_v34  ;;  %vm14249_vm14 = vcmask 515072   ;;  %vm14252_vm13 = vmmov %vm14241_vm1 }
 0x5c6   :  { %5113 = vmatprep.mubr.bf16.mxu0 %v14182_v32  ;;  %7770 = vmatprep.mubr.bf16.mxu1 %v14182_v32  ;;  %v7976_v63 = vsel %vm504_vm6, %v7957_v59, 0 }
 0x5c8   :  { %v5949_v30 = vpop.permute.xlu1 %5948  ;;  %v13501_v39 = vpop.permute.xlu0 %7949 }
 0x5c9   :  { %v5961_v17 = vsel %vm14238_vm15, %v5949_v30, %v12778_v55  ;;  %v5960_v13 = vsel %vm14240_vm0, %v12703_v29, %v5949_v30  ;;  %vm14254_vm0 = vmmov %vm14241_vm1 }
 0x5ca   :  { %v5983_v5 = vsel %vm504_vm6, %v5960_v13, 0 }
 0x5cb   :  { %9856 = vmatmul.mubr.msk.bf16.gmra.mrb[36].mxu0 %vm692_vm11, %v14235_v10  ;;  %10023 = vmatmul.mubr.msk.bf16.gmra.mrb[12].mxu1 %vm692_vm11, %v13412_v11 }
 0x5cc   :  { %5448 = vmatprep.mubr.bf16.mxu0 %v14182_v32  ;;  %7862 = vmatprep.mubr.bf16.mxu1 %v14182_v32  ;;  %v7954_v60 = vpop.permute.xlu0 %7953 }
 0x5d3   :  { %9876 = vmatmul.mubr.msk.bf16.vlgmr.msra.gmra.mrb[32].mxu0 %vm692_vm11, %v12356_v2  ;;  %10028 = vmatmul.mubr.msk.bf16.vlgmr.msra.gmra.mrb[16].mxu1 %vm692_vm11, %v13402_v57  ;;  %v7952_v2 = vpop.permute.xlu1 %7951 }
 0x5d4   :  { %5757 = vmatpush1.bf16.msra.mxu0 %v5643_v62  ;;  %7994 = vmatpush1.bf16.msra.mxu1 %v7970_v58  ;;  %v7961_v43 = vsel %vm14242_vm3, %v13501_v39, %v7952_v2  ;;  %vm14256_vm3 = vmmov %vm14243_vm4 }
 0x5d5   :  { %9917 = vmatprep.subr.msk.bf16.mxu0 %vm504_vm6, %v5961_v17  ;;  %10042 = vmatprep.subr.msk.bf16.mxu1 %vm504_vm6, %v7958_v45  ;;  %v7988_v6 = vsel %vm504_vm6, %v7961_v43, 0 }
 0x5d6   :  { %5458 = vmatprep.mubr.bf16.mxu0 %v14182_v32  ;;  %7872 = vmatprep.mubr.bf16.mxu1 %v14182_v32 }
 0x5d7   :  { %v6296_v55 = vpop.permute.xlu1 %6295 }
 0x5d8   :  { %v6308_v40 = vsel %vm3547_vm7, %v6296_v55, %v12928_v54  ;;  %v8254_v54 = vpop.permute.xlu0 %8253  ;;  %v6307_v23 = vsel %vm3547_vm7, %v12901_v48, %v6296_v55  ;;  %vm14244_vm7 = vmmov %vm14243_vm4 }
 0x5d9   :  { %v6330_v16 = vsel %vm504_vm6, %v6307_v23, 0 }
 0x5db   :  { %9877 = vmatmul.mubr.msk.bf16.gmra.mrb[36].mxu0 %vm692_vm11, %v12358_v15  ;;  %10029 = vmatmul.mubr.msk.bf16.gmra.mrb[20].mxu1 %vm692_vm11, %v13412_v11  ;;  %v7962_v15 = vsel %vm14241_vm1, %v7952_v2, %v7954_v60  ;;  %v8256_v49 = vpop.permute.xlu1 %8255 }
 0x5dc   :  { %5788 = vmatprep.mubr.bf16.mxu0 %v14182_v32  ;;  %8025 = vmatprep.mubr.bf16.mxu1 %v14182_v32  ;;  %v8258_v1 = vpop.permute.xlu0 %8257  ;;  %v8271_v18 = vsel %vm14244_vm7, %v8254_v54, %v8256_v49  ;;  %vm14258_vm7 = vmmov %vm14256_vm3 }
 0x5dd   :  { %v8272_v38 = vsel %vm14243_vm4, %v8256_v49, %v8258_v1  ;;  %v8286_v17 = vsel %vm504_vm6, %v8271_v18, 0 }
 0x5df   :  { %v13533_v37 = vpop.permute.xlu1 %8226 }
 0x5e0   :  { %v13558_v48 = vpop.permute.xlu0 %8228 }
 0x5e3   :  { %9897 = vmatmul.mubr.msk.bf16.vlgmr.msra.gmra.mrb[32].mxu0 %vm692_vm11, %v12511_v51  ;;  %10040 = vmatmul.mubr.msk.bf16.vlgmr.msra.gmra.mrb[0].mxu1 %vm692_vm11, %v13453_v22  ;;  %v6636_v46 = vpop.permute.xlu1 %6635 }
 0x5e4   :  { %6097 = vmatpush1.bf16.msra.mxu0 %v5983_v5  ;;  %8045 = vmatpush1.bf16.msra.mxu1 %v7976_v63  ;;  %v6648_v33 = vsel %vm3205_vm9, %v6636_v46, %v13042_v26  ;;  %v8260_v10 = vpop.permute.xlu0 %8259  ;;  %v6647_v3 = vsel %vm3205_vm9, %v13013_v36, %v6636_v46  ;;  %vm14245_vm9 = vmmov %vm14243_vm4 }
 0x5e5   :  { %9940 = vmatprep.subr.msk.bf16.mxu0 %vm504_vm6, %v6308_v40  ;;  %10048 = vmatprep.subr.msk.bf16.mxu1 %vm504_vm6, %v7962_v15  ;;  %v13523_v29 = vpop.f32.mrb[16].mxu0  ;;  %v6670_v2 = vsel %vm504_vm6, %v6647_v3, 0  ;;  %v8273_v60 = vsel %vm14246_vm8, %v8258_v1, %v8260_v10 }
 0x5e6   :  { %v13525_v4 = vpop.f32.mrb[17].mxu0  ;;  %5798 = vmatprep.mubr.bf16.mxu0 %v14182_v32  ;;  %8035 = vmatprep.mubr.bf16.mxu1 %v14182_v32  ;;  %v8292_v15 = vsel %vm504_vm6, %v8273_v60, 0 }
 0x5e7   :  { %v13529_v51 = vpop.f32.mrb[18].mxu0  ;;  %v13581_v30 = vpop.permute.xlu1 %8261 }
 0x5e8   :  { %v13531_v41 = vpop.f32.mrb[19].mxu0  ;;  %v6976_v62 = vpop.permute.xlu0 %6975  ;;  %v8274_v36 = vsel %vm14245_vm9, %v8260_v10, %v13581_v30  ;;  %vm14259_vm9 = vcmask 506880  }
 0x5e9   :  { %v6988_v59 = vsel %vm2863_vm12, %v6976_v62, %v13178_v12  ;;  %v6987_v63 = vsel %vm2863_vm12, %v13129_v7, %v6976_v62  ;;  %vm14248_vm12 = vmmov %vm14243_vm4 }
 0x5ea   :  { %v7010_v40 = vsel %vm504_vm6, %v6987_v63, 0 }
 0x5eb   :  { %9898 = vmatmul.mubr.msk.bf16.gmra.mrb[36].mxu0 %vm692_vm11, %v12517_v52  ;;  %10041 = vmatmul.mubr.msk.bf16.gmra.mrb[4].mxu1 %vm692_vm11, %v13470_v44  ;;  %v13601_v13 = vpop.permute.xlu1 %8265 }
 0x5ec   :  { %6128 = vmatprep.mubr.bf16.mxu0 %v14182_v32  ;;  %8076 = vmatprep.mubr.bf16.mxu1 %v14182_v32 }
 0x5ed   :  { %v13541_v0 = vpop.f32.mrb[20].mxu0 }
 0x5ee   :  { %v13543_v35 = vpop.f32.mrb[21].mxu0 }
 0x5ef   :  { %v3355_v25 = vpop.f32.mrb[22].mxu0  ;;  %v8270_v5 = vpop.permute.xlu1 %8269 }
 0x5f0   :  { %v3356_v52 = vpop.f32.mrb[23].mxu0 }
 0x5f3   :  { %9918 = vmatmul.mubr.msk.bf16.vlgmr.msra.gmra.mrb[32].mxu0 %vm692_vm11, %v12646_v31  ;;  %10043 = vmatmul.mubr.msk.bf16.vlgmr.msra.gmra.mrb[8].mxu1 %vm692_vm11, %v13453_v22 }
 0x5f4   :  { %6444 = vmatpush1.bf16.msra.mxu0 %v6330_v16  ;;  %8147 = vmatpush1.bf16.msra.mxu1 %v7988_v6 }
 0x5f5   :  { %9961 = vmatprep.subr.msk.bf16.mxu0 %vm504_vm6, %v6648_v33  ;;  %10060 = vmatprep.subr.msk.bf16.mxu1 %vm504_vm6, %v8272_v38 }
 0x5f6   :  { %6138 = vmatprep.mubr.bf16.mxu0 %v14182_v32  ;;  %8086 = vmatprep.mubr.bf16.mxu1 %v14182_v32 }
 0x5f8   :  { %v13564_v31 = vpop.f32.mrb[24].mxu0 }
 0x5f9   :  { %v13566_v20 = vpop.f32.mrb[25].mxu0 }
 0x5fa   :  { %v13568_v34 = vpop.f32.mrb[26].mxu0 }
 0x5fb   :  { %9919 = vmatmul.mubr.msk.bf16.gmra.mrb[36].mxu0 %vm692_vm11, %v12670_v61  ;;  %10044 = vmatmul.mubr.msk.bf16.gmra.mrb[12].mxu1 %vm692_vm11, %v13470_v44  ;;  %v13574_v26 = vpop.f32.mrb[27].mxu0 }
 0x5fc   :  { %6475 = vmatprep.mubr.bf16.mxu0 %v14182_v32  ;;  %8178 = vmatprep.mubr.bf16.mxu1 %v14182_v32 }
 0x600   :  { %v13583_v58 = vpop.f32.mrb[28].mxu0 }
 0x601   :  { %v13585_v61 = vpop.f32.mrb[29].mxu0 }
 0x602   :  { %v3406_v45 = vpop.f32.mrb[30].mxu0 }
 0x603   :  { %9941 = vmatmul.mubr.msk.bf16.vlgmr.msra.gmra.mrb[32].mxu0 %vm692_vm11, %v13303_v53  ;;  %10049 = vmatmul.mubr.msk.bf16.vlgmr.msra.gmra.mrb[16].mxu1 %vm692_vm11, %v13453_v22  ;;  %v3407_v55 = vpop.f32.mrb[31].mxu0  ;;  %v8268_v53 = vpop.permute.xlu0 %8267 }
 0x604   :  { %6784 = vmatpush1.bf16.msra.mxu0 %v6670_v2  ;;  %8310 = vmatpush1.bf16.msra.mxu1 %v8286_v17  ;;  %v8277_v52 = vsel %vm14248_vm12, %v13601_v13, %v8268_v53 }
 0x605   :  { %9982 = vmatprep.subr.msk.bf16.mxu0 %vm504_vm6, %v6988_v59  ;;  %10063 = vmatprep.subr.msk.bf16.mxu1 %vm504_vm6, %v8274_v36  ;;  %v8304_v6 = vsel %vm504_vm6, %v8277_v52, 0 }
 0x606   :  { %6485 = vmatprep.mubr.bf16.mxu0 %v14182_v32  ;;  %8188 = vmatprep.mubr.bf16.mxu1 %v14182_v32 }
 0x607   :  { %v7316_v12 = vpop.permute.xlu0 %7315 }
 0x608   :  { %v7328_v49 = vsel %vm2521_vm5, %v7316_v12, %v13373_v47 }
 0x60b   :  { %9942 = vmatmul.mubr.msk.bf16.gmra.mrb[36].mxu0 %vm692_vm11, %v13351_v28  ;;  %10050 = vmatmul.mubr.msk.bf16.gmra.mrb[20].mxu1 %vm692_vm11, %v13470_v44  ;;  %v8278_v28 = vsel %vm14247_vm10, %v8268_v53, %v8270_v5  ;;  %v8572_v54 = vpop.permute.xlu0 %8571  ;;  %vm14261_vm10 = vmmov %vm14259_vm9 }
 0x60c   :  { %6815 = vmatprep.mubr.bf16.mxu0 %v14182_v32  ;;  %8341 = vmatprep.mubr.bf16.mxu1 %v14182_v32 }
 0x60f   :  { %v13625_v7 = vpop.permute.xlu0 %8542 }
 0x613   :  { %9962 = vmatmul.mubr.msk.bf16.vlgmr.msra.gmra.mrb[32].mxu0 %vm692_vm11, %v12983_v19  ;;  %10061 = vmatmul.mubr.msk.bf16.vlgmr.msra.gmra.mrb[0].mxu1 %vm692_vm11, %v13533_v37  ;;  %v8570_v19 = vpop.permute.xlu1 %8569  ;;  %v7632_v46 = vpop.permute.xlu0 %7631 }
 0x614   :  { %7124 = vmatpush1.bf16.msra.mxu0 %v7010_v40  ;;  %8361 = vmatpush1.bf16.msra.mxu1 %v8292_v15  ;;  %v7644_v10 = vsel %vm969_vm2, %v7632_v46, %v13434_v8  ;;  %v7643_v45 = vsel %vm969_vm2, %v13425_v56, %v7632_v46 }
 0x615   :  { %10003 = vmatprep.subr.msk.bf16.mxu0 %vm504_vm6, %v7328_v49  ;;  %10069 = vmatprep.subr.msk.bf16.mxu1 %vm504_vm6, %v8278_v28  ;;  %v7666_v36 = vsel %vm504_vm6, %v7643_v45, 0 }
 0x616   :  { %6825 = vmatprep.mubr.bf16.mxu0 %v14182_v32  ;;  %8351 = vmatprep.mubr.bf16.mxu1 %v14182_v32 }
 0x617   :  { %v8574_v23 = vpop.permute.xlu1 %8573  ;;  %v13673_v17 = vpop.permute.xlu0 %8577 }
 0x618   :  { %v8588_v33 = vsel %vm14249_vm14, %v8572_v54, %v8574_v23 }
 0x61b   :  { %9963 = vmatmul.mubr.msk.bf16.gmra.mrb[36].mxu0 %vm692_vm11, %v12990_v24  ;;  %10062 = vmatmul.mubr.msk.bf16.gmra.mrb[4].mxu1 %vm692_vm11, %v13558_v48  ;;  %v13631_v47 = vpop.f32.mrb[40].mxu0  ;;  %v7327_v24 = vsel %vm2521_vm5, %v13265_v9, %v7316_v12  ;;  %v13658_v18 = vpop.permute.xlu1 %8544  ;;  %vm14250_vm5 = vmmov %vm14249_vm14 }
 0x61c   :  { %v13633_v1 = vpop.f32.mrb[41].mxu0  ;;  %7155 = vmatprep.mubr.bf16.mxu0 %v14182_v32  ;;  %8392 = vmatprep.mubr.bf16.mxu1 %v14182_v32  ;;  %v7350_v16 = vsel %vm504_vm6, %v7327_v24, 0  ;;  %v8587_v8 = vsel %vm14250_vm5, %v8570_v19, %v8572_v54  ;;  %vm14251_vm15 = vmmov %vm14250_vm5  ;;  %v8582_v56 = vpop.permute.xlu0 %8581 }
 0x61d   :  { %v13637_v25 = vpop.f32.mrb[42].mxu0  ;;  %v8602_v55 = vsel %vm504_vm6, %v8587_v8, 0  ;;  %vm14253_vm2 = vmmov %vm14250_vm5 }
 0x61e   :  { %v13639_v43 = vpop.f32.mrb[43].mxu0  ;;  %vm14255_vm1 = vmmov %vm14253_vm2 }
 0x61f   :  { %v8576_v62 = vpop.permute.xlu1 %8575  ;;  %vm14257_vm4 = vmmov %vm14255_vm1 }
 0x620   :  { %v8589_v53 = vsel %vm14253_vm2, %v8574_v23, %v8576_v62  ;;  %v8586_v60 = vpop.permute.xlu0 %8585  ;;  %vm14260_vm8 = vmmov %vm14255_vm1 }
 0x621   :  { %v8608_v63 = vsel %vm504_vm6, %v8589_v53, 0  ;;  %vm14262_vm12 = vmmov %vm14255_vm1 }
 0x622   :  { %vm14263_vm14 = vmmov %vm14259_vm9 }
 0x623   :  { %9983 = vmatmul.mubr.msk.bf16.vlgmr.msra.gmra.mrb[32].mxu0 %vm692_vm11, %v13103_v21  ;;  %10064 = vmatmul.mubr.msk.bf16.vlgmr.msra.gmra.mrb[8].mxu1 %vm692_vm11, %v13533_v37  ;;  %v13651_v38 = vpop.f32.mrb[44].mxu0  ;;  %v7948_v2 = vpop.permute.xlu1 %7947  ;;  %vm14264_vm5 = vmmov %vm14259_vm9 }
 0x624   :  { %7464 = vmatpush1.bf16.msra.mxu0 %v7350_v16  ;;  %8463 = vmatpush1.bf16.msra.mxu1 %v8304_v6  ;;  %v13656_v9 = vpop.f32.mrb[45].mxu0  ;;  %v7960_v59 = vsel %vm14252_vm13, %v7948_v2, %v13501_v39  ;;  %v7959_v12 = vsel %vm14254_vm0, %v13485_v27, %v7948_v2  ;;  %vm14266_vm13 = vmmov %vm14264_vm5 }
 0x625   :  { %10024 = vmatprep.subr.msk.bf16.mxu0 %vm504_vm6, %v7644_v10  ;;  %10081 = vmatprep.subr.msk.bf16.mxu1 %vm504_vm6, %v8588_v33  ;;  %v3508_v21 = vpop.f32.mrb[46].mxu0  ;;  %v7982_v5 = vsel %vm504_vm6, %v7959_v12, 0  ;;  %vm14267_vm2 = vmmov %vm14264_vm5 }
 0x626   :  { %v3509_v3 = vpop.f32.mrb[47].mxu0  ;;  %7165 = vmatprep.mubr.bf16.mxu0 %v14182_v32  ;;  %8402 = vmatprep.mubr.bf16.mxu1 %v14182_v32  ;;  %vm14268_vm0 = vmmov %vm14267_vm2 }
 0x62b   :  { %9984 = vmatmul.mubr.msk.bf16.gmra.mrb[36].mxu0 %vm692_vm11, %v13110_v42  ;;  %10065 = vmatmul.mubr.msk.bf16.gmra.mrb[12].mxu1 %vm692_vm11, %v13558_v48  ;;  %v8590_v42 = vsel %vm14251_vm15, %v8576_v62, %v13673_v17  ;;  %vm14265_vm15 = vmmov %vm14264_vm5 }
 0x62c   :  { %7495 = vmatprep.mubr.bf16.mxu0 %v14182_v32  ;;  %8494 = vmatprep.mubr.bf16.mxu1 %v14182_v32 }
 0x633   :  { %10004 = vmatmul.mubr.msk.bf16.vlgmr.msra.gmra.mrb[32].mxu0 %vm692_vm11, %v13218_v50  ;;  %10070 = vmatmul.mubr.msk.bf16.vlgmr.msra.gmra.mrb[16].mxu1 %vm692_vm11, %v13533_v37  ;;  %v8584_v50 = vpop.permute.xlu1 %8583 }
 0x634   :  { %7780 = vmatpush1.bf16.msra.mxu0 %v7666_v36  ;;  %8626 = vmatpush1.bf16.msra.mxu1 %v8602_v55 }
 0x635   :  { %10045 = vmatprep.subr.msk.bf16.mxu0 %vm504_vm6, %v7960_v59  ;;  %10084 = vmatprep.subr.msk.bf16.mxu1 %vm504_vm6, %v8590_v42 }
 0x636   :  { %7505 = vmatprep.mubr.bf16.mxu0 %v14182_v32  ;;  %8504 = vmatprep.mubr.bf16.mxu1 %v14182_v32 }
 0x637   :  { %v8264_v39 = vpop.permute.xlu1 %8263 }
 0x638   :  { %v8276_v15 = vsel %vm14256_vm3, %v8264_v39, %v13601_v13  ;;  %v8593_v13 = vsel %vm14257_vm4, %v8582_v56, %v8584_v50  ;;  %v8275_v28 = vsel %vm14258_vm7, %v13581_v30, %v8264_v39 }
 0x639   :  { %v8620_v19 = vsel %vm504_vm6, %v8593_v13, 0  ;;  %v8298_v23 = vsel %vm504_vm6, %v8275_v28, 0 }
 0x63b   :  { %10005 = vmatmul.mubr.msk.bf16.gmra.mrb[36].mxu0 %vm692_vm11, %v13223_v14  ;;  %10071 = vmatmul.mubr.msk.bf16.gmra.mrb[20].mxu1 %vm692_vm11, %v13558_v48  ;;  %v8594_v14 = vsel %vm14255_vm1, %v8584_v50, %v8586_v60  ;;  %v8888_v40 = vpop.permute.xlu1 %8887 }
 0x63c   :  { %7811 = vmatprep.mubr.bf16.mxu0 %v14182_v32  ;;  %8657 = vmatprep.mubr.bf16.mxu1 %v14182_v32 }
 0x63f   :  { %v13711_v27 = vpop.permute.xlu1 %8858 }
 0x643   :  { %10025 = vmatmul.mubr.msk.bf16.vlgmr.msra.gmra.mrb[32].mxu0 %vm692_vm11, %v13402_v57  ;;  %10082 = vmatmul.mubr.msk.bf16.vlgmr.msra.gmra.mrb[0].mxu1 %vm692_vm11, %v13625_v7  ;;  %v8886_v57 = vpop.permute.xlu0 %8885  ;;  %v8580_v54 = vpop.permute.xlu1 %8579 }
 0x644   :  { %8096 = vmatpush1.bf16.msra.mxu0 %v7982_v5  ;;  %8677 = vmatpush1.bf16.msra.mxu1 %v8608_v63  ;;  %v8592_v52 = vsel %vm14260_vm8, %v8580_v54, %v8582_v56  ;;  %v8903_v46 = vsel %vm14261_vm10, %v8886_v57, %v8888_v40  ;;  %v8591_v6 = vsel %vm14262_vm12, %v13673_v17, %v8580_v54 }
 0x645   :  { %10066 = vmatprep.subr.msk.bf16.mxu0 %vm504_vm6, %v8276_v15  ;;  %10090 = vmatprep.subr.msk.bf16.mxu1 %vm504_vm6, %v8594_v14  ;;  %v8918_v33 = vsel %vm504_vm6, %v8903_v46, 0  ;;  %v8614_v10 = vsel %vm504_vm6, %v8591_v6, 0 }
 0x646   :  { %7821 = vmatprep.mubr.bf16.mxu0 %v14182_v32  ;;  %8667 = vmatprep.mubr.bf16.mxu1 %v14182_v32 }
 0x647   :  { %v8890_v49 = vpop.permute.xlu0 %8889  ;;  %v8894_v24 = vpop.permute.xlu1 %8893 }
 0x64b   :  { %10026 = vmatmul.mubr.msk.bf16.gmra.mrb[36].mxu0 %vm692_vm11, %v13412_v11  ;;  %10083 = vmatmul.mubr.msk.bf16.gmra.mrb[4].mxu1 %vm692_vm11, %v13658_v18  ;;  %v8904_v11 = vsel %vm14259_vm9, %v8888_v40, %v8890_v49  ;;  %v8861_v30 = vpop.permute.xlu0 %8860  ;;  %v8898_v16 = vpop.permute.xlu1 %8897 }
 0x64c   :  { %8127 = vmatprep.mubr.bf16.mxu0 %v14182_v32  ;;  %8708 = vmatprep.mubr.bf16.mxu1 %v14182_v32 }
 0x64f   :  { %v8902_v8 = vpop.permute.xlu1 %8901 }
 0x653   :  { %10046 = vmatmul.mubr.msk.bf16.vlgmr.msra.gmra.mrb[32].mxu0 %vm692_vm11, %v13453_v22  ;;  %10085 = vmatmul.mubr.msk.bf16.vlgmr.msra.gmra.mrb[8].mxu1 %vm692_vm11, %v13625_v7  ;;  %v8892_v22 = vpop.permute.xlu0 %8891 }
 0x654   :  { %8412 = vmatpush1.bf16.msra.mxu0 %v8298_v23  ;;  %8779 = vmatpush1.bf16.msra.mxu1 %v8620_v19 }
 0x655   :  { %10087 = vmatprep.subr.msk.bf16.mxu0 %vm504_vm6, %v8592_v52  ;;  %10102 = vmatprep.subr.msk.bf16.mxu1 %vm504_vm6, %v8904_v11 }
 0x656   :  { %8137 = vmatprep.mubr.bf16.mxu0 %v14182_v32  ;;  %8718 = vmatprep.mubr.bf16.mxu1 %v14182_v32 }
 0x657   :  { %v8896_v21 = vpop.permute.xlu0 %8895 }
 0x658   :  { %v8908_v3 = vsel %vm14264_vm5, %v8896_v21, %v8898_v16  ;;  %v8907_v62 = vsel %vm14266_vm13, %v8894_v24, %v8896_v21 }
 0x659   :  { %v8930_v17 = vsel %vm504_vm6, %v8907_v62, 0 }
 0x65b   :  { %10047 = vmatmul.mubr.msk.bf16.gmra.mrb[36].mxu0 %vm692_vm11, %v13470_v44  ;;  %10086 = vmatmul.mubr.msk.bf16.gmra.mrb[12].mxu1 %vm692_vm11, %v13658_v18  ;;  %v8906_v44 = vsel %vm14263_vm14, %v8892_v22, %v8894_v24  ;;  %v8900_v2 = vpop.permute.xlu0 %8899 }
 0x65c   :  { %8443 = vmatprep.mubr.bf16.mxu0 %v14182_v32  ;;  %8810 = vmatprep.mubr.bf16.mxu1 %v14182_v32 }
 0x663   :  { %10067 = vmatmul.mubr.msk.bf16.vlgmr.msra.gmra.mrb[32].mxu0 %vm692_vm11, %v13533_v37  ;;  %10091 = vmatmul.mubr.msk.bf16.vlgmr.msra.gmra.mrb[16].mxu1 %vm692_vm11, %v13625_v7  ;;  %v8905_v37 = vsel %vm14265_vm15, %v8890_v49, %v8892_v22 }
 0x664   :  { %8728 = vmatpush1.bf16.msra.mxu0 %v8614_v10  ;;  %8942 = vmatpush1.bf16.msra.mxu1 %v8918_v33  ;;  %v8924_v45 = vsel %vm504_vm6, %v8905_v37, 0 }
 0x665   :  { %10105 = vmatprep.subr.msk.bf16.mxu1 %vm504_vm6, %v8906_v44  ;;  %10108 = vmatprep.subr.msk.bf16.mxu0 %vm504_vm6, %v8908_v3 }
 0x666   :  { %8453 = vmatprep.mubr.bf16.mxu0 %v14182_v32  ;;  %8820 = vmatprep.mubr.bf16.mxu1 %v14182_v32 }
 0x66b   :  { %10068 = vmatmul.mubr.msk.bf16.gmra.mrb[36].mxu0 %vm692_vm11, %v13558_v48  ;;  %10092 = vmatmul.mubr.msk.bf16.gmra.mrb[20].mxu1 %vm692_vm11, %v13658_v18  ;;  %v8910_v48 = vsel %vm14267_vm2, %v8900_v2, %v8902_v8 }
 0x66c   :  { %8759 = vmatprep.mubr.bf16.mxu0 %v14182_v32  ;;  %8973 = vmatprep.mubr.bf16.mxu1 %v14182_v32 }
 0x673   :  { %10088 = vmatmul.mubr.msk.bf16.vlgmr.msra.gmra.mrb[32].mxu0 %vm692_vm11, %v13625_v7  ;;  %10103 = vmatmul.mubr.msk.bf16.vlgmr.msra.gmra.mrb[0].mxu1 %vm692_vm11, %v13711_v27  ;;  %v8909_v7 = vsel %vm14268_vm0, %v8898_v16, %v8900_v2 }
 0x674   :  { %8993 = vmatpush1.bf16.msra.mxu1 %v8924_v45  ;;  %9044 = vmatpush1.bf16.msra.mxu0 %v8930_v17  ;;  %v8936_v55 = vsel %vm504_vm6, %v8909_v7, 0 }
 0x675   :  { %10111 = vmatprep.subr.msk.bf16.mxu1 %vm504_vm6, %v8910_v48  ;;  %8769 = vmatprep.mubr.bf16.mxu0 %v14182_v32 }
 0x676   :  { %8983 = vmatprep.mubr.bf16.mxu1 %v14182_v32 }
 0x67b   :  { %10089 = vmatmul.mubr.msk.bf16.gmra.mrb[36].mxu0 %vm692_vm11, %v13658_v18  ;;  %10104 = vmatmul.mubr.msk.bf16.gmra.mrb[4].mxu1 %vm692_vm11, %v8861_v30 }
 0x67c   :  { %9024 = vmatprep.mubr.bf16.mxu1 %v14182_v32  ;;  %9075 = vmatprep.mubr.bf16.mxu0 %v14182_v32 }
 0x683   :  { %10106 = vmatmul.mubr.msk.bf16.vlgmr.msra.gmra.mrb[8].mxu1 %vm692_vm11, %v13711_v27  ;;  %10109 = vmatmul.mubr.msk.bf16.vlgmr.msra.gmra.mrb[32].mxu0 %vm692_vm11, %v13711_v27 }
 0x684   :  { %9095 = vmatpush1.bf16.msra.mxu1 %v8936_v55  ;;  %9034 = vmatprep.mubr.bf16.mxu1 %v14182_v32 }
 0x685   :  { %9085 = vmatprep.mubr.bf16.mxu0 %v14182_v32 }
 0x68b   :  { %10107 = vmatmul.mubr.msk.bf16.gmra.mrb[12].mxu1 %vm692_vm11, %v8861_v30  ;;  %10110 = vmatmul.mubr.msk.bf16.gmra.mrb[36].mxu0 %vm692_vm11, %v8861_v30 }
 0x68c   :  { %9126 = vmatprep.mubr.bf16.mxu1 %v14182_v32 }
 0x693   :  { %10112 = vmatmul.mubr.msk.bf16.vlgmr.msra.gmra.mrb[16].mxu1 %vm692_vm11, %v13711_v27 }
 0x694   :  { %9136 = vmatprep.mubr.bf16.mxu1 %v14182_v32 }
 0x69b   :  { %10113 = vmatmul.mubr.msk.bf16.gmra.mrb[20].mxu1 %vm692_vm11, %v8861_v30 }
 0x746   :  { %v8975_v18 = vpop.f32.mrb[0].mxu1 }
 0x747   :  { %v13794_v36 = vadd.f32 %v8975_v18, %v13523_v29  ;;  %v8977_v42 = vpop.f32.mrb[1].mxu1 }
 0x748   :  { %v13797_v59 = vadd.f32 %v8977_v42, %v13525_v4  ;;  %v8979_v50 = vpop.f32.mrb[2].mxu1 }
 0x749   :  { %v13800_v56 = vadd.f32 %v8979_v50, %v13529_v51  ;;  %v8981_v39 = vpop.f32.mrb[3].mxu1  ;;  %v9196_v4 = vmul.f32 %v13794_v36, %v13794_v36 }
 0x74a   :  { %v13803_v53 = vadd.f32 %v8981_v39, %v13531_v41  ;;  %v9197_v51 = vmul.f32 %v13797_v59, %v13797_v59 }
 0x74b   :  { %v9204_v41 = vmul.f32 %v13800_v56, %v13800_v56 }
 0x74c   :  { %v9205_v14 = vmul.f32 %v13803_v53, %v13803_v53  ;;  %v9220_v13 = vadd.f32 %v9197_v51, %v9196_v4  ;;  %v9178_v19 = vadd.f32 %v13803_v53, %v13800_v56 }
 0x74e   :  { %v8985_v12 = vpop.f32.mrb[4].mxu1  ;;  %v9229_v24 = vadd.f32 %v9205_v14, %v9204_v41 }
 0x74f   :  { %v13806_v32 = vadd.f32 %v8985_v12, %v13541_v0  ;;  %v8987_v60 = vpop.f32.mrb[5].mxu1 }
 0x750   :  { %v13809_v29 = vadd.f32 %v8987_v60, %v13543_v35  ;;  %v8989_v63 = vpop.f32.mrb[6].mxu1  ;;  %v9169_v35 = vadd.f32 %v13797_v59, %v13794_v36 }
 0x751   :  { %v8990_v5 = vpop.f32.mrb[7].mxu1  ;;  %v9212_v37 = vmul.f32 %v13806_v32, %v13806_v32 }
 0x752   :  { %v9213_v62 = vmul.f32 %v13809_v29, %v13809_v29  ;;  %v9187_v39 = vadd.f32 %v13809_v29, %v13806_v32 }
 0x756   :  { %v9026_v0 = vpop.f32.mrb[8].mxu1  ;;  %v13819_v15 = vpop.f32.mrb[32].mxu0 }
 0x757   :  { %v13824_v40 = vadd.f32 %v9026_v0, %v13564_v31  ;;  %v9028_v57 = vpop.f32.mrb[9].mxu1  ;;  %v13826_v27 = vpop.f32.mrb[33].mxu0 }
 0x758   :  { %v13829_v28 = vadd.f32 %v9028_v57, %v13566_v20  ;;  %v9030_v49 = vpop.f32.mrb[10].mxu1  ;;  %v13831_v54 = vpop.f32.mrb[34].mxu0  ;;  %v9201_v8 = vmul.f32 %v13826_v27, %v13826_v27  ;;  %v9238_v57 = vadd.f32 %v9213_v62, %v9212_v37 }
 0x759   :  { %v9170_v23 = vadd.f32 %v13824_v40, %v9169_v35  ;;  %v9198_v11 = vmul.f32 %v13824_v40, %v13824_v40  ;;  %v13839_v31 = vadd.f32 %v9030_v49, %v13568_v34  ;;  %v9032_v52 = vpop.f32.mrb[11].mxu1  ;;  %v13841_v30 = vpop.f32.mrb[35].mxu0  ;;  %v9200_v34 = vmul.f32 %v13819_v15, %v13819_v15 }
 0x75a   :  { %v9199_v20 = vmul.f32 %v13829_v28, %v13829_v28  ;;  %v13846_v22 = vadd.f32 %v9032_v52, %v13574_v26  ;;  %v9208_v45 = vmul.f32 %v13831_v54, %v13831_v54  ;;  %v9209_v41 = vmul.f32 %v13841_v30, %v13841_v30 }
 0x75b   :  { %v9221_v46 = vadd.f32 %v9220_v13, %v9198_v11  ;;  %v9171_v6 = vadd.f32 %v13829_v28, %v9170_v23  ;;  %v9179_v16 = vadd.f32 %v13839_v31, %v9178_v19  ;;  %v9206_v33 = vmul.f32 %v13839_v31, %v13839_v31 }
 0x75c   :  { %v9207_v10 = vmul.f32 %v13846_v22, %v13846_v22 }
 0x75d   :  { %v9222_v21 = vadd.f32 %v9221_v46, %v9199_v20  ;;  %v9172_v44 = vadd.f32 %v9171_v6, %v13819_v15  ;;  %v9230_v3 = vadd.f32 %v9229_v24, %v9206_v33  ;;  %v9180_v26 = vadd.f32 %v13846_v22, %v9179_v16 }
 0x75e   :  { %v9036_v17 = vpop.f32.mrb[12].mxu1  ;;  %v13866_v2 = vpop.f32.mrb[36].mxu0 }
 0x75f   :  { %v9173_v48 = vadd.f32 %v9172_v44, %v13826_v27  ;;  %v9223_v7 = vadd.f32 %v9222_v21, %v9200_v34  ;;  %v9231_v55 = vadd.f32 %v9230_v3, %v9207_v10  ;;  %v9181_v18 = vadd.f32 %v9180_v26, %v13831_v54  ;;  %v9038_v42 = vpop.f32.mrb[13].mxu1  ;;  %v13870_v50 = vpop.f32.mrb[37].mxu0 }
 0x760   :  { %v13875_v12 = vadd.f32 %v9036_v17, %v13583_v58  ;;  %v13878_v60 = vadd.f32 %v9038_v42, %v13585_v61  ;;  %v9040_v63 = vpop.f32.mrb[14].mxu1  ;;  %v9091_v5 = vpop.f32.mrb[38].mxu0  ;;  %v9216_v11 = vmul.f32 %v13866_v2, %v13866_v2  ;;  %v9217_v33 = vmul.f32 %v13870_v50, %v13870_v50 }
 0x761   :  { %v9224_v4 = vadd.f32 %v9223_v7, %v9201_v8  ;;  %v9182_v51 = vadd.f32 %v9181_v18, %v13841_v30  ;;  %v9232_v14 = vadd.f32 %v9231_v55, %v9208_v45  ;;  %v9041_v0 = vpop.f32.mrb[15].mxu1  ;;  %v9092_v35 = vpop.f32.mrb[39].mxu0 }
 0x762   :  { %v9188_v13 = vadd.f32 %v13875_v12, %v9187_v39  ;;  %v9214_v58 = vmul.f32 %v13875_v12, %v13875_v12  ;;  %v9215_v61 = vmul.f32 %v13878_v60, %v13878_v60 }
 0x763   :  { %v9233_v49 = vadd.f32 %v9232_v14, %v9209_v41 }
 0x764   :  { %v9239_v19 = vadd.f32 %v9238_v57, %v9214_v58  ;;  %v9189_v23 = vadd.f32 %v13878_v60, %v9188_v13 }
 0x766   :  { %v9240_v52 = vadd.f32 %v9239_v19, %v9215_v61  ;;  %v9190_v24 = vadd.f32 %v9189_v23, %v13866_v2  ;;  %v9128_v20 = vpop.f32.mrb[16].mxu1 }
 0x767   :  { %v13893_v46 = vadd.f32 %v9128_v20, %v13631_v47  ;;  %v9130_v6 = vpop.f32.mrb[17].mxu1 }
 0x768   :  { %v9191_v16 = vadd.f32 %v9190_v24, %v13870_v50  ;;  %v9241_v34 = vadd.f32 %v9240_v52, %v9216_v11  ;;  %v13899_v10 = vadd.f32 %v9130_v6, %v13633_v1  ;;  %v9132_v21 = vpop.f32.mrb[18].mxu1 }
 0x769   :  { %v13902_v44 = vadd.f32 %v9132_v21, %v13637_v25  ;;  %v9134_v3 = vpop.f32.mrb[19].mxu1  ;;  %v9202_v18 = vmul.f32 %v13893_v46, %v13893_v46 }
 0x76a   :  { %v9242_v26 = vadd.f32 %v9241_v34, %v9217_v33  ;;  %v13905_v37 = vadd.f32 %v9134_v3, %v13639_v43  ;;  %v9203_v14 = vmul.f32 %v13899_v10, %v13899_v10 }
 0x76b   :  { %v9183_v47 = vadd.f32 %v13902_v44, %v9182_v51  ;;  %v9210_v62 = vmul.f32 %v13902_v44, %v13902_v44  ;;  %v9174_v51 = vadd.f32 %v13893_v46, %v9173_v48  ;;  %v9225_v35 = vadd.f32 %v9224_v4, %v9202_v18 }
 0x76c   :  { %v9211_v1 = vmul.f32 %v13905_v37, %v13905_v37 }
 0x76d   :  { %v9184_v8 = vadd.f32 %v13905_v37, %v9183_v47  ;;  %v9234_v45 = vadd.f32 %v9233_v49, %v9210_v62  ;;  %v9175_v57 = vadd.f32 %v13899_v10, %v9174_v51  ;;  %v9226_v13 = vadd.f32 %v9225_v35, %v9203_v14 }
 0x76e   :  { %v9138_v17 = vpop.f32.mrb[20].mxu1 }
 0x76f   :  { %v13914_v25 = vadd.f32 %v9138_v17, %v13651_v38  ;;  %9185 = vadd.xlane.f32.xlu0 %v9184_v8  ;;  %v9140_v7 = vpop.f32.mrb[21].mxu1  ;;  %v9235_v5 = vadd.f32 %v9234_v45, %v9211_v1 }
 0x770   :  { %v13917_v43 = vadd.f32 %v9140_v7, %v13656_v9  ;;  %v9142_v55 = vpop.f32.mrb[22].mxu1 }
 0x771   :  { %v9192_v42 = vadd.f32 %v13914_v25, %v9191_v16  ;;  %v9218_v39 = vmul.f32 %v13914_v25, %v13914_v25  ;;  %v9143_v63 = vpop.f32.mrb[23].mxu1 }
 0x772   :  { %v9219_v38 = vmul.f32 %v13917_v43, %v13917_v43 }
 0x773   :  { %9236 = vadd.xlane.f32.xlu0 %v9235_v5  ;;  %v9193_v9 = vadd.f32 %v13917_v43, %v9192_v42  ;;  %v9243_v41 = vadd.f32 %v9242_v26, %v9218_v39  ;;  %v9277_v39 = vld [vmem:[%s14101_s4 + $0x8] sm:$0xf]  ;;  %v9276_v5 = vld [vmem:[%s14101_s4] sm:$0xff] }
 0x775   :  { %9194 = vadd.xlane.f32.xlu1 %v9193_v9  ;;  %v9244_v0 = vadd.f32 %v9243_v41, %v9219_v38  ;;  %v9284_v41 = vld [vmem:[%s14102_s5] sm:$0xff] }
 0x777   :  { %9245 = vadd.xlane.f32.xlu0 %v9244_v0 }
 0x779   :  { %9176 = vadd.xlane.f32.xlu1 %v9175_v57  ;;  %v9285_v57 = vld [vmem:[%s14102_s5 + $0x8] sm:$0xf] }
 0x77b   :  { %9227 = vadd.xlane.f32.xlu0 %v9226_v13 }
 0x7fc   :  { %v9186_v58 = vpop.xlane.xlu0 %9185 }
 0x7fd   :  { %v9249_v48 = vrot.slane %v9186_v58, 4 }
 0x800   :  { %v9237_v61 = vpop.xlane.xlu0 %9236 }
 0x801   :  { %v9258_v11 = vrot.slane %v9237_v61, 4 }
 0x802   :  { %v9195_v49 = vpop.xlane.xlu1 %9194 }
 0x803   :  { %v9250_v19 = vrot.slane %v9195_v49, 4 }
 0x804   :  { %v9246_v23 = vpop.xlane.xlu0 %9245 }
 0x805   :  { %v9255_v52 = vadd.f32 %v9250_v19, %v9186_v58  ;;  %v9259_v24 = vrot.slane %v9246_v23, 4  ;;  %v9251_v20 = vsel %vm504_vm6, %v9249_v48, %v9250_v19 }
 0x806   :  { %v9177_v6 = vpop.xlane.xlu1 %9176 }
 0x807   :  { %v9267_v16 = vmul.f32 0.00048828125, %v9255_v52  ;;  %v9264_v4 = vadd.f32 %v9259_v24, %v9237_v61  ;;  %v9254_v33 = vadd.f32 %v9251_v20, %v9177_v6  ;;  %v9260_v34 = vsel %vm504_vm6, %v9258_v11, %v9259_v24 }
 0x808   :  { %v9228_v21 = vpop.xlane.xlu0 %9227 }
 0x809   :  { %v9271_v3 = vmul.f32 %v9267_v16, %v9267_v16  ;;  %v9269_v26 = vmul.f32 0.00048828125, %v9264_v4  ;;  %v9266_v47 = vmul.f32 0.00048828125, %v9254_v33  ;;  %v9263_v62 = vadd.f32 %v9260_v34, %v9228_v21 }
 0x80b   :  { %v9273_v8 = vsub.f32 %v9269_v26, %v9271_v3  ;;  %v9270_v1 = vmul.f32 %v9266_v47, %v9266_v47  ;;  %v9268_v45 = vmul.f32 0.00048828125, %v9263_v62 }
 0x80d   :  { %v9275_v17 = vmax.f32 %v9273_v8, 0.0  ;;  %v9272_v7 = vsub.f32 %v9268_v45, %v9270_v1 }
 0x80f   :  { %v9279_v55 = vadd.f32 1e-05, %v9275_v17  ;;  %v9274_v18 = vmax.f32 %v9272_v7, 0.0 }
 0x811   :  { %11006 = vrsqrt.f32 %v9279_v55  ;;  %v9278_v42 = vadd.f32 1e-05, %v9274_v18 }
 0x813   :  { %11008 = vrsqrt.f32 %v9278_v42 }
 0x81b   :  { %v11007_v63 = vpop.eup %11006 }
 0x81c   :  { %v9283_v38 = vmul.f32 %v11007_v63, %v9277_v39 }
 0x81d   :  { %v11009_v51 = vpop.eup %11008 }
 0x81e   :  { %9297 = vperm.xlu0 %10968, %v9283_v38   ;;  %v9282_v9 = vmul.f32 %v11009_v51, %v9276_v5  ;;  %v9287_v35 = vmul.f32 %v9283_v38, %v9267_v16 }
 0x820   :  { %9292 = vperm.xlu1 %10967, %v9282_v9   ;;  %v9286_v14 = vmul.f32 %v9282_v9, %v9266_v47  ;;  %v9289_v13 = vsub.f32 %v9285_v57, %v9287_v35 }
 0x822   :  { %v9288_v0 = vsub.f32 %v9284_v41, %v9286_v14 }
 0x824   :  { %9318 = vperm.xlu1 %10967, %v9288_v0  }
 0x828   :  { %9323 = vperm.xlu1 %10967, %v9289_v13  }
 0x89d   :  { %v9298_v58 = vpop.permute.xlu0 %9297 }
 0x89e   :  { %v13946_v49 = vmul.f32 %v13800_v56, %v9298_v58  ;;  %v9310_v45 = vmul.f32 %v13839_v31, %v9298_v58  ;;  %v9375_v17 = vrot.slane %v9298_v58, 4  ;;  %v9311_v55 = vmul.f32 %v13846_v22, %v9298_v58 }
 0x89f   :  { %v9293_v61 = vpop.permute.xlu1 %9292  ;;  %v9312_v18 = vmul.f32 %v9298_v58, %v13831_v54  ;;  %v9313_v42 = vmul.f32 %v9298_v58, %v13841_v30  ;;  %v9314_v39 = vmul.f32 %v13902_v44, %v9298_v58  ;;  %v9315_v63 = vmul.f32 %v13905_v37, %v9298_v58 }
 0x8a0   :  { %v9300_v48 = vmul.f32 %v13794_v36, %v9293_v61  ;;  %v9301_v19 = vmul.f32 %v13797_v59, %v9293_v61  ;;  %v9302_v23 = vmul.f32 %v13824_v40, %v9293_v61  ;;  %v9303_v11 = vmul.f32 %v13829_v28, %v9293_v61 }
 0x8a1   :  { %v9304_v52 = vmul.f32 %v9293_v61, %v13819_v15  ;;  %v9305_v24 = vmul.f32 %v9293_v61, %v13826_v27  ;;  %v9306_v20 = vmul.f32 %v13893_v46, %v9293_v61  ;;  %v9307_v6 = vmul.f32 %v13899_v10, %v9293_v61 }
 0x8a2   :  { %v9374_v16 = vrot.slane %v9293_v61, 4  ;;  %v9309_v10 = vmul.f32 %v13803_v53, %v9298_v58 }
 0x8a3   :  { %v9319_v4 = vpop.permute.xlu1 %9318 }
 0x8a4   :  { %v9326_v33 = vadd.f32 %v9319_v4, %v9300_v48  ;;  %v9327_v34 = vadd.f32 %v9319_v4, %v9301_v19  ;;  %v9328_v21 = vadd.f32 %v9319_v4, %v9302_v23  ;;  %v9329_v36 = vadd.f32 %v9319_v4, %v9303_v11 }
 0x8a5   :  { %v9330_v3 = vadd.f32 %v9319_v4, %v9304_v52  ;;  %v9331_v59 = vadd.f32 %v9319_v4, %v9305_v24  ;;  %v9332_v26 = vadd.f32 %v9319_v4, %v9306_v20  ;;  %v9333_v40 = vadd.f32 %v9319_v4, %v9307_v6 }
 0x8a6   :  { %v9342_v47 = vmax.f32 %v9326_v33, 0.0  ;;  %v9343_v28 = vmax.f32 %v9327_v34, 0.0  ;;  %v9344_v62 = vmax.f32 %v9328_v21, 0.0  ;;  %v9345_v15 = vmax.f32 %v9329_v36, 0.0 }
 0x8a7   :  { %v9346_v8 = vmax.f32 %v9330_v3, 0.0  ;;  %v9347_v27 = vmax.f32 %v9331_v59, 0.0  ;;  %v9348_v1 = vmax.f32 %v9332_v26, 0.0  ;;  %v9349_v46 = vmax.f32 %v9333_v40, 0.0  ;;  %v9324_v11 = vpop.permute.xlu1 %9323 }
 0x8a8   :  { %9358 = vst [vmem:[%s14103_s6] sm:$0xff] %v9342_v47  ;;  %9359 = vst [vmem:[%s14103_s6 + $0x8] sm:$0xff] %v9343_v28  ;;  %v13970_v7 = vrot.slane %v9319_v4, 4  ;;  %v9376_v5 = vsel %vm504_vm6, %v9374_v16, %v9375_v17  ;;  %v9379_v38 = vmul.f32 %v13800_v56, %v9374_v16  ;;  %v9380_v51 = vmul.f32 %v13803_v53, %v9374_v16 }
 0x8a9   :  { %9360 = vst [vmem:[%s14103_s6 + $0x10] sm:$0xff] %v9344_v62  ;;  %9361 = vst [vmem:[%s14103_s6 + $0x18] sm:$0xff] %v9345_v15  ;;  %v9381_v9 = vmul.f32 %v13839_v31, %v9374_v16  ;;  %v9382_v41 = vmul.f32 %v13846_v22, %v9374_v16  ;;  %v9383_v14 = vmul.f32 %v9374_v16, %v13831_v54 }
 0x8aa   :  { %9362 = vst [vmem:[%s14103_s6 + $0x20] sm:$0xff] %v9346_v8  ;;  %9363 = vst [vmem:[%s14103_s6 + $0x28] sm:$0xff] %v9347_v27  ;;  %v9384_v0 = vmul.f32 %v9374_v16, %v13841_v30  ;;  %v9385_v35 = vmul.f32 %v13902_v44, %v9374_v16  ;;  %v9386_v57 = vmul.f32 %v13905_v37, %v9374_v16 }
 0x8ab   :  { %9364 = vst [vmem:[%s14103_s6 + $0x30] sm:$0xff] %v9348_v1  ;;  %9365 = vst [vmem:[%s14103_s6 + $0x38] sm:$0xff] %v9349_v46  ;;  %v9400_v13 = vadd.f32 %v13970_v7, %v9379_v38  ;;  %v9401_v58 = vadd.f32 %v13970_v7, %v9380_v51  ;;  %v9402_v56 = vadd.f32 %v13970_v7, %v9381_v9 }
 0x8ac   :  { %v9403_v53 = vadd.f32 %v13970_v7, %v9382_v41  ;;  %v9404_v31 = vadd.f32 %v13970_v7, %v9383_v14  ;;  %v9405_v22 = vadd.f32 %v13970_v7, %v9384_v0  ;;  %v9387_v54 = vmul.f32 %v13806_v32, %v9376_v5 }
 0x8ad   :  { %v9388_v30 = vmul.f32 %v13809_v29, %v9376_v5  ;;  %v9406_v44 = vadd.f32 %v13970_v7, %v9385_v35  ;;  %v9407_v37 = vadd.f32 %v13970_v7, %v9386_v57  ;;  %v9389_v61 = vmul.f32 %v13875_v12, %v9376_v5 }
 0x8ae   :  { %v9390_v48 = vmul.f32 %v13878_v60, %v9376_v5  ;;  %v9391_v19 = vmul.f32 %v9376_v5, %v13866_v2  ;;  %v9392_v23 = vmul.f32 %v9376_v5, %v13870_v50  ;;  %v9393_v52 = vmul.f32 %v13914_v25, %v9376_v5 }
 0x8af   :  { %v9394_v24 = vmul.f32 %v13917_v43, %v9376_v5  ;;  %v9416_v32 = vmax.f32 %v9400_v13, 0.0  ;;  %v9417_v20 = vmax.f32 %v9401_v58, 0.0  ;;  %v9418_v29 = vmax.f32 %v9402_v56, 0.0 }
 0x8b0   :  { %v9419_v6 = vmax.f32 %v9403_v53, 0.0  ;;  %v9420_v16 = vmax.f32 %v9404_v31, 0.0  ;;  %v9421_v4 = vmax.f32 %v9405_v22, 0.0  ;;  %v9422_v33 = vmax.f32 %v9406_v44, 0.0 }
 0x8b1   :  { %v9423_v34 = vmax.f32 %v9407_v37, 0.0  ;;  %v9334_v12 = vadd.f32 %v9324_v11, %v13946_v49  ;;  %v9335_v60 = vadd.f32 %v9324_v11, %v9309_v10  ;;  %v9336_v21 = vadd.f32 %v9324_v11, %v9310_v45 }
 0x8b2   :  { %v9337_v2 = vadd.f32 %v9324_v11, %v9311_v55  ;;  %v9338_v36 = vadd.f32 %v9324_v11, %v9312_v18  ;;  %v9339_v50 = vadd.f32 %v9324_v11, %v9313_v42  ;;  %v9340_v3 = vadd.f32 %v9324_v11, %v9314_v39 }
 0x8b3   :  { %v9341_v59 = vadd.f32 %v9324_v11, %v9315_v63  ;;  %v9350_v25 = vmax.f32 %v9334_v12, 0.0  ;;  %v9351_v26 = vmax.f32 %v9335_v60, 0.0  ;;  %v9352_v43 = vmax.f32 %v9336_v21, 0.0 }
 0x8b4   :  { %v9353_v40 = vmax.f32 %v9337_v2, 0.0  ;;  %v9354_v47 = vmax.f32 %v9338_v36, 0.0  ;;  %v9355_v28 = vmax.f32 %v9339_v50, 0.0  ;;  %v9448_v62 = vrot.slane %v9416_v32, 4 }
 0x8b5   :  { %v9356_v15 = vmax.f32 %v9340_v3, 0.0  ;;  %v9357_v8 = vmax.f32 %v9341_v59, 0.0  ;;  %9366 = vst [vmem:[%s14103_s6 + $0x40] sm:$0xf] %v9350_v25  ;;  %9367 = vst [vmem:[%s14103_s6 + $0x48] sm:$0xf] %v9351_v26 }
 0x8b6   :  { %v9396_v49 = vrot.slane %v9324_v11, 4  ;;  %v9451_v27 = vrot.slane %v9417_v20, 4  ;;  %v9454_v1 = vrot.slane %v9418_v29, 4  ;;  %v9457_v46 = vrot.slane %v9419_v6, 4  ;;  %9368 = vst [vmem:[%s14103_s6 + $0x50] sm:$0xf] %v9352_v43 }
 0x8b7   :  { %v9460_v10 = vrot.slane %v9420_v16, 4  ;;  %9369 = vst [vmem:[%s14103_s6 + $0x58] sm:$0xf] %v9353_v40  ;;  %9370 = vst [vmem:[%s14103_s6 + $0x60] sm:$0xf] %v9354_v47  ;;  %v9463_v45 = vrot.slane %v9421_v4, 4 }
 0x8b8   :  { %9371 = vst [vmem:[%s14103_s6 + $0x68] sm:$0xf] %v9355_v28  ;;  %v9466_v17 = vrot.slane %v9422_v33, 4  ;;  %v9469_v55 = vrot.slane %v9423_v34, 4  ;;  %9372 = vst [vmem:[%s14103_s6 + $0x70] sm:$0xf] %v9356_v15  ;;  %v9397_v18 = vsel %vm504_vm6, %v13970_v7, %v9396_v49 }
 0x8b9   :  { %9373 = vst [vmem:[%s14103_s6 + $0x78] sm:$0xf] %v9357_v8  ;;  %v9408_v42 = vadd.f32 %v9397_v18, %v9387_v54  ;;  %v9409_v39 = vadd.f32 %v9397_v18, %v9388_v30  ;;  %v9410_v63 = vadd.f32 %v9397_v18, %v9389_v61  ;;  %v9411_v5 = vadd.f32 %v9397_v18, %v9390_v48 }
 0x8ba   :  { %v9412_v38 = vadd.f32 %v9397_v18, %v9391_v19  ;;  %v9413_v51 = vadd.f32 %v9397_v18, %v9392_v23  ;;  %v9414_v9 = vadd.f32 %v9397_v18, %v9393_v52  ;;  %v9415_v41 = vadd.f32 %v9397_v18, %v9394_v24 }
 0x8bb   :  { %v9424_v14 = vmax.f32 %v9408_v42, 0.0  ;;  %v9425_v0 = vmax.f32 %v9409_v39, 0.0  ;;  %v9426_v35 = vmax.f32 %v9410_v63, 0.0  ;;  %v9427_v57 = vmax.f32 %v9411_v5, 0.0 }
 0x8bc   :  { %v9428_v13 = vmax.f32 %v9412_v38, 0.0  ;;  %v9429_v58 = vmax.f32 %v9413_v51, 0.0  ;;  %v9430_v56 = vmax.f32 %v9414_v9, 0.0  ;;  %v9431_v53 = vmax.f32 %v9415_v41, 0.0 }
 0x8bd   :  { %v9449_v31 = vrot.slane %v9424_v14, 4  ;;  %v9452_v22 = vrot.slane %v9425_v0, 4  ;;  %v9455_v44 = vrot.slane %v9426_v35, 4  ;;  %v9458_v7 = vrot.slane %v9427_v57, 4 }
 0x8be   :  { %v9461_v54 = vrot.slane %v9428_v13, 4  ;;  %v9464_v30 = vrot.slane %v9429_v58, 4  ;;  %v9467_v37 = vrot.slane %v9430_v56, 4  ;;  %v9470_v61 = vrot.slane %v9431_v53, 4 }
 0x8bf   :  { %v9450_v48 = vsel %vm504_vm6, %v9448_v62, %v9449_v31  ;;  %v9453_v19 = vsel %vm504_vm6, %v9451_v27, %v9452_v22  ;;  %v9456_v23 = vsel %vm504_vm6, %v9454_v1, %v9455_v44  ;;  %v9459_v11 = vsel %vm504_vm6, %v9457_v46, %v9458_v7  ;;  %10122 = vst [vmem:[%s14103_s6 + $0xc0] sm:$0xf] %v9449_v31 }
 0x8c0   :  { %10123 = vst [vmem:[%s14103_s6 + $0xc8] sm:$0xf] %v9452_v22  ;;  %10124 = vst [vmem:[%s14103_s6 + $0xd0] sm:$0xf] %v9455_v44  ;;  %v9462_v52 = vsel %vm504_vm6, %v9460_v10, %v9461_v54  ;;  %v9465_v24 = vsel %vm504_vm6, %v9463_v45, %v9464_v30  ;;  %v9468_v32 = vsel %vm504_vm6, %v9466_v17, %v9467_v37 }
 0x8c1   :  { %10125 = vst [vmem:[%s14103_s6 + $0xd8] sm:$0xf] %v9458_v7  ;;  %v9471_v20 = vsel %vm504_vm6, %v9469_v55, %v9470_v61  ;;  %10114 = vst [vmem:[%s14103_s6 + $0x80] sm:$0xff] %v9450_v48 }
 0x8c2   :  { %10115 = vst [vmem:[%s14103_s6 + $0x88] sm:$0xff] %v9453_v19  ;;  %10116 = vst [vmem:[%s14103_s6 + $0x90] sm:$0xff] %v9456_v23 }
 0x8c3   :  { %10117 = vst [vmem:[%s14103_s6 + $0x98] sm:$0xff] %v9459_v11  ;;  %10126 = vst [vmem:[%s14103_s6 + $0xe0] sm:$0xf] %v9461_v54 }
 0x8c4   :  { %10127 = vst [vmem:[%s14103_s6 + $0xe8] sm:$0xf] %v9464_v30  ;;  %10128 = vst [vmem:[%s14103_s6 + $0xf0] sm:$0xf] %v9467_v37 }
 0x8c5   :  { %10129 = vst [vmem:[%s14103_s6 + $0xf8] sm:$0xf] %v9470_v61  ;;  %10118 = vst [vmem:[%s14103_s6 + $0xa0] sm:$0xff] %v9462_v52 }
 0x8c6   :  { %10119 = vst [vmem:[%s14103_s6 + $0xa8] sm:$0xff] %v9465_v24  ;;  %10120 = vst [vmem:[%s14103_s6 + $0xb0] sm:$0xff] %v9468_v32 }
 0x8c7   :  { %10121 = vst [vmem:[%s14103_s6 + $0xb8] sm:$0xff] %v9471_v20 }

</bundles_post_ra>
